<compile_context>
chip_gen: v7x
topology: tpu7x:2x2x1
jax: 0.10.0
libtpu: 0.0.40
codegen_flags: <defaults>
</compile_context>

<pallas_src>
import functools

import numpy as np
import jax
import jax.numpy as jnp
from jax.experimental import pallas as pl
from jax.experimental.pallas import tpu as pltpu

P0 = 128  # lane offset of the real image inside the padded-flat spatial axis


def _round_up(x, m):
    return (x + m - 1) // m * m


# ----------------------------------------------------------------------------
# In-kernel ConvLSTM cell step: one stacked-K matmul per step
# ----------------------------------------------------------------------------
def _cell_step(comb_ref, patch_ref, w_ref, b_ref, c_ref, *, hid, H, W,
               left_ok, right_ok):
    """One ConvLSTMCell update.

    comb_ref : (C, Lp)      bf16 combined [x | h] in padded-flat layout
    patch_ref: (9*C, M)     bf16 im2col scratch (fully rewritten here)
    w_ref    : (4*hid, 9*C) bf16 stacked conv weights (tap-major K)
    b_ref    : (4*hid, 1)   f32 bias
    c_ref    : (hid, M)     f32 cell state, updated in place
    Returns h_next (hid, M) f32 (caller stores the bf16 copies).
    """
    M = H * W
    C = comb_ref.shape[0]
    base = P0 - (W + 1)

    # build the (9*C, M) patch with 9 shifted, lane-dense copies; only the two
    # horizontal taps need a boundary mask (vertical halo is handled by the
    # zero pad lanes of the padded-flat layout).
    for ki in range(3):
        for kj in range(3):
            s0 = base + ki * W + kj
            blk = comb_ref[:, s0:s0 + M]
            if kj == 0:
                blk = jnp.where(left_ok, blk, jnp.zeros_like(blk))
            elif kj == 2:
                blk = jnp.where(right_ok, blk, jnp.zeros_like(blk))
            tap = ki * 3 + kj
            patch_ref[tap * C:(tap + 1) * C, :] = blk

    # single K = 9*C bf16 matmul, f32 accumulation on the MXU
    z = jnp.dot(w_ref[...], patch_ref[...],
                preferred_element_type=jnp.float32) + b_ref[...]
    i = jax.nn.sigmoid(z[0 * hid:1 * hid])
    f = jax.nn.sigmoid(z[1 * hid:2 * hid])
    o = jax.nn.sigmoid(z[2 * hid:3 * hid])
    g = jnp.tanh(z[3 * hid:4 * hid])
    c_next = f * c_ref[...] + i * g
    h_next = o * jnp.tanh(c_next)
    c_ref[...] = c_next
    return h_next


# ----------------------------------------------------------------------------
# One fused kernel: 3 ConvLSTM cells + both avg-pools + FC head, full sequence
# ----------------------------------------------------------------------------
def convlstm_net_kernel(x_ref, wc1, b1, wc2, b2, wc3, b3, p1_ref, wh_ref, bh_ref,
                        out_ref,
                        comb1, c1s, comb2, c2s, comb3, c3s,
                        patch1, patch2, patch3,
                        *, hid1, hid2, hid3, c0_pad, cin2_pad, cin3_pad,
                        H, W, Hp, Wp):
    T = x_ref.shape[0]
    M, Mp = H * W, Hp * Wp

    # fresh recurrent state for this batch element (grid axis is batch)
    for r in (comb1, c1s, comb2, c2s, comb3, c3s):
        r[...] = jnp.zeros_like(r)

    # boundary masks for the horizontal conv taps (hoisted out of the cells)
    colW = jax.lax.broadcasted_iota(jnp.int32, (1, M), 1) % W
    lW, rW = colW >= 1, colW <= W - 2
    colP = jax.lax.broadcasted_iota(jnp.int32, (1, Mp), 1) % Wp
    lP, rP = colP >= 1, colP <= Wp - 2

    def step(t, _h3_prev):
        # layer 1: current video frame -> x rows of comb1 (pad lanes stay zero)
        comb1[0:c0_pad, :] = x_ref[t]
        h1 = _cell_step(comb1, patch1, wc1, b1, c1s, hid=hid1, H=H, W=W,
                        left_ok=lW, right_ok=rW)
        h1b = h1.astype(jnp.bfloat16)
        comb1[c0_pad:c0_pad + hid1, P0:P0 + M] = h1b      # own hidden state
        comb2[0:hid1, P0:P0 + M] = h1b                    # layer-2 input

        # layer 2
        h2 = _cell_step(comb2, patch2, wc2, b2, c2s, hid=hid2, H=H, W=W,
                        left_ok=lW, right_ok=rW)
        h2b = h2.astype(jnp.bfloat16)
        comb2[cin2_pad:cin2_pad + hid2, P0:P0 + M] = h2b

        # fused 2x2 avg-pool (bf16 MXU matmul) -> layer-3 input
        x3 = jnp.dot(h2b, p1_ref[...], preferred_element_type=jnp.float32)
        comb3[0:hid2, P0:P0 + Mp] = x3.astype(jnp.bfloat16)

        # layer 3 (pooled resolution)
        h3 = _cell_step(comb3, patch3, wc3, b3, c3s, hid=hid3, H=Hp, W=Wp,
                        left_ok=lP, right_ok=rP)
        comb3[cin3_pad:cin3_pad + hid3, P0:P0 + Mp] = h3.astype(jnp.bfloat16)
        return h3

    h3_last = jax.lax.fori_loop(0, T, step,
                                jnp.zeros((hid3, Mp), jnp.float32))

    # fused head: avg-pool-2 + fc1 + fc2 folded into wh_ref/bh_ref in the wrapper
    prod = wh_ref[...] * h3_last[None, :, :]              # (f2, hid3, Mp) f32
    s = jnp.sum(prod, axis=-1)                            # (f2, hid3)
    s = jnp.sum(s, axis=-1, keepdims=True)                # (f2, 1)
    out_ref[...] = s + bh_ref[...]


# ----------------------------------------------------------------------------
# JAX glue (layout / weight plumbing only)
# ----------------------------------------------------------------------------
def make_pool_matrix(H, W, k, s):
    """Per-image AvgPool2d(k, s) as a (H*W, Hp*Wp) matrix (shared over batch/time)."""
    Hp = (H - k) // s + 1
    Wp = (W - k) // s + 1
    P = np.zeros((H * W, Hp * Wp), np.float32)
    for hp in range(Hp):
        for wp in range(Wp):
            for dh in range(k):
                for dw in range(k):
                    P[(hp * s + dh) * W + (wp * s + dw), hp * Wp + wp] = 1.0 / (k * k)
    return jnp.asarray(P), Hp, Wp


def _stack_conv_weight(w, cin, hid, cin_pad):
    """torch (4*hid, cin+hid, 3, 3) -> one stacked bf16 (4*hid, 9*(cin_pad+hid))."""
    wt = jnp.transpose(w, (2, 3, 0, 1)).reshape(9, 4 * hid, cin + hid)
    wx, wh = wt[:, :, :cin], wt[:, :, cin:]
    if cin_pad > cin:
        wx = jnp.pad(wx, ((0, 0), (0, 0), (0, cin_pad - cin)))
    wc = jnp.concatenate([wx, wh], axis=2)                      # (9, 4*hid, C)
    wc = jnp.transpose(wc, (1, 0, 2)).reshape(4 * hid, 9 * (cin_pad + hid))
    return wc.astype(jnp.bfloat16)


def convlstm_forward(x_tbchw, params, cfg):
    """x_tbchw: (T, B, C0, H, W), batch_first=False like the PyTorch module."""
    H, W = cfg["input_size"]
    (c0, hid1), (_, hid2), (_, hid3) = cfg["conv_dim"]
    pk, ps = cfg["pool_size"][0]
    f1, f2 = cfg["fc_size"]
    T, B = x_tbchw.shape[0], x_tbchw.shape[1]
    hp_prec = jax.lax.Precision.HIGHEST

    M = H * W
    p1_mat, Hp, Wp = make_pool_matrix(H, W, pk, ps)
    Mp = Hp * Wp
    p2_mat, Hf, Wf = make_pool_matrix(Hp, Wp, pk, ps)
    Mf = Hf * Wf
    Lp1 = P0 + M + W + 1
    Lp3 = P0 + Mp + Wp + 1

    # channel groups padded to multiples of 16 (bf16 sublane packing alignment)
    c0_pad = _round_up(c0, 16)
    cin2_pad = _round_up(hid1, 16)
    cin3_pad = _round_up(hid2, 16)
    C1, C2, C3 = c0_pad + hid1, cin2_pad + hid2, cin3_pad + hid3

    # input video: (B, T, c0_pad, Lp1) bf16, padded-flat layout
    x = jnp.transpose(x_tbchw, (1, 0, 2, 3, 4)).reshape(B, T, c0, M)
    x = jnp.pad(x, ((0, 0), (0, 0), (0, c0_pad - c0), (P0, W + 1)))
    x = x.astype(jnp.bfloat16)

    wc1 = _stack_conv_weight(params["conv1_w"], c0, hid1, c0_pad)
    wc2 = _stack_conv_weight(params["conv2_w"], hid1, hid2, cin2_pad)
    wc3 = _stack_conv_weight(params["conv3_w"], hid2, hid3, cin3_pad)
    b1 = params["conv1_b"].reshape(4 * hid1, 1)
    b2 = params["conv2_b"].reshape(4 * hid2, 1)
    b3 = params["conv3_b"].reshape(4 * hid3, 1)
    p1_bf = p1_mat.astype(jnp.bfloat16)

    # the head (avg-pool 2, fc1, fc2) is entirely linear -> fold into one tensor
    wcomb = jnp.dot(params["fc1_w"].T, params["fc2_w"].T, precision=hp_prec)
    wcomb = wcomb.reshape(hid3, Mf, f2)
    w_head = jnp.einsum("nm,cmj->jcn", p2_mat, wcomb, precision=hp_prec)  # (f2,hid3,Mp)
    b_head = (jnp.dot(params["fc1_b"], params["fc2_w"].T, precision=hp_prec)
              + params["fc2_b"]).reshape(f2, 1)

    kernel = functools.partial(
        convlstm_net_kernel, hid1=hid1, hid2=hid2, hid3=hid3,
        c0_pad=c0_pad, cin2_pad=cin2_pad, cin3_pad=cin3_pad,
        H=H, W=W, Hp=Hp, Wp=Wp)

    # TODO(synk): for much larger H*W (esp. v7x 64 MiB VMEM) the per-frame
    # buffers / im2col patches must be tiled over spatial row blocks with a halo.
    out = pl.pallas_call(
        kernel,
        out_shape=jax.ShapeDtypeStruct((B, f2, 1), jnp.float32),
        grid=(B,),
        in_specs=[
            pl.BlockSpec((None, T, c0_pad, Lp1), lambda b: (b, 0, 0, 0)),
            pl.BlockSpec((4 * hid1, 9 * C1), lambda b: (0, 0)),
            pl.BlockSpec((4 * hid1, 1), lambda b: (0, 0)),
            pl.BlockSpec((4 * hid2, 9 * C2), lambda b: (0, 0)),
            pl.BlockSpec((4 * hid2, 1), lambda b: (0, 0)),
            pl.BlockSpec((4 * hid3, 9 * C3), lambda b: (0, 0)),
            pl.BlockSpec((4 * hid3, 1), lambda b: (0, 0)),
            pl.BlockSpec((M, Mp), lambda b: (0, 0)),
            pl.BlockSpec((f2, hid3, Mp), lambda b: (0, 0, 0)),
            pl.BlockSpec((f2, 1), lambda b: (0, 0)),
        ],
        out_specs=pl.BlockSpec((None, f2, 1), lambda b: (b, 0, 0)),
        scratch_shapes=[
            pltpu.VMEM((C1, Lp1), jnp.bfloat16),     # comb1 = [x   | h1]
            pltpu.VMEM((hid1, M), jnp.float32),      # c1
            pltpu.VMEM((C2, Lp1), jnp.bfloat16),     # comb2 = [h1  | h2]
            pltpu.VMEM((hid2, M), jnp.float32),      # c2
            pltpu.VMEM((C3, Lp3), jnp.bfloat16),     # comb3 = [pool(h2) | h3]
            pltpu.VMEM((hid3, Mp), jnp.float32),     # c3
            pltpu.VMEM((9 * C1, M), jnp.bfloat16),   # patch1
            pltpu.VMEM((9 * C2, M), jnp.bfloat16),   # patch2
            pltpu.VMEM((9 * C3, Mp), jnp.bfloat16),  # patch3
        ],
        compiler_params=pltpu.CompilerParams(
            dimension_semantics=("parallel",)),
    )(x, wc1, b1, wc2, b2, wc3, b3, p1_bf, w_head, b_head)

    return out.reshape(B, f2)


# ----------------------------------------------------------------------------
# Pure-JAX reference (mirrors the PyTorch module; bf16-rounds MXU operands so
# it matches the kernel's numerics up to accumulation order)
# ----------------------------------------------------------------------------
def _cell_forward_ref(x, h, c, w, b, hid):
    combined = jnp.concatenate([x, h], axis=1)
    combined = combined.astype(jnp.bfloat16).astype(jnp.float32)
    wr = w.astype(jnp.bfloat16).astype(jnp.float32)
    z = jax.lax.conv_general_dilated(
        combined, wr, window_strides=(1, 1), padding="SAME",
        dimension_numbers=("NCHW", "OIHW", "NCHW"),
        precision=jax.lax.Precision.HIGHEST)
    z = z + b.reshape(1, -1, 1, 1)
    i = jax.nn.sigmoid(z[:, 0 * hid:1 * hid])
    f = jax.nn.sigmoid(z[:, 1 * hid:2 * hid])
    o = jax.nn.sigmoid(z[:, 2 * hid:3 * hid])
    g = jnp.tanh(z[:, 3 * hid:4 * hid])
    c_next = f * c + i * g
    return o * jnp.tanh(c_next), c_next


def _avg_pool_ref(x, k, s):
    B, C, H, W = x.shape
    return x.reshape(B, C, H // s, k, W // s, k).mean(axis=(3, 5))


def reference_forward(x_tbchw, params, cfg):
    H, W = cfg["input_size"]
    (c0, hid1), (_, hid2), (_, hid3) = cfg["conv_dim"]
    pk, ps = cfg["pool_size"][0]
    T, B = x_tbchw.shape[0], x_tbchw.shape[1]
    x = jnp.transpose(x_tbchw, (1, 0, 2, 3, 4))          # (B, T, C, H, W)
    Hp, Wp = H // ps, W // ps

    h1 = jnp.zeros((B, hid1, H, W), jnp.float32); c1 = jnp.zeros_like(h1)
    h2 = jnp.zeros((B, hid2, H, W), jnp.float32); c2 = jnp.zeros_like(h2)
    h3 = jnp.zeros((B, hid3, Hp, Wp), jnp.float32); c3 = jnp.zeros_like(h3)
    last = None
    for t in range(T):
        h1, c1 = _cell_forward_ref(x[:, t], h1, c1,
                                   params["conv1_w"], params["conv1_b"], hid1)
        h2, c2 = _cell_forward_ref(h1, h2, c2,
                                   params["conv2_w"], params["conv2_b"], hid2)
        x3 = _avg_pool_ref(h2, pk, ps)
        h3, c3 = _cell_forward_ref(x3, h3, c3,
                                   params["conv3_w"], params["conv3_b"], hid3)
        last = _avg_pool_ref(h3, pk, ps)
    feat = last.reshape(B, -1)
    hfc = jnp.dot(feat, params["fc1_w"].T,
                  precision=jax.lax.Precision.HIGHEST) + params["fc1_b"]
    return jnp.dot(hfc, params["fc2_w"].T,
                   precision=jax.lax.Precision.HIGHEST) + params["fc2_b"]


# ----------------------------------------------------------------------------
# Deterministic parameter construction (synthetic; torch layouts)
# ----------------------------------------------------------------------------
def init_params(key, cfg):
    H, W = cfg["input_size"]
    (c0, hid1), (cin2, hid2), (cin3, hid3) = cfg["conv_dim"]
    pk, ps = cfg["pool_size"][0]
    f1, f2 = cfg["fc_size"]
    Hf, Wf = (H // ps) // ps, (W // ps) // ps
    fc_in = hid3 * Hf * Wf

    ks = jax.random.split(key, 10)
    nrm = lambda k, shp, s: (s * jax.random.normal(k, shp)).astype(jnp.float32)
    return {
        "conv1_w": nrm(ks[0], (4 * hid1, c0 + hid1, 3, 3), 0.1),
        "conv1_b": nrm(ks[1], (4 * hid1,), 0.1),
        "conv2_w": nrm(ks[2], (4 * hid2, cin2 + hid2, 3, 3), 0.1),
        "conv2_b": nrm(ks[3], (4 * hid2,), 0.1),
        "conv3_w": nrm(ks[4], (4 * hid3, cin3 + hid3, 3, 3), 0.1),
        "conv3_b": nrm(ks[5], (4 * hid3,), 0.1),
        "fc1_w": nrm(ks[6], (f1, fc_in), 0.05),
        "fc1_b": nrm(ks[7], (f1,), 0.05),
        "fc2_w": nrm(ks[8], (f2, f1), 0.05),
        "fc2_b": nrm(ks[9], (f2,), 0.05),
    }


# ----------------------------------------------------------------------------
if __name__ == "__main__":
    cfg = {
        "input_size": (16, 16),
        "conv_dim": [[4, 32], [32, 32], [32, 32]],   # (in_dim, hidden_dim) per cell
        "pool_size": [[2, 2], [2, 2]],               # AvgPool2d(kernel=2, stride=2)
        "kernel_size": [(3, 3), (3, 3), (3, 3)],
        "fc_size": [64, 16],
    }
    T, B = 8, 2
    C0, (H, W) = cfg["conv_dim"][0][0], cfg["input_size"]

    key = jax.random.PRNGKey(0)
    k_x, k_p = jax.random.split(key)
    # batch_first=False => input is (seq, batch, C, H, W)
    x = jax.random.normal(k_x, (T, B, C0, H, W), dtype=jnp.float32)
    params = init_params(k_p, cfg)

    fwd = jax.jit(functools.partial(convlstm_forward, cfg=cfg))
    out = jax.block_until_ready(fwd(x, params))

    assert out.shape == (B, cfg["fc_size"][1]), out.shape
    assert bool(jnp.all(jnp.isfinite(out)))

    ref = jax.jit(functools.partial(reference_forward, cfg=cfg))(x, params)
    assert bool(jnp.allclose(out, ref, atol=2e-2, rtol=2e-2)), \
        float(jnp.max(jnp.abs(out - ref)))

    print("KERNEL_OK")
</pallas_src>

<mosaic_0001>
module attributes {stable_mosaic.version = 11 : i64} {
  func.func @convlstm_net_kernel(%arg0: i32, %arg1: memref<1x8x16x401xbf16, #tpu.memory_space<vmem>>, %arg2: memref<128x432xbf16, #tpu.memory_space<vmem>>, %arg3: memref<128x1xf32, #tpu.memory_space<vmem>>, %arg4: memref<128x576xbf16, #tpu.memory_space<vmem>>, %arg5: memref<128x1xf32, #tpu.memory_space<vmem>>, %arg6: memref<128x576xbf16, #tpu.memory_space<vmem>>, %arg7: memref<128x1xf32, #tpu.memory_space<vmem>>, %arg8: memref<256x64xbf16, #tpu.memory_space<vmem>>, %arg9: memref<16x32x64xf32, #tpu.memory_space<vmem>>, %arg10: memref<16x1xf32, #tpu.memory_space<vmem>>, %arg11: memref<1x16x1xf32, #tpu.memory_space<vmem>>, %arg12: memref<48x401xbf16, #tpu.memory_space<vmem>>, %arg13: memref<32x256xf32, #tpu.memory_space<vmem>>, %arg14: memref<64x401xbf16, #tpu.memory_space<vmem>>, %arg15: memref<32x256xf32, #tpu.memory_space<vmem>>, %arg16: memref<64x201xbf16, #tpu.memory_space<vmem>>, %arg17: memref<32x64xf32, #tpu.memory_space<vmem>>, %arg18: memref<432x256xbf16, #tpu.memory_space<vmem>>, %arg19: memref<576x256xbf16, #tpu.memory_space<vmem>>, %arg20: memref<576x64xbf16, #tpu.memory_space<vmem>>) attributes {dimension_semantics = [#tpu.dimension_semantics<parallel>], iteration_bounds = array<i64: 2>, scalar_prefetch = 0 : i64, scratch_operands = 9 : i64, tpu.core_type = #tpu.core_type<tc>, window_params = [{transform_indices = @transform_0, window_bounds = array<i64: 1, 8, 16, 401>}, {pipeline_mode = #tpu.pipeline_mode<synchronous>, transform_indices = @transform_1, window_bounds = array<i64: 128, 432>}, {pipeline_mode = #tpu.pipeline_mode<synchronous>, transform_indices = @transform_2, window_bounds = array<i64: 128, 1>}, {pipeline_mode = #tpu.pipeline_mode<synchronous>, transform_indices = @transform_3, window_bounds = array<i64: 128, 576>}, {pipeline_mode = #tpu.pipeline_mode<synchronous>, transform_indices = @transform_4, window_bounds = array<i64: 128, 1>}, {pipeline_mode = #tpu.pipeline_mode<synchronous>, transform_indices = @transform_5, window_bounds = array<i64: 128, 576>}, {pipeline_mode = #tpu.pipeline_mode<synchronous>, transform_indices = @transform_6, window_bounds = array<i64: 128, 1>}, {pipeline_mode = #tpu.pipeline_mode<synchronous>, transform_indices = @transform_7, window_bounds = array<i64: 256, 64>}, {pipeline_mode = #tpu.pipeline_mode<synchronous>, transform_indices = @transform_8, window_bounds = array<i64: 16, 32, 64>}, {pipeline_mode = #tpu.pipeline_mode<synchronous>, transform_indices = @transform_9, window_bounds = array<i64: 16, 1>}, {transform_indices = @transform_10, window_bounds = array<i64: 1, 16, 1>}]} {
    %cst = arith.constant 0.000000e+00 : bf16
    %0 = vector.broadcast %cst : bf16 to vector<48x401xbf16>
    %c0 = arith.constant 0 : index
    %c0_0 = arith.constant 0 : index
    %1 = vector.load %arg12[%c0, %c0_0] : memref<48x401xbf16, #tpu.memory_space<vmem>>, vector<48x401xbf16>
    tpu.vector_store %arg12[%c0, %c0_0], %0 {strides = array<i32>} : memref<48x401xbf16, #tpu.memory_space<vmem>>, vector<48x401xbf16>,
    %cst_1 = arith.constant 0.000000e+00 : f32
    %2 = vector.broadcast %cst_1 : f32 to vector<32x256xf32>
    %c0_2 = arith.constant 0 : index
    %c0_3 = arith.constant 0 : index
    %3 = vector.load %arg13[%c0_2, %c0_3] : memref<32x256xf32, #tpu.memory_space<vmem>>, vector<32x256xf32>
    tpu.vector_store %arg13[%c0_2, %c0_3], %2 {strides = array<i32>} : memref<32x256xf32, #tpu.memory_space<vmem>>, vector<32x256xf32>,
    %cst_4 = arith.constant 0.000000e+00 : bf16
    %4 = vector.broadcast %cst_4 : bf16 to vector<64x401xbf16>
    %c0_5 = arith.constant 0 : index
    %c0_6 = arith.constant 0 : index
    %5 = vector.load %arg14[%c0_5, %c0_6] : memref<64x401xbf16, #tpu.memory_space<vmem>>, vector<64x401xbf16>
    tpu.vector_store %arg14[%c0_5, %c0_6], %4 {strides = array<i32>} : memref<64x401xbf16, #tpu.memory_space<vmem>>, vector<64x401xbf16>,
    %cst_7 = arith.constant 0.000000e+00 : f32
    %6 = vector.broadcast %cst_7 : f32 to vector<32x256xf32>
    %c0_8 = arith.constant 0 : index
    %c0_9 = arith.constant 0 : index
    %7 = vector.load %arg15[%c0_8, %c0_9] : memref<32x256xf32, #tpu.memory_space<vmem>>, vector<32x256xf32>
    tpu.vector_store %arg15[%c0_8, %c0_9], %6 {strides = array<i32>} : memref<32x256xf32, #tpu.memory_space<vmem>>, vector<32x256xf32>,
    %cst_10 = arith.constant 0.000000e+00 : bf16
    %8 = vector.broadcast %cst_10 : bf16 to vector<64x201xbf16>
    %c0_11 = arith.constant 0 : index
    %c0_12 = arith.constant 0 : index
    %9 = vector.load %arg16[%c0_11, %c0_12] : memref<64x201xbf16, #tpu.memory_space<vmem>>, vector<64x201xbf16>
    tpu.vector_store %arg16[%c0_11, %c0_12], %8 {strides = array<i32>} : memref<64x201xbf16, #tpu.memory_space<vmem>>, vector<64x201xbf16>,
    %cst_13 = arith.constant 0.000000e+00 : f32
    %10 = vector.broadcast %cst_13 : f32 to vector<32x64xf32>
    %c0_14 = arith.constant 0 : index
    %c0_15 = arith.constant 0 : index
    %11 = vector.load %arg17[%c0_14, %c0_15] : memref<32x64xf32, #tpu.memory_space<vmem>>, vector<32x64xf32>
    tpu.vector_store %arg17[%c0_14, %c0_15], %10 {strides = array<i32>} : memref<32x64xf32, #tpu.memory_space<vmem>>, vector<32x64xf32>,
    %12 = tpu.iota {dimensions = array<i32: 1>} : vector<1x256xi32>
    %c16_i32 = arith.constant 16 : i32
    %c0_i32 = arith.constant 0 : i32
    %13 = arith.cmpi eq, %c16_i32, %c0_i32 : i32
    %c1_i32 = arith.constant 1 : i32
    %14 = arith.select %13, %c1_i32, %c16_i32 : i32
    %15 = vector.broadcast %14 : i32 to vector<1x256xi32>
    %16 = arith.remsi %12, %15 : vector<1x256xi32>
    %c0_i32_16 = arith.constant 0 : i32
    %17 = vector.broadcast %c0_i32_16 : i32 to vector<1x256xi32>
    %18 = arith.cmpi ne, %16, %17 : vector<1x256xi32>
    %c0_i32_17 = arith.constant 0 : i32
    %19 = vector.broadcast %c0_i32_17 : i32 to vector<1x256xi32>
    %20 = arith.cmpi slt, %16, %19 : vector<1x256xi32>
    %c0_i32_18 = arith.constant 0 : i32
    %21 = arith.cmpi slt, %14, %c0_i32_18 : i32
    %22 = vector.broadcast %21 : i1 to vector<1x256xi1>
    %23 = vector.broadcast %22 : vector<1x256xi1> to vector<1x256xi1>
    %24 = arith.xori %20, %23 : vector<1x256xi1>
    %25 = arith.andi %24, %18 : vector<1x256xi1>
    %26 = vector.broadcast %14 : i32 to vector<1x256xi32>
    %27 = arith.addi %16, %26 : vector<1x256xi32>
    %28 = arith.select %25, %27, %16 : vector<1x256xi1>, vector<1x256xi32>
    %c1_i32_19 = arith.constant 1 : i32
    %29 = vector.broadcast %c1_i32_19 : i32 to vector<1x256xi32>
    %30 = arith.cmpi sge, %28, %29 : vector<1x256xi32>
    %c14_i32 = arith.constant 14 : i32
    %31 = vector.broadcast %c14_i32 : i32 to vector<1x256xi32>
    %32 = arith.cmpi sle, %28, %31 : vector<1x256xi32>
    %33 = tpu.iota {dimensions = array<i32: 1>} : vector<1x64xi32>
    %c8_i32 = arith.constant 8 : i32
    %c0_i32_20 = arith.constant 0 : i32
    %34 = arith.cmpi eq, %c8_i32, %c0_i32_20 : i32
    %c1_i32_21 = arith.constant 1 : i32
    %35 = arith.select %34, %c1_i32_21, %c8_i32 : i32
    %36 = vector.broadcast %35 : i32 to vector<1x64xi32>
    %37 = arith.remsi %33, %36 : vector<1x64xi32>
    %c0_i32_22 = arith.constant 0 : i32
    %38 = vector.broadcast %c0_i32_22 : i32 to vector<1x64xi32>
    %39 = arith.cmpi ne, %37, %38 : vector<1x64xi32>
    %c0_i32_23 = arith.constant 0 : i32
    %40 = vector.broadcast %c0_i32_23 : i32 to vector<1x64xi32>
    %41 = arith.cmpi slt, %37, %40 : vector<1x64xi32>
    %c0_i32_24 = arith.constant 0 : i32
    %42 = arith.cmpi slt, %35, %c0_i32_24 : i32
    %43 = vector.broadcast %42 : i1 to vector<1x64xi1>
    %44 = vector.broadcast %43 : vector<1x64xi1> to vector<1x64xi1>
    %45 = arith.xori %41, %44 : vector<1x64xi1>
    %46 = arith.andi %45, %39 : vector<1x64xi1>
    %47 = vector.broadcast %35 : i32 to vector<1x64xi32>
    %48 = arith.addi %37, %47 : vector<1x64xi32>
    %49 = arith.select %46, %48, %37 : vector<1x64xi1>, vector<1x64xi32>
    %c1_i32_25 = arith.constant 1 : i32
    %50 = vector.broadcast %c1_i32_25 : i32 to vector<1x64xi32>
    %51 = arith.cmpi sge, %49, %50 : vector<1x64xi32>
    %c6_i32 = arith.constant 6 : i32
    %52 = vector.broadcast %c6_i32 : i32 to vector<1x64xi32>
    %53 = arith.cmpi sle, %49, %52 : vector<1x64xi32>
    %cst_26 = arith.constant 0.000000e+00 : f32
    %54 = vector.broadcast %cst_26 : f32 to vector<32x64xf32>
    %c0_i32_27 = arith.constant 0 : i32
    %c8_i32_28 = arith.constant 8 : i32
    %55 = arith.addi %c0_i32_27, %c8_i32_28 : i32
    %c1_i32_29 = arith.constant 1 : i32
    %56 = scf.for %arg21 = %c0_i32_27 to %55 step %c1_i32_29 iter_args(%arg22 = %54) -> (vector<32x64xf32>)  : i32 {
      %c0_41 = arith.constant 0 : index
      %69 = arith.index_cast %arg21 : i32 to index
      %c0_42 = arith.constant 0 : index
      %c0_43 = arith.constant 0 : index
      %70 = vector.load %arg1[%c0_41, %69, %c0_42, %c0_43] : memref<1x8x16x401xbf16, #tpu.memory_space<vmem>>, vector<1x1x16x401xbf16>
      %71 = vector.shape_cast %70 : vector<1x1x16x401xbf16> to vector<16x401xbf16>
      %c0_44 = arith.constant 0 : index
      %c0_45 = arith.constant 0 : index
      %72 = vector.load %arg12[%c0_44, %c0_45] : memref<48x401xbf16, #tpu.memory_space<vmem>>, vector<16x401xbf16>
      tpu.vector_store %arg12[%c0_44, %c0_45], %71 {strides = array<i32>} : memref<48x401xbf16, #tpu.memory_space<vmem>>, vector<16x401xbf16>,
      %c0_46 = arith.constant 0 : index
      %c111 = arith.constant 111 : index
      %73 = vector.load %arg12[%c0_46, %c111] : memref<48x401xbf16, #tpu.memory_space<vmem>>, vector<48x256xbf16>
      %cst_47 = arith.constant 0.000000e+00 : bf16
      %74 = vector.broadcast %cst_47 : bf16 to vector<48x256xbf16>
      %75 = vector.shape_cast %30 : vector<1x256xi1> to vector<1x256xi1>
      %76 = vector.broadcast %75 : vector<1x256xi1> to vector<48x256xi1>
      %77 = arith.select %76, %73, %74 : vector<48x256xi1>, vector<48x256xbf16>
      %c0_48 = arith.constant 0 : index
      %c0_49 = arith.constant 0 : index
      %78 = vector.load %arg18[%c0_48, %c0_49] : memref<432x256xbf16, #tpu.memory_space<vmem>>, vector<48x256xbf16>
      tpu.vector_store %arg18[%c0_48, %c0_49], %77 {strides = array<i32>} : memref<432x256xbf16, #tpu.memory_space<vmem>>, vector<48x256xbf16>,
      %c0_50 = arith.constant 0 : index
      %c112 = arith.constant 112 : index
      %79 = vector.load %arg12[%c0_50, %c112] : memref<48x401xbf16, #tpu.memory_space<vmem>>, vector<48x256xbf16>
      %c48 = arith.constant 48 : index
      %c0_51 = arith.constant 0 : index
      %80 = vector.load %arg18[%c48, %c0_51] : memref<432x256xbf16, #tpu.memory_space<vmem>>, vector<48x256xbf16>
      tpu.vector_store %arg18[%c48, %c0_51], %79 {strides = array<i32>} : memref<432x256xbf16, #tpu.memory_space<vmem>>, vector<48x256xbf16>,
      %c0_52 = arith.constant 0 : index
      %c113 = arith.constant 113 : index
      %81 = vector.load %arg12[%c0_52, %c113] : memref<48x401xbf16, #tpu.memory_space<vmem>>, vector<48x256xbf16>
      %cst_53 = arith.constant 0.000000e+00 : bf16
      %82 = vector.broadcast %cst_53 : bf16 to vector<48x256xbf16>
      %83 = vector.shape_cast %32 : vector<1x256xi1> to vector<1x256xi1>
      %84 = vector.broadcast %83 : vector<1x256xi1> to vector<48x256xi1>
      %85 = arith.select %84, %81, %82 : vector<48x256xi1>, vector<48x256xbf16>
      %c96 = arith.constant 96 : index
      %c0_54 = arith.constant 0 : index
      %86 = vector.load %arg18[%c96, %c0_54] : memref<432x256xbf16, #tpu.memory_space<vmem>>, vector<48x256xbf16>
      tpu.vector_store %arg18[%c96, %c0_54], %85 {strides = array<i32>} : memref<432x256xbf16, #tpu.memory_space<vmem>>, vector<48x256xbf16>,
      %c0_55 = arith.constant 0 : index
      %c127 = arith.constant 127 : index
      %87 = vector.load %arg12[%c0_55, %c127] : memref<48x401xbf16, #tpu.memory_space<vmem>>, vector<48x256xbf16>
      %cst_56 = arith.constant 0.000000e+00 : bf16
      %88 = vector.broadcast %cst_56 : bf16 to vector<48x256xbf16>
      %89 = vector.shape_cast %30 : vector<1x256xi1> to vector<1x256xi1>
      %90 = vector.broadcast %89 : vector<1x256xi1> to vector<48x256xi1>
      %91 = arith.select %90, %87, %88 : vector<48x256xi1>, vector<48x256xbf16>
      %c144 = arith.constant 144 : index
      %c0_57 = arith.constant 0 : index
      %92 = vector.load %arg18[%c144, %c0_57] : memref<432x256xbf16, #tpu.memory_space<vmem>>, vector<48x256xbf16>
      tpu.vector_store %arg18[%c144, %c0_57], %91 {strides = array<i32>} : memref<432x256xbf16, #tpu.memory_space<vmem>>, vector<48x256xbf16>,
      %c0_58 = arith.constant 0 : index
      %c128 = arith.constant 128 : index
      %93 = vector.load %arg12[%c0_58, %c128] : memref<48x401xbf16, #tpu.memory_space<vmem>>, vector<48x256xbf16>
      %c192 = arith.constant 192 : index
      %c0_59 = arith.constant 0 : index
      %94 = vector.load %arg18[%c192, %c0_59] : memref<432x256xbf16, #tpu.memory_space<vmem>>, vector<48x256xbf16>
      tpu.vector_store %arg18[%c192, %c0_59], %93 {strides = array<i32>} : memref<432x256xbf16, #tpu.memory_space<vmem>>, vector<48x256xbf16>,
      %c0_60 = arith.constant 0 : index
      %c129 = arith.constant 129 : index
      %95 = vector.load %arg12[%c0_60, %c129] : memref<48x401xbf16, #tpu.memory_space<vmem>>, vector<48x256xbf16>
      %cst_61 = arith.constant 0.000000e+00 : bf16
      %96 = vector.broadcast %cst_61 : bf16 to vector<48x256xbf16>
      %97 = vector.shape_cast %32 : vector<1x256xi1> to vector<1x256xi1>
      %98 = vector.broadcast %97 : vector<1x256xi1> to vector<48x256xi1>
      %99 = arith.select %98, %95, %96 : vector<48x256xi1>, vector<48x256xbf16>
      %c240 = arith.constant 240 : index
      %c0_62 = arith.constant 0 : index
      %100 = vector.load %arg18[%c240, %c0_62] : memref<432x256xbf16, #tpu.memory_space<vmem>>, vector<48x256xbf16>
      tpu.vector_store %arg18[%c240, %c0_62], %99 {strides = array<i32>} : memref<432x256xbf16, #tpu.memory_space<vmem>>, vector<48x256xbf16>,
      %c0_63 = arith.constant 0 : index
      %c143 = arith.constant 143 : index
      %101 = vector.load %arg12[%c0_63, %c143] : memref<48x401xbf16, #tpu.memory_space<vmem>>, vector<48x256xbf16>
      %cst_64 = arith.constant 0.000000e+00 : bf16
      %102 = vector.broadcast %cst_64 : bf16 to vector<48x256xbf16>
      %103 = vector.shape_cast %30 : vector<1x256xi1> to vector<1x256xi1>
      %104 = vector.broadcast %103 : vector<1x256xi1> to vector<48x256xi1>
      %105 = arith.select %104, %101, %102 : vector<48x256xi1>, vector<48x256xbf16>
      %c288 = arith.constant 288 : index
      %c0_65 = arith.constant 0 : index
      %106 = vector.load %arg18[%c288, %c0_65] : memref<432x256xbf16, #tpu.memory_space<vmem>>, vector<48x256xbf16>
      tpu.vector_store %arg18[%c288, %c0_65], %105 {strides = array<i32>} : memref<432x256xbf16, #tpu.memory_space<vmem>>, vector<48x256xbf16>,
      %c0_66 = arith.constant 0 : index
      %c144_67 = arith.constant 144 : index
      %107 = vector.load %arg12[%c0_66, %c144_67] : memref<48x401xbf16, #tpu.memory_space<vmem>>, vector<48x256xbf16>
      %c336 = arith.constant 336 : index
      %c0_68 = arith.constant 0 : index
      %108 = vector.load %arg18[%c336, %c0_68] : memref<432x256xbf16, #tpu.memory_space<vmem>>, vector<48x256xbf16>
      tpu.vector_store %arg18[%c336, %c0_68], %107 {strides = array<i32>} : memref<432x256xbf16, #tpu.memory_space<vmem>>, vector<48x256xbf16>,
      %c0_69 = arith.constant 0 : index
      %c145 = arith.constant 145 : index
      %109 = vector.load %arg12[%c0_69, %c145] : memref<48x401xbf16, #tpu.memory_space<vmem>>, vector<48x256xbf16>
      %cst_70 = arith.constant 0.000000e+00 : bf16
      %110 = vector.broadcast %cst_70 : bf16 to vector<48x256xbf16>
      %111 = vector.shape_cast %32 : vector<1x256xi1> to vector<1x256xi1>
      %112 = vector.broadcast %111 : vector<1x256xi1> to vector<48x256xi1>
      %113 = arith.select %112, %109, %110 : vector<48x256xi1>, vector<48x256xbf16>
      %c384 = arith.constant 384 : index
      %c0_71 = arith.constant 0 : index
      %114 = vector.load %arg18[%c384, %c0_71] : memref<432x256xbf16, #tpu.memory_space<vmem>>, vector<48x256xbf16>
      tpu.vector_store %arg18[%c384, %c0_71], %113 {strides = array<i32>} : memref<432x256xbf16, #tpu.memory_space<vmem>>, vector<48x256xbf16>,
      %c0_72 = arith.constant 0 : index
      %c0_73 = arith.constant 0 : index
      %115 = vector.load %arg2[%c0_72, %c0_73] : memref<128x432xbf16, #tpu.memory_space<vmem>>, vector<128x432xbf16>
      %c0_74 = arith.constant 0 : index
      %c0_75 = arith.constant 0 : index
      %116 = vector.load %arg18[%c0_74, %c0_75] : memref<432x256xbf16, #tpu.memory_space<vmem>>, vector<432x256xbf16>
      %cst_76 = arith.constant dense<0.000000e+00> : vector<128x256xf32>
      %117 = tpu.matmul %115, %116, %cst_76 {dimension_numbers = #tpu.dot_dimension_numbers<[1], [0], [0], [1], [0, 0, 1, 1], [], []>} : vector<128x432xbf16>, vector<432x256xbf16>, vector<128x256xf32> -> vector<128x256xf32>
      %c0_77 = arith.constant 0 : index
      %c0_78 = arith.constant 0 : index
      %118 = vector.load %arg3[%c0_77, %c0_78] : memref<128x1xf32, #tpu.memory_space<vmem>>, vector<128x1xf32>
      %119 = vector.broadcast %118 : vector<128x1xf32> to vector<128x256xf32>
      %120 = arith.addf %117, %119 : vector<128x256xf32>
      %121 = vector.extract_strided_slice %120 {offsets = [0, 0], sizes = [32, 256], strides = [1, 1]} : vector<128x256xf32> to vector<32x256xf32>
      %122 = arith.negf %121 : vector<32x256xf32>
      %123 = math.exp %122 : vector<32x256xf32>
      %cst_79 = arith.constant 1.000000e+00 : f32
      %124 = vector.broadcast %cst_79 : f32 to vector<32x256xf32>
      %125 = arith.addf %124, %123 : vector<32x256xf32>
      %126 = arith.divf %124, %125 : vector<32x256xf32>
      %127 = vector.extract_strided_slice %120 {offsets = [32, 0], sizes = [32, 256], strides = [1, 1]} : vector<128x256xf32> to vector<32x256xf32>
      %128 = arith.negf %127 : vector<32x256xf32>
      %129 = math.exp %128 : vector<32x256xf32>
      %cst_80 = arith.constant 1.000000e+00 : f32
      %130 = vector.broadcast %cst_80 : f32 to vector<32x256xf32>
      %131 = arith.addf %130, %129 : vector<32x256xf32>
      %132 = arith.divf %130, %131 : vector<32x256xf32>
      %133 = vector.extract_strided_slice %120 {offsets = [64, 0], sizes = [32, 256], strides = [1, 1]} : vector<128x256xf32> to vector<32x256xf32>
      %134 = arith.negf %133 : vector<32x256xf32>
      %135 = math.exp %134 : vector<32x256xf32>
      %cst_81 = arith.constant 1.000000e+00 : f32
      %136 = vector.broadcast %cst_81 : f32 to vector<32x256xf32>
      %137 = arith.addf %136, %135 : vector<32x256xf32>
      %138 = arith.divf %136, %137 : vector<32x256xf32>
      %139 = vector.extract_strided_slice %120 {offsets = [96, 0], sizes = [32, 256], strides = [1, 1]} : vector<128x256xf32> to vector<32x256xf32>
      %140 = math.tanh %139 : vector<32x256xf32>
      %c0_82 = arith.constant 0 : index
      %c0_83 = arith.constant 0 : index
      %141 = vector.load %arg13[%c0_82, %c0_83] : memref<32x256xf32, #tpu.memory_space<vmem>>, vector<32x256xf32>
      %142 = arith.mulf %132, %141 : vector<32x256xf32>
      %143 = arith.mulf %126, %140 : vector<32x256xf32>
      %144 = arith.addf %142, %143 : vector<32x256xf32>
      %145 = math.tanh %144 : vector<32x256xf32>
      %146 = arith.mulf %138, %145 : vector<32x256xf32>
      %c0_84 = arith.constant 0 : index
      %c0_85 = arith.constant 0 : index
      %147 = vector.load %arg13[%c0_84, %c0_85] : memref<32x256xf32, #tpu.memory_space<vmem>>, vector<32x256xf32>
      tpu.vector_store %arg13[%c0_84, %c0_85], %144 {strides = array<i32>} : memref<32x256xf32, #tpu.memory_space<vmem>>, vector<32x256xf32>,
      %148 = arith.truncf %146 : vector<32x256xf32> to vector<32x256xbf16>
      %c16 = arith.constant 16 : index
      %c128_86 = arith.constant 128 : index
      %149 = vector.load %arg12[%c16, %c128_86] : memref<48x401xbf16, #tpu.memory_space<vmem>>, vector<32x256xbf16>
      tpu.vector_store %arg12[%c16, %c128_86], %148 {strides = array<i32>} : memref<48x401xbf16, #tpu.memory_space<vmem>>, vector<32x256xbf16>,
      %c0_87 = arith.constant 0 : index
      %c128_88 = arith.constant 128 : index
      %150 = vector.load %arg14[%c0_87, %c128_88] : memref<64x401xbf16, #tpu.memory_space<vmem>>, vector<32x256xbf16>
      tpu.vector_store %arg14[%c0_87, %c128_88], %148 {strides = array<i32>} : memref<64x401xbf16, #tpu.memory_space<vmem>>, vector<32x256xbf16>,
      %c0_89 = arith.constant 0 : index
      %c111_90 = arith.constant 111 : index
      %151 = vector.load %arg14[%c0_89, %c111_90] : memref<64x401xbf16, #tpu.memory_space<vmem>>, vector<64x256xbf16>
      %cst_91 = arith.constant 0.000000e+00 : bf16
      %152 = vector.broadcast %cst_91 : bf16 to vector<64x256xbf16>
      %153 = vector.shape_cast %30 : vector<1x256xi1> to vector<1x256xi1>
      %154 = vector.broadcast %153 : vector<1x256xi1> to vector<64x256xi1>
      %155 = arith.select %154, %151, %152 : vector<64x256xi1>, vector<64x256xbf16>
      %c0_92 = arith.constant 0 : index
      %c0_93 = arith.constant 0 : index
      %156 = vector.load %arg19[%c0_92, %c0_93] : memref<576x256xbf16, #tpu.memory_space<vmem>>, vector<64x256xbf16>
      tpu.vector_store %arg19[%c0_92, %c0_93], %155 {strides = array<i32>} : memref<576x256xbf16, #tpu.memory_space<vmem>>, vector<64x256xbf16>,
      %c0_94 = arith.constant 0 : index
      %c112_95 = arith.constant 112 : index
      %157 = vector.load %arg14[%c0_94, %c112_95] : memref<64x401xbf16, #tpu.memory_space<vmem>>, vector<64x256xbf16>
      %c64 = arith.constant 64 : index
      %c0_96 = arith.constant 0 : index
      %158 = vector.load %arg19[%c64, %c0_96] : memref<576x256xbf16, #tpu.memory_space<vmem>>, vector<64x256xbf16>
      tpu.vector_store %arg19[%c64, %c0_96], %157 {strides = array<i32>} : memref<576x256xbf16, #tpu.memory_space<vmem>>, vector<64x256xbf16>,
      %c0_97 = arith.constant 0 : index
      %c113_98 = arith.constant 113 : index
      %159 = vector.load %arg14[%c0_97, %c113_98] : memref<64x401xbf16, #tpu.memory_space<vmem>>, vector<64x256xbf16>
      %cst_99 = arith.constant 0.000000e+00 : bf16
      %160 = vector.broadcast %cst_99 : bf16 to vector<64x256xbf16>
      %161 = vector.shape_cast %32 : vector<1x256xi1> to vector<1x256xi1>
      %162 = vector.broadcast %161 : vector<1x256xi1> to vector<64x256xi1>
      %163 = arith.select %162, %159, %160 : vector<64x256xi1>, vector<64x256xbf16>
      %c128_100 = arith.constant 128 : index
      %c0_101 = arith.constant 0 : index
      %164 = vector.load %arg19[%c128_100, %c0_101] : memref<576x256xbf16, #tpu.memory_space<vmem>>, vector<64x256xbf16>
      tpu.vector_store %arg19[%c128_100, %c0_101], %163 {strides = array<i32>} : memref<576x256xbf16, #tpu.memory_space<vmem>>, vector<64x256xbf16>,
      %c0_102 = arith.constant 0 : index
      %c127_103 = arith.constant 127 : index
      %165 = vector.load %arg14[%c0_102, %c127_103] : memref<64x401xbf16, #tpu.memory_space<vmem>>, vector<64x256xbf16>
      %cst_104 = arith.constant 0.000000e+00 : bf16
      %166 = vector.broadcast %cst_104 : bf16 to vector<64x256xbf16>
      %167 = vector.shape_cast %30 : vector<1x256xi1> to vector<1x256xi1>
      %168 = vector.broadcast %167 : vector<1x256xi1> to vector<64x256xi1>
      %169 = arith.select %168, %165, %166 : vector<64x256xi1>, vector<64x256xbf16>
      %c192_105 = arith.constant 192 : index
      %c0_106 = arith.constant 0 : index
      %170 = vector.load %arg19[%c192_105, %c0_106] : memref<576x256xbf16, #tpu.memory_space<vmem>>, vector<64x256xbf16>
      tpu.vector_store %arg19[%c192_105, %c0_106], %169 {strides = array<i32>} : memref<576x256xbf16, #tpu.memory_space<vmem>>, vector<64x256xbf16>,
      %c0_107 = arith.constant 0 : index
      %c128_108 = arith.constant 128 : index
      %171 = vector.load %arg14[%c0_107, %c128_108] : memref<64x401xbf16, #tpu.memory_space<vmem>>, vector<64x256xbf16>
      %c256 = arith.constant 256 : index
      %c0_109 = arith.constant 0 : index
      %172 = vector.load %arg19[%c256, %c0_109] : memref<576x256xbf16, #tpu.memory_space<vmem>>, vector<64x256xbf16>
      tpu.vector_store %arg19[%c256, %c0_109], %171 {strides = array<i32>} : memref<576x256xbf16, #tpu.memory_space<vmem>>, vector<64x256xbf16>,
      %c0_110 = arith.constant 0 : index
      %c129_111 = arith.constant 129 : index
      %173 = vector.load %arg14[%c0_110, %c129_111] : memref<64x401xbf16, #tpu.memory_space<vmem>>, vector<64x256xbf16>
      %cst_112 = arith.constant 0.000000e+00 : bf16
      %174 = vector.broadcast %cst_112 : bf16 to vector<64x256xbf16>
      %175 = vector.shape_cast %32 : vector<1x256xi1> to vector<1x256xi1>
      %176 = vector.broadcast %175 : vector<1x256xi1> to vector<64x256xi1>
      %177 = arith.select %176, %173, %174 : vector<64x256xi1>, vector<64x256xbf16>
      %c320 = arith.constant 320 : index
      %c0_113 = arith.constant 0 : index
      %178 = vector.load %arg19[%c320, %c0_113] : memref<576x256xbf16, #tpu.memory_space<vmem>>, vector<64x256xbf16>
      tpu.vector_store %arg19[%c320, %c0_113], %177 {strides = array<i32>} : memref<576x256xbf16, #tpu.memory_space<vmem>>, vector<64x256xbf16>,
      %c0_114 = arith.constant 0 : index
      %c143_115 = arith.constant 143 : index
      %179 = vector.load %arg14[%c0_114, %c143_115] : memref<64x401xbf16, #tpu.memory_space<vmem>>, vector<64x256xbf16>
      %cst_116 = arith.constant 0.000000e+00 : bf16
      %180 = vector.broadcast %cst_116 : bf16 to vector<64x256xbf16>
      %181 = vector.shape_cast %30 : vector<1x256xi1> to vector<1x256xi1>
      %182 = vector.broadcast %181 : vector<1x256xi1> to vector<64x256xi1>
      %183 = arith.select %182, %179, %180 : vector<64x256xi1>, vector<64x256xbf16>
      %c384_117 = arith.constant 384 : index
      %c0_118 = arith.constant 0 : index
      %184 = vector.load %arg19[%c384_117, %c0_118] : memref<576x256xbf16, #tpu.memory_space<vmem>>, vector<64x256xbf16>
      tpu.vector_store %arg19[%c384_117, %c0_118], %183 {strides = array<i32>} : memref<576x256xbf16, #tpu.memory_space<vmem>>, vector<64x256xbf16>,
      %c0_119 = arith.constant 0 : index
      %c144_120 = arith.constant 144 : index
      %185 = vector.load %arg14[%c0_119, %c144_120] : memref<64x401xbf16, #tpu.memory_space<vmem>>, vector<64x256xbf16>
      %c448 = arith.constant 448 : index
      %c0_121 = arith.constant 0 : index
      %186 = vector.load %arg19[%c448, %c0_121] : memref<576x256xbf16, #tpu.memory_space<vmem>>, vector<64x256xbf16>
      tpu.vector_store %arg19[%c448, %c0_121], %185 {strides = array<i32>} : memref<576x256xbf16, #tpu.memory_space<vmem>>, vector<64x256xbf16>,
      %c0_122 = arith.constant 0 : index
      %c145_123 = arith.constant 145 : index
      %187 = vector.load %arg14[%c0_122, %c145_123] : memref<64x401xbf16, #tpu.memory_space<vmem>>, vector<64x256xbf16>
      %cst_124 = arith.constant 0.000000e+00 : bf16
      %188 = vector.broadcast %cst_124 : bf16 to vector<64x256xbf16>
      %189 = vector.shape_cast %32 : vector<1x256xi1> to vector<1x256xi1>
      %190 = vector.broadcast %189 : vector<1x256xi1> to vector<64x256xi1>
      %191 = arith.select %190, %187, %188 : vector<64x256xi1>, vector<64x256xbf16>
      %c512 = arith.constant 512 : index
      %c0_125 = arith.constant 0 : index
      %192 = vector.load %arg19[%c512, %c0_125] : memref<576x256xbf16, #tpu.memory_space<vmem>>, vector<64x256xbf16>
      tpu.vector_store %arg19[%c512, %c0_125], %191 {strides = array<i32>} : memref<576x256xbf16, #tpu.memory_space<vmem>>, vector<64x256xbf16>,
      %c0_126 = arith.constant 0 : index
      %c0_127 = arith.constant 0 : index
      %193 = vector.load %arg4[%c0_126, %c0_127] : memref<128x576xbf16, #tpu.memory_space<vmem>>, vector<128x576xbf16>
      %c0_128 = arith.constant 0 : index
      %c0_129 = arith.constant 0 : index
      %194 = vector.load %arg19[%c0_128, %c0_129] : memref<576x256xbf16, #tpu.memory_space<vmem>>, vector<576x256xbf16>
      %cst_130 = arith.constant dense<0.000000e+00> : vector<128x256xf32>
      %195 = tpu.matmul %193, %194, %cst_130 {dimension_numbers = #tpu.dot_dimension_numbers<[1], [0], [0], [1], [0, 0, 1, 1], [], []>} : vector<128x576xbf16>, vector<576x256xbf16>, vector<128x256xf32> -> vector<128x256xf32>
      %c0_131 = arith.constant 0 : index
      %c0_132 = arith.constant 0 : index
      %196 = vector.load %arg5[%c0_131, %c0_132] : memref<128x1xf32, #tpu.memory_space<vmem>>, vector<128x1xf32>
      %197 = vector.broadcast %196 : vector<128x1xf32> to vector<128x256xf32>
      %198 = arith.addf %195, %197 : vector<128x256xf32>
      %199 = vector.extract_strided_slice %198 {offsets = [0, 0], sizes = [32, 256], strides = [1, 1]} : vector<128x256xf32> to vector<32x256xf32>
      %200 = arith.negf %199 : vector<32x256xf32>
      %201 = math.exp %200 : vector<32x256xf32>
      %cst_133 = arith.constant 1.000000e+00 : f32
      %202 = vector.broadcast %cst_133 : f32 to vector<32x256xf32>
      %203 = arith.addf %202, %201 : vector<32x256xf32>
      %204 = arith.divf %202, %203 : vector<32x256xf32>
      %205 = vector.extract_strided_slice %198 {offsets = [32, 0], sizes = [32, 256], strides = [1, 1]} : vector<128x256xf32> to vector<32x256xf32>
      %206 = arith.negf %205 : vector<32x256xf32>
      %207 = math.exp %206 : vector<32x256xf32>
      %cst_134 = arith.constant 1.000000e+00 : f32
      %208 = vector.broadcast %cst_134 : f32 to vector<32x256xf32>
      %209 = arith.addf %208, %207 : vector<32x256xf32>
      %210 = arith.divf %208, %209 : vector<32x256xf32>
      %211 = vector.extract_strided_slice %198 {offsets = [64, 0], sizes = [32, 256], strides = [1, 1]} : vector<128x256xf32> to vector<32x256xf32>
      %212 = arith.negf %211 : vector<32x256xf32>
      %213 = math.exp %212 : vector<32x256xf32>
      %cst_135 = arith.constant 1.000000e+00 : f32
      %214 = vector.broadcast %cst_135 : f32 to vector<32x256xf32>
      %215 = arith.addf %214, %213 : vector<32x256xf32>
      %216 = arith.divf %214, %215 : vector<32x256xf32>
      %217 = vector.extract_strided_slice %198 {offsets = [96, 0], sizes = [32, 256], strides = [1, 1]} : vector<128x256xf32> to vector<32x256xf32>
      %218 = math.tanh %217 : vector<32x256xf32>
      %c0_136 = arith.constant 0 : index
      %c0_137 = arith.constant 0 : index
      %219 = vector.load %arg15[%c0_136, %c0_137] : memref<32x256xf32, #tpu.memory_space<vmem>>, vector<32x256xf32>
      %220 = arith.mulf %210, %219 : vector<32x256xf32>
      %221 = arith.mulf %204, %218 : vector<32x256xf32>
      %222 = arith.addf %220, %221 : vector<32x256xf32>
      %223 = math.tanh %222 : vector<32x256xf32>
      %224 = arith.mulf %216, %223 : vector<32x256xf32>
      %c0_138 = arith.constant 0 : index
      %c0_139 = arith.constant 0 : index
      %225 = vector.load %arg15[%c0_138, %c0_139] : memref<32x256xf32, #tpu.memory_space<vmem>>, vector<32x256xf32>
      tpu.vector_store %arg15[%c0_138, %c0_139], %222 {strides = array<i32>} : memref<32x256xf32, #tpu.memory_space<vmem>>, vector<32x256xf32>,
      %226 = arith.truncf %224 : vector<32x256xf32> to vector<32x256xbf16>
      %c32 = arith.constant 32 : index
      %c128_140 = arith.constant 128 : index
      %227 = vector.load %arg14[%c32, %c128_140] : memref<64x401xbf16, #tpu.memory_space<vmem>>, vector<32x256xbf16>
      tpu.vector_store %arg14[%c32, %c128_140], %226 {strides = array<i32>} : memref<64x401xbf16, #tpu.memory_space<vmem>>, vector<32x256xbf16>,
      %c0_141 = arith.constant 0 : index
      %c0_142 = arith.constant 0 : index
      %228 = vector.load %arg8[%c0_141, %c0_142] : memref<256x64xbf16, #tpu.memory_space<vmem>>, vector<256x64xbf16>
      %cst_143 = arith.constant dense<0.000000e+00> : vector<32x64xf32>
      %229 = tpu.matmul %226, %228, %cst_143 {dimension_numbers = #tpu.dot_dimension_numbers<[1], [0], [0], [1], [0, 0, 1, 1], [], []>} : vector<32x256xbf16>, vector<256x64xbf16>, vector<32x64xf32> -> vector<32x64xf32>
      %230 = arith.truncf %229 : vector<32x64xf32> to vector<32x64xbf16>
      %c0_144 = arith.constant 0 : index
      %c128_145 = arith.constant 128 : index
      %231 = vector.load %arg16[%c0_144, %c128_145] : memref<64x201xbf16, #tpu.memory_space<vmem>>, vector<32x64xbf16>
      tpu.vector_store %arg16[%c0_144, %c128_145], %230 {strides = array<i32>} : memref<64x201xbf16, #tpu.memory_space<vmem>>, vector<32x64xbf16>,
      %c0_146 = arith.constant 0 : index
      %c119 = arith.constant 119 : index
      %232 = vector.load %arg16[%c0_146, %c119] : memref<64x201xbf16, #tpu.memory_space<vmem>>, vector<64x64xbf16>
      %cst_147 = arith.constant 0.000000e+00 : bf16
      %233 = vector.broadcast %cst_147 : bf16 to vector<64x64xbf16>
      %234 = vector.shape_cast %51 : vector<1x64xi1> to vector<1x64xi1>
      %235 = vector.broadcast %234 : vector<1x64xi1> to vector<64x64xi1>
      %236 = arith.select %235, %232, %233 : vector<64x64xi1>, vector<64x64xbf16>
      %c0_148 = arith.constant 0 : index
      %c0_149 = arith.constant 0 : index
      %237 = vector.load %arg20[%c0_148, %c0_149] : memref<576x64xbf16, #tpu.memory_space<vmem>>, vector<64x64xbf16>
      tpu.vector_store %arg20[%c0_148, %c0_149], %236 {strides = array<i32>} : memref<576x64xbf16, #tpu.memory_space<vmem>>, vector<64x64xbf16>,
      %c0_150 = arith.constant 0 : index
      %c120 = arith.constant 120 : index
      %238 = vector.load %arg16[%c0_150, %c120] : memref<64x201xbf16, #tpu.memory_space<vmem>>, vector<64x64xbf16>
      %c64_151 = arith.constant 64 : index
      %c0_152 = arith.constant 0 : index
      %239 = vector.load %arg20[%c64_151, %c0_152] : memref<576x64xbf16, #tpu.memory_space<vmem>>, vector<64x64xbf16>
      tpu.vector_store %arg20[%c64_151, %c0_152], %238 {strides = array<i32>} : memref<576x64xbf16, #tpu.memory_space<vmem>>, vector<64x64xbf16>,
      %c0_153 = arith.constant 0 : index
      %c121 = arith.constant 121 : index
      %240 = vector.load %arg16[%c0_153, %c121] : memref<64x201xbf16, #tpu.memory_space<vmem>>, vector<64x64xbf16>
      %cst_154 = arith.constant 0.000000e+00 : bf16
      %241 = vector.broadcast %cst_154 : bf16 to vector<64x64xbf16>
      %242 = vector.shape_cast %53 : vector<1x64xi1> to vector<1x64xi1>
      %243 = vector.broadcast %242 : vector<1x64xi1> to vector<64x64xi1>
      %244 = arith.select %243, %240, %241 : vector<64x64xi1>, vector<64x64xbf16>
      %c128_155 = arith.constant 128 : index
      %c0_156 = arith.constant 0 : index
      %245 = vector.load %arg20[%c128_155, %c0_156] : memref<576x64xbf16, #tpu.memory_space<vmem>>, vector<64x64xbf16>
      tpu.vector_store %arg20[%c128_155, %c0_156], %244 {strides = array<i32>} : memref<576x64xbf16, #tpu.memory_space<vmem>>, vector<64x64xbf16>,
      %c0_157 = arith.constant 0 : index
      %c127_158 = arith.constant 127 : index
      %246 = vector.load %arg16[%c0_157, %c127_158] : memref<64x201xbf16, #tpu.memory_space<vmem>>, vector<64x64xbf16>
      %cst_159 = arith.constant 0.000000e+00 : bf16
      %247 = vector.broadcast %cst_159 : bf16 to vector<64x64xbf16>
      %248 = vector.shape_cast %51 : vector<1x64xi1> to vector<1x64xi1>
      %249 = vector.broadcast %248 : vector<1x64xi1> to vector<64x64xi1>
      %250 = arith.select %249, %246, %247 : vector<64x64xi1>, vector<64x64xbf16>
      %c192_160 = arith.constant 192 : index
      %c0_161 = arith.constant 0 : index
      %251 = vector.load %arg20[%c192_160, %c0_161] : memref<576x64xbf16, #tpu.memory_space<vmem>>, vector<64x64xbf16>
      tpu.vector_store %arg20[%c192_160, %c0_161], %250 {strides = array<i32>} : memref<576x64xbf16, #tpu.memory_space<vmem>>, vector<64x64xbf16>,
      %c0_162 = arith.constant 0 : index
      %c128_163 = arith.constant 128 : index
      %252 = vector.load %arg16[%c0_162, %c128_163] : memref<64x201xbf16, #tpu.memory_space<vmem>>, vector<64x64xbf16>
      %c256_164 = arith.constant 256 : index
      %c0_165 = arith.constant 0 : index
      %253 = vector.load %arg20[%c256_164, %c0_165] : memref<576x64xbf16, #tpu.memory_space<vmem>>, vector<64x64xbf16>
      tpu.vector_store %arg20[%c256_164, %c0_165], %252 {strides = array<i32>} : memref<576x64xbf16, #tpu.memory_space<vmem>>, vector<64x64xbf16>,
      %c0_166 = arith.constant 0 : index
      %c129_167 = arith.constant 129 : index
      %254 = vector.load %arg16[%c0_166, %c129_167] : memref<64x201xbf16, #tpu.memory_space<vmem>>, vector<64x64xbf16>
      %cst_168 = arith.constant 0.000000e+00 : bf16
      %255 = vector.broadcast %cst_168 : bf16 to vector<64x64xbf16>
      %256 = vector.shape_cast %53 : vector<1x64xi1> to vector<1x64xi1>
      %257 = vector.broadcast %256 : vector<1x64xi1> to vector<64x64xi1>
      %258 = arith.select %257, %254, %255 : vector<64x64xi1>, vector<64x64xbf16>
      %c320_169 = arith.constant 320 : index
      %c0_170 = arith.constant 0 : index
      %259 = vector.load %arg20[%c320_169, %c0_170] : memref<576x64xbf16, #tpu.memory_space<vmem>>, vector<64x64xbf16>
      tpu.vector_store %arg20[%c320_169, %c0_170], %258 {strides = array<i32>} : memref<576x64xbf16, #tpu.memory_space<vmem>>, vector<64x64xbf16>,
      %c0_171 = arith.constant 0 : index
      %c135 = arith.constant 135 : index
      %260 = vector.load %arg16[%c0_171, %c135] : memref<64x201xbf16, #tpu.memory_space<vmem>>, vector<64x64xbf16>
      %cst_172 = arith.constant 0.000000e+00 : bf16
      %261 = vector.broadcast %cst_172 : bf16 to vector<64x64xbf16>
      %262 = vector.shape_cast %51 : vector<1x64xi1> to vector<1x64xi1>
      %263 = vector.broadcast %262 : vector<1x64xi1> to vector<64x64xi1>
      %264 = arith.select %263, %260, %261 : vector<64x64xi1>, vector<64x64xbf16>
      %c384_173 = arith.constant 384 : index
      %c0_174 = arith.constant 0 : index
      %265 = vector.load %arg20[%c384_173, %c0_174] : memref<576x64xbf16, #tpu.memory_space<vmem>>, vector<64x64xbf16>
      tpu.vector_store %arg20[%c384_173, %c0_174], %264 {strides = array<i32>} : memref<576x64xbf16, #tpu.memory_space<vmem>>, vector<64x64xbf16>,
      %c0_175 = arith.constant 0 : index
      %c136 = arith.constant 136 : index
      %266 = vector.load %arg16[%c0_175, %c136] : memref<64x201xbf16, #tpu.memory_space<vmem>>, vector<64x64xbf16>
      %c448_176 = arith.constant 448 : index
      %c0_177 = arith.constant 0 : index
      %267 = vector.load %arg20[%c448_176, %c0_177] : memref<576x64xbf16, #tpu.memory_space<vmem>>, vector<64x64xbf16>
      tpu.vector_store %arg20[%c448_176, %c0_177], %266 {strides = array<i32>} : memref<576x64xbf16, #tpu.memory_space<vmem>>, vector<64x64xbf16>,
      %c0_178 = arith.constant 0 : index
      %c137 = arith.constant 137 : index
      %268 = vector.load %arg16[%c0_178, %c137] : memref<64x201xbf16, #tpu.memory_space<vmem>>, vector<64x64xbf16>
      %cst_179 = arith.constant 0.000000e+00 : bf16
      %269 = vector.broadcast %cst_179 : bf16 to vector<64x64xbf16>
      %270 = vector.shape_cast %53 : vector<1x64xi1> to vector<1x64xi1>
      %271 = vector.broadcast %270 : vector<1x64xi1> to vector<64x64xi1>
      %272 = arith.select %271, %268, %269 : vector<64x64xi1>, vector<64x64xbf16>
      %c512_180 = arith.constant 512 : index
      %c0_181 = arith.constant 0 : index
      %273 = vector.load %arg20[%c512_180, %c0_181] : memref<576x64xbf16, #tpu.memory_space<vmem>>, vector<64x64xbf16>
      tpu.vector_store %arg20[%c512_180, %c0_181], %272 {strides = array<i32>} : memref<576x64xbf16, #tpu.memory_space<vmem>>, vector<64x64xbf16>,
      %c0_182 = arith.constant 0 : index
      %c0_183 = arith.constant 0 : index
      %274 = vector.load %arg6[%c0_182, %c0_183] : memref<128x576xbf16, #tpu.memory_space<vmem>>, vector<128x576xbf16>
      %c0_184 = arith.constant 0 : index
      %c0_185 = arith.constant 0 : index
      %275 = vector.load %arg20[%c0_184, %c0_185] : memref<576x64xbf16, #tpu.memory_space<vmem>>, vector<576x64xbf16>
      %cst_186 = arith.constant dense<0.000000e+00> : vector<128x64xf32>
      %276 = tpu.matmul %274, %275, %cst_186 {dimension_numbers = #tpu.dot_dimension_numbers<[1], [0], [0], [1], [0, 0, 1, 1], [], []>} : vector<128x576xbf16>, vector<576x64xbf16>, vector<128x64xf32> -> vector<128x64xf32>
      %c0_187 = arith.constant 0 : index
      %c0_188 = arith.constant 0 : index
      %277 = vector.load %arg7[%c0_187, %c0_188] : memref<128x1xf32, #tpu.memory_space<vmem>>, vector<128x1xf32>
      %278 = vector.broadcast %277 : vector<128x1xf32> to vector<128x64xf32>
      %279 = arith.addf %276, %278 : vector<128x64xf32>
      %280 = vector.extract_strided_slice %279 {offsets = [0, 0], sizes = [32, 64], strides = [1, 1]} : vector<128x64xf32> to vector<32x64xf32>
      %281 = arith.negf %280 : vector<32x64xf32>
      %282 = math.exp %281 : vector<32x64xf32>
      %cst_189 = arith.constant 1.000000e+00 : f32
      %283 = vector.broadcast %cst_189 : f32 to vector<32x64xf32>
      %284 = arith.addf %283, %282 : vector<32x64xf32>
      %285 = arith.divf %283, %284 : vector<32x64xf32>
      %286 = vector.extract_strided_slice %279 {offsets = [32, 0], sizes = [32, 64], strides = [1, 1]} : vector<128x64xf32> to vector<32x64xf32>
      %287 = arith.negf %286 : vector<32x64xf32>
      %288 = math.exp %287 : vector<32x64xf32>
      %cst_190 = arith.constant 1.000000e+00 : f32
      %289 = vector.broadcast %cst_190 : f32 to vector<32x64xf32>
      %290 = arith.addf %289, %288 : vector<32x64xf32>
      %291 = arith.divf %289, %290 : vector<32x64xf32>
      %292 = vector.extract_strided_slice %279 {offsets = [64, 0], sizes = [32, 64], strides = [1, 1]} : vector<128x64xf32> to vector<32x64xf32>
      %293 = arith.negf %292 : vector<32x64xf32>
      %294 = math.exp %293 : vector<32x64xf32>
      %cst_191 = arith.constant 1.000000e+00 : f32
      %295 = vector.broadcast %cst_191 : f32 to vector<32x64xf32>
      %296 = arith.addf %295, %294 : vector<32x64xf32>
      %297 = arith.divf %295, %296 : vector<32x64xf32>
      %298 = vector.extract_strided_slice %279 {offsets = [96, 0], sizes = [32, 64], strides = [1, 1]} : vector<128x64xf32> to vector<32x64xf32>
      %299 = math.tanh %298 : vector<32x64xf32>
      %c0_192 = arith.constant 0 : index
      %c0_193 = arith.constant 0 : index
      %300 = vector.load %arg17[%c0_192, %c0_193] : memref<32x64xf32, #tpu.memory_space<vmem>>, vector<32x64xf32>
      %301 = arith.mulf %291, %300 : vector<32x64xf32>
      %302 = arith.mulf %285, %299 : vector<32x64xf32>
      %303 = arith.addf %301, %302 : vector<32x64xf32>
      %304 = math.tanh %303 : vector<32x64xf32>
      %305 = arith.mulf %297, %304 : vector<32x64xf32>
      %c0_194 = arith.constant 0 : index
      %c0_195 = arith.constant 0 : index
      %306 = vector.load %arg17[%c0_194, %c0_195] : memref<32x64xf32, #tpu.memory_space<vmem>>, vector<32x64xf32>
      tpu.vector_store %arg17[%c0_194, %c0_195], %303 {strides = array<i32>} : memref<32x64xf32, #tpu.memory_space<vmem>>, vector<32x64xf32>,
      %307 = arith.truncf %305 : vector<32x64xf32> to vector<32x64xbf16>
      %c32_196 = arith.constant 32 : index
      %c128_197 = arith.constant 128 : index
      %308 = vector.load %arg16[%c32_196, %c128_197] : memref<64x201xbf16, #tpu.memory_space<vmem>>, vector<32x64xbf16>
      tpu.vector_store %arg16[%c32_196, %c128_197], %307 {strides = array<i32>} : memref<64x201xbf16, #tpu.memory_space<vmem>>, vector<32x64xbf16>,
      scf.yield %305 : vector<32x64xf32>
    }
    %c8_i32_30 = arith.constant 8 : i32
    %c0_31 = arith.constant 0 : index
    %c0_32 = arith.constant 0 : index
    %c0_33 = arith.constant 0 : index
    %57 = vector.load %arg9[%c0_31, %c0_32, %c0_33] : memref<16x32x64xf32, #tpu.memory_space<vmem>>, vector<16x32x64xf32>
    %58 = vector.shape_cast %56 : vector<32x64xf32> to vector<1x32x64xf32>
    %59 = vector.broadcast %58 : vector<1x32x64xf32> to vector<16x32x64xf32>
    %60 = arith.mulf %57, %59 : vector<16x32x64xf32>
    %cst_34 = arith.constant dense<0.000000e+00> : vector<16x32xf32>
    %61 = vector.multi_reduction <add>, %60, %cst_34 [2] : vector<16x32x64xf32> to vector<16x32xf32>
    %cst_35 = arith.constant dense<0.000000e+00> : vector<16xf32>
    %62 = vector.multi_reduction <add>, %61, %cst_35 [1] : vector<16x32xf32> to vector<16xf32>
    %63 = vector.shape_cast %62 : vector<16xf32> to vector<16x1xf32>
    %c0_36 = arith.constant 0 : index
    %c0_37 = arith.constant 0 : index
    %64 = vector.load %arg10[%c0_36, %c0_37] : memref<16x1xf32, #tpu.memory_space<vmem>>, vector<16x1xf32>
    %65 = arith.addf %63, %64 : vector<16x1xf32>
    %c0_38 = arith.constant 0 : index
    %c0_39 = arith.constant 0 : index
    %c0_40 = arith.constant 0 : index
    %66 = vector.load %arg11[%c0_38, %c0_39, %c0_40] : memref<1x16x1xf32, #tpu.memory_space<vmem>>, vector<1x16x1xf32>
    %67 = vector.shape_cast %66 : vector<1x16x1xf32> to vector<16x1xf32>
    %68 = vector.shape_cast %65 : vector<16x1xf32> to vector<1x16x1xf32>
    tpu.vector_store %arg11[%c0_38, %c0_39, %c0_40], %68 {strides = array<i32>} : memref<1x16x1xf32, #tpu.memory_space<vmem>>, vector<1x16x1xf32>,
    return
  }
  func.func @transform_0(%arg0: i32) -> (i32, i32, i32, i32) {
    %c0_i32 = arith.constant 0 : i32
    %c0_i32_0 = arith.constant 0 : i32
    %c0_i32_1 = arith.constant 0 : i32
    %c0_i32_2 = arith.constant 0 : i32
    return %arg0, %c0_i32, %c0_i32_0, %c0_i32_1 : i32, i32, i32, i32
  }
  func.func @transform_1(%arg0: i32) -> (i32, i32) {
    %c0_i32 = arith.constant 0 : i32
    %c0_i32_0 = arith.constant 0 : i32
    %c0_i32_1 = arith.constant 0 : i32
    return %c0_i32, %c0_i32_0 : i32, i32
  }
  func.func @transform_2(%arg0: i32) -> (i32, i32) {
    %c0_i32 = arith.constant 0 : i32
    %c0_i32_0 = arith.constant 0 : i32
    %c0_i32_1 = arith.constant 0 : i32
    return %c0_i32, %c0_i32_0 : i32, i32
  }
  func.func @transform_3(%arg0: i32) -> (i32, i32) {
    %c0_i32 = arith.constant 0 : i32
    %c0_i32_0 = arith.constant 0 : i32
    %c0_i32_1 = arith.constant 0 : i32
    return %c0_i32, %c0_i32_0 : i32, i32
  }
  func.func @transform_4(%arg0: i32) -> (i32, i32) {
    %c0_i32 = arith.constant 0 : i32
    %c0_i32_0 = arith.constant 0 : i32
    %c0_i32_1 = arith.constant 0 : i32
    return %c0_i32, %c0_i32_0 : i32, i32
  }
  func.func @transform_5(%arg0: i32) -> (i32, i32) {
    %c0_i32 = arith.constant 0 : i32
    %c0_i32_0 = arith.constant 0 : i32
    %c0_i32_1 = arith.constant 0 : i32
    return %c0_i32, %c0_i32_0 : i32, i32
  }
  func.func @transform_6(%arg0: i32) -> (i32, i32) {
    %c0_i32 = arith.constant 0 : i32
    %c0_i32_0 = arith.constant 0 : i32
    %c0_i32_1 = arith.constant 0 : i32
    return %c0_i32, %c0_i32_0 : i32, i32
  }
  func.func @transform_7(%arg0: i32) -> (i32, i32) {
    %c0_i32 = arith.constant 0 : i32
    %c0_i32_0 = arith.constant 0 : i32
    %c0_i32_1 = arith.constant 0 : i32
    return %c0_i32, %c0_i32_0 : i32, i32
  }
  func.func @transform_8(%arg0: i32) -> (i32, i32, i32) {
    %c0_i32 = arith.constant 0 : i32
    %c0_i32_0 = arith.constant 0 : i32
    %c0_i32_1 = arith.constant 0 : i32
    %c0_i32_2 = arith.constant 0 : i32
    return %c0_i32, %c0_i32_0, %c0_i32_1 : i32, i32, i32
  }
  func.func @transform_9(%arg0: i32) -> (i32, i32) {
    %c0_i32 = arith.constant 0 : i32
    %c0_i32_0 = arith.constant 0 : i32
    %c0_i32_1 = arith.constant 0 : i32
    return %c0_i32, %c0_i32_0 : i32, i32
  }
  func.func @transform_10(%arg0: i32) -> (i32, i32, i32) {
    %c0_i32 = arith.constant 0 : i32
    %c0_i32_0 = arith.constant 0 : i32
    %c0_i32_1 = arith.constant 0 : i32
    return %arg0, %c0_i32, %c0_i32_0 : i32, i32, i32
  }
}

</mosaic_0001>

<bundles_post_ra>
// kernel: convlstm_forward.1
= control target key start
LH: loop header
LB: loop body
LE: loop exit
PB: predicated region body
PF: predicated region fallthrough
CT: control target
= control target key end

     0   :  { %s6905_s13 = smov 0   ;;  %s9460_s0 = inlined_call_operand.vmem [shape: bf16[2,8,16,401], index: 0, kind: input, shape index: {}]   ;;  %s9461_s1 = inlined_call_operand.vmem [shape: bf16[128,432], index: 1, kind: input, shape index: {}]   ;;  %s9462_s2 = inlined_call_operand.vmem [shape: f32[128,1], index: 2, kind: input, shape index: {}]   ;;  %s9463_s3 = inlined_call_operand.vmem [shape: bf16[128,576], index: 3, kind: input, shape index: {}]   ;;  %s9464_s4 = inlined_call_operand.vmem [shape: f32[128,1], index: 4, kind: input, shape index: {}]   ;;  %s9465_s5 = inlined_call_operand.vmem [shape: bf16[128,576], index: 5, kind: input, shape index: {}]   ;;  %s9466_s6 = inlined_call_operand.vmem [shape: f32[128,1], index: 6, kind: input, shape index: {}]   ;;  %s9467_s7 = inlined_call_operand.vmem [shape: bf16[256,64], index: 7, kind: input, shape index: {}]   ;;  %s9468_s8 = inlined_call_operand.vmem [shape: f32[16,32,64], index: 8, kind: input, shape index: {}]   ;;  %s9469_s9 = inlined_call_operand.vmem [shape: f32[16,1], index: 9, kind: input, shape index: {}]   ;;  %s9470_s10 = inlined_call_operand.vmem [shape: f32[2,16,1], index: 10, kind: output, shape index: {}]  }
   0x1 LB: > { %s5696_s14 = sadd.s32 4294967295, %s6827_s13   ;;  %p5700_p0 = scmp.ge.s32.totalorder %s6827_s13, 1  ;;  %s6827_s13 = sphi %s6905_s13, %s20_s13  }
   0x2   : > { %p312_p1 = scmp.lt.s32.totalorder %s6827_s13, 3 }
   0x4   : > { %p313_p2 = pnand %p5700_p0, %p312_p1 }
   0x6   : > { %316 = sbr.rel (%p313_p2) target bundleno = 2562 (0xa02), region = 60 }
   0xd   : > { %p6915_p3 = scmp.lt.s32.totalorder %s5696_s14, 1  ;;  %v9498_v0 = vlaneseq  ;;  %vm9486_vm0 = vcmask 138240   ;;  %v6833_v1 = vmov 0   ;;  %v6834_v2 = vmov 0.0   ;;  %s6974_s24 = smov 0  }
   0xe   : > { %368 = vst [vmem:[#allocation2 + $0x20] sm:$0xff] %v6833_v1  ;;  %369 = vst [vmem:[#allocation2 + $0x28] sm:$0xff] %v6833_v1  ;;  %vm409_vm1 = vcmask 596992   ;;  %vm9471_vm2 = vcmask 523264   ;;  %v9515_v8 = vmov 0  ;;  %v9518_v9 = vmov 0 }
   0xf   : > { %370 = vst [vmem:[#allocation2 + $0x30] sm:$0xff] %v6833_v1  ;;  %372 = vst [vmem:[#allocation2 + $0x40] sm:$0xff] %v6833_v1  ;;  %s9805_s14 = smov (!%p6915_p3, %s5696_s14), 1  ;;  %v6931_v3 = vand.u32 127, %v9498_v0  ;;  %v9521_v10 = vmov 0  ;;  %v9524_v11 = vmov 0 }
  0x10   : > { %373 = vst [vmem:[#allocation2 + $0x48] sm:$0xff] %v6833_v1  ;;  %374 = vst [vmem:[#allocation2 + $0x50] sm:$0xff] %v6833_v1  ;;  %s5925_s16 = sshll.u32 %s9805_s14, 8  ;;  %s5926_s17 = sshll.u32 %s9805_s14, 4  ;;  %v9527_v12 = vmov 0  ;;  %v9530_v13 = vmov 0 }
  0x11   : > { %384 = vst [vmem:[#allocation4] sm:$0xff] %v6833_v1  ;;  %388 = vst [vmem:[#allocation4 + $0x20] sm:$0xff] %v6833_v1  ;;  %v424_v4 = vadd.s32 128, %v6931_v3  ;;  %v429_v5 = vand.u32 15, %v6931_v3  ;;  %v457_v6 = vand.u32 7, %v6931_v3  ;;  %s6943_s20 = scalar_lea.vmem %s9460_s0, %s5925_s16  ;;  %s6948_s23 = scalar_lea.vmem %s9470_s10, %s5926_s17 }
  0x12   : > { %392 = vst [vmem:[#allocation4 + $0x40] sm:$0xff] %v6833_v1  ;;  %393 = vst [vmem:[#allocation4 + $0x48] sm:$0xff] %v6833_v1 }
  0x13   : > { %394 = vst [vmem:[#allocation4 + $0x50] sm:$0xff] %v6833_v1  ;;  %396 = vst [vmem:[#allocation4 + $0x60] sm:$0xff] %v6833_v1  ;;  %v436_v7 = vand.u32 15, %v424_v4  ;;  %vm6950_vm3 = vcmp.ge.s32.totalorder %v429_v5, 1  ;;  %vm6954_vm4 = vcmp.le.s32.totalorder %v429_v5, 14  ;;  %vm6958_vm5 = vcmp.ge.s32.totalorder %v457_v6, 1 }
  0x14   : > { %397 = vst [vmem:[#allocation4 + $0x68] sm:$0xff] %v6833_v1  ;;  %398 = vst [vmem:[#allocation4 + $0x70] sm:$0xff] %v6833_v1  ;;  %v9516_v8 = vsel %vm6950_vm3, 4294967295, %v9515_v8  ;;  %v9519_v9 = vsel %vm6954_vm4, 4294967295, %v9518_v9  ;;  %v9522_v10 = vsel %vm6958_vm5, 4294967295, %v9521_v10  ;;  %vm6962_vm6 = vcmp.le.s32.totalorder %v457_v6, 6 }
  0x15   : > { %408 = vst [vmem:[#allocation6] sm:$0xff] %v6833_v1  ;;  %411 = vst [vmem:[#allocation6 + $0x10] sm:$0xff] %v6833_v1  ;;  %v9525_v11 = vsel %vm6962_vm6, 4294967295, %v9524_v11  ;;  %vm6966_vm7 = vcmp.ge.s32.totalorder %v436_v7, 1  ;;  %vm6970_vm8 = vcmp.le.s32.totalorder %v436_v7, 14 }
  0x16   : > { %413 = vst [vmem:[#allocation6 + $0x20] sm:$0xff] %v6833_v1  ;;  %415 = vst [vmem:[#allocation6 + $0x30] sm:$0xff] %v6833_v1  ;;  %v9528_v12 = vsel %vm6966_vm7, 4294967295, %v9527_v12  ;;  %v9531_v13 = vsel %vm6970_vm8, 4294967295, %v9530_v13 }
  0x17   : > { %367 = vst.msk [vmem:[#allocation2 + $0x18] sm:$0xff] %vm9486_vm0, %v6833_v1  ;;  %371 = vst.msk [vmem:[#allocation2 + $0x38] sm:$0xff] %vm9486_vm0, %v6833_v1 }
  0x18   : > { %375 = vst.msk [vmem:[#allocation2 + $0x58] sm:$0xff] %vm9486_vm0, %v6833_v1  ;;  %387 = vst.msk [vmem:[#allocation4 + $0x18] sm:$0xff] %vm9486_vm0, %v6833_v1 }
  0x19   : > { %391 = vst.msk [vmem:[#allocation4 + $0x38] sm:$0xff] %vm9486_vm0, %v6833_v1  ;;  %395 = vst.msk [vmem:[#allocation4 + $0x58] sm:$0xff] %vm9486_vm0, %v6833_v1 }
  0x1a   : > { %399 = vst.msk [vmem:[#allocation4 + $0x78] sm:$0xff] %vm9486_vm0, %v6833_v1  ;;  %376 = vst [vmem:[#allocation3] sm:$0xff] %v6834_v2 }
  0x1b   : > { %377 = vst [vmem:[#allocation3 + $0x8] sm:$0xff] %v6834_v2  ;;  %378 = vst [vmem:[#allocation3 + $0x10] sm:$0xff] %v6834_v2 }
  0x1c   : > { %379 = vst [vmem:[#allocation3 + $0x18] sm:$0xff] %v6834_v2  ;;  %380 = vst [vmem:[#allocation3 + $0x20] sm:$0xff] %v6834_v2 }
  0x1d   : > { %381 = vst [vmem:[#allocation3 + $0x28] sm:$0xff] %v6834_v2  ;;  %382 = vst [vmem:[#allocation3 + $0x30] sm:$0xff] %v6834_v2 }
  0x1e   : > { %383 = vst [vmem:[#allocation3 + $0x38] sm:$0xff] %v6834_v2  ;;  %400 = vst [vmem:[#allocation5] sm:$0xff] %v6834_v2 }
  0x1f   : > { %401 = vst [vmem:[#allocation5 + $0x8] sm:$0xff] %v6834_v2  ;;  %402 = vst [vmem:[#allocation5 + $0x10] sm:$0xff] %v6834_v2 }
  0x20   : > { %403 = vst [vmem:[#allocation5 + $0x18] sm:$0xff] %v6834_v2  ;;  %404 = vst [vmem:[#allocation5 + $0x20] sm:$0xff] %v6834_v2 }
  0x21   : > { %405 = vst [vmem:[#allocation5 + $0x28] sm:$0xff] %v6834_v2  ;;  %406 = vst [vmem:[#allocation5 + $0x30] sm:$0xff] %v6834_v2 }
  0x22   : > { %407 = vst [vmem:[#allocation5 + $0x38] sm:$0xff] %v6834_v2  ;;  %9514 = vst [vmem:[#allocation11_spill] sm:$0xff] %v6931_v3 }
  0x23   : > { %410 = vst.msk [vmem:[#allocation6 + $0x8] sm:$0xff] %vm409_vm1, %v6833_v1  ;;  %412 = vst.msk [vmem:[#allocation6 + $0x18] sm:$0xff] %vm409_vm1, %v6833_v1 }
  0x24   : > { %414 = vst.msk [vmem:[#allocation6 + $0x28] sm:$0xff] %vm409_vm1, %v6833_v1  ;;  %416 = vst.msk [vmem:[#allocation6 + $0x38] sm:$0xff] %vm409_vm1, %v6833_v1 }
  0x25   : > { %418 = vst.msk [vmem:[#allocation7] sm:$0xff] %vm9471_vm2, %v6834_v2  ;;  %419 = vst.msk [vmem:[#allocation7 + $0x8] sm:$0xff] %vm9471_vm2, %v6834_v2 }
  0x26   : > { %420 = vst.msk [vmem:[#allocation7 + $0x10] sm:$0xff] %vm9471_vm2, %v6834_v2  ;;  %421 = vst.msk [vmem:[#allocation7 + $0x18] sm:$0xff] %vm9471_vm2, %v6834_v2 }
  0x27   : > { %9517 = vst [vmem:[#allocation12_spill] sm:$0xff] %v9516_v8  ;;  %9520 = vst [vmem:[#allocation13_spill] sm:$0xff] %v9519_v9 }
  0x28   : > { %9523 = vst [vmem:[#allocation14_spill] sm:$0xff] %v9522_v10  ;;  %9526 = vst [vmem:[#allocation15_spill] sm:$0xff] %v9525_v11 }
  0x29   : > { %9529 = vst [vmem:[#allocation16_spill] sm:$0xff] %v9528_v12  ;;  %9532 = vst [vmem:[#allocation17_spill] sm:$0xff] %v9531_v13 }
  0x2a LB: >> { %vm521_vm9 = vmpackc.low %vm6966_vm7, %vm6950_vm3  ;;  %v9535_v0 = vlaneseq  ;;  %v9499_v15 = vmov 0   ;;  %s5927_s25 = sshll.u32 %s6831_s24, 5  ;;  %s9487_s27 = smov 111   ;;  %v7041_v27 = vld [vmem:[#allocation2 + $0x28] sm:$0xff]  ;;  %v7043_v28 = vld [vmem:[#allocation2 + $0x20] sm:$0xff]  ;;  %vm9540_vm0 = vcmask 138240   ;;  %s6831_s24 = sphi %s6974_s24, %s472_s24  }
  0x2b   : >> { %v522_v16 = vsel %vm521_vm9, 65537, %v9499_v15  ;;  %vm663_vm10 = vmpackc.low %vm6970_vm8, %vm6954_vm4  ;;  %6314 = vset.pattern.permute.xlu1 %v9499_v15  ;;  %6313 = vset.pattern.permute.xlu0 %v9499_v15  ;;  %s7006_s26 = scalar_lea.vmem %s6943_s20, %s5927_s25  ;;  %s6837_s28 = smov 113   ;;  %v7049_v29 = vld [vmem:[#allocation2 + $0x30] sm:$0xff]  ;;  %v7057_v31 = vld [vmem:[#allocation2 + $0x48] sm:$0xff]  ;;  %vm9473_vm12 = vcmask 908288   ;;  %vm9476_vm9 = vcmask 924672  }
  0x2c   : >> { %v6984_v14 = vshrl.u32 %v9535_v0, 7  ;;  %v664_v19 = vsel %vm663_vm10, 65537, %v9499_v15  ;;  %v7017_v24 = vld [vmem:[%s7006_s26 + $0x8] ss:$16 sps:$4 sm:$0xff]   ;;  %v7020_v25 = vld [vmem:[%s7006_s26 + $0x4] ss:$16 sps:$4 sm:$0xff]  }
  0x2d   : >> { %v7023_v26 = vld [vmem:[%s7006_s26] ss:$16 sps:$4 sm:$0xff]   ;;  %s6838_s29 = smov 127   ;;  %s6839_s30 = smov 1   ;;  %v6320_v32 = vld [vmem:[%s7006_s26 + $0xc] ss:$16 sps:$4 sm:$0xff]  }
  0x2e   : >> { %9536 = vst [vmem:[#allocation18_spill] sm:$0xff] %v6984_v14  ;;  %v6994_v17 = vsub.s32 0, %v6984_v14  ;;  %v529_v18 = vsub.s32 4, %v6984_v14  ;;  %s6840_s11 = smov 16   ;;  %v7051_v30 = vld [vmem:[#allocation2 + $0x50] sm:$0xff]  ;;  %507 = vst.msk [vmem:[#allocation2 + $0x18] sm:$0xff] %vm9540_vm0, %v6320_v32 }
  0x2f   : >> { %s6841_s12 = smov 17   ;;  %v7083_v38 = vld [vmem:[#allocation2 + $0x40] sm:$0xff]  ;;  %s6842_s14 = smov 15  }
  0x30   : >> { %9539 = vst [vmem:[#allocation19_spill] sm:$0xff] %v6994_v17  ;;  %v6999_v20 = vrot.slane %v522_v16, %v6994_v17  ;;  %v7002_v21 = vrot.slane %v664_v19, %v6994_v17  ;;  %v7010_v22 = vrot.slane %v522_v16, %v529_v18  ;;  %v7014_v23 = vrot.slane %v664_v19, %v529_v18  ;;  %s9489_s17 = smov 112   ;;  %s6846_s25 = smov 7  }
  0x31   : >> { %s6847_s26 = smov 9   ;;  %s472_s24 = sadd.s32 1, %s6831_s24  }
  0x32   : >> { %531 = vrot.lane.b32.xlu0 %v6999_v20, %s9487_s27  ;;  %673 = vrot.lane.b32.xlu1 %v7002_v21, %s6837_s28  ;;  %p469_p4 = scmp.ge.s32.totalorder %s472_s24, 8  }
  0x33   : > { %vm9739_vm3 = vcmask (%p469_p4), 523264  }
  0x34   : > { %vm9740_vm4 = vmmov (%p469_p4), %vm9739_vm3 }
  0x35   : > { %vm9743_vm7 = vmmov (%p469_p4), %vm9739_vm3 }
  0x36   : >> { %533 = vrot.lane.b32.xlu0 %v7010_v22, %s9487_s27  ;;  %675 = vrot.lane.b32.xlu1 %v7014_v23, %s6837_s28  ;;  %vm9744_vm8 = vmmov (%p469_p4), %vm9739_vm3 }
  0x3a   : >> { %748 = vrot.lane.b32.xlu1 %v7010_v22, %s6838_s29  ;;  %746 = vrot.lane.b32.xlu0 %v6999_v20, %s6838_s29 }
  0x3e   : >> { %831 = vrot.lane.b32.xlu0 %v7002_v21, %s6839_s30  ;;  %833 = vrot.lane.b32.xlu1 %v7014_v23, %s6839_s30 }
  0x42   : >> { %617 = vrot.lane.b32.xlu0 %v7017_v24, %s6840_s11  ;;  %615 = vrot.lane.b32.xlu1 %v7020_v25, %s6840_s11 }
  0x46   : >> { %621 = vrot.lane.b32.xlu0 %v7041_v27, %s6840_s11  ;;  %613 = vrot.lane.b32.xlu1 %v7023_v26, %s6840_s11 }
  0x4a   : >> { %619 = vrot.lane.b32.xlu0 %v7043_v28, %s6840_s11  ;;  %623 = vrot.lane.b32.xlu1 %v7049_v29, %s6840_s11 }
  0x4e   : >> { %629 = vrot.lane.b32.xlu0 %v7051_v30, %s6840_s11  ;;  %627 = vrot.lane.b32.xlu1 %v7057_v31, %s6840_s11 }
  0xa4   : >> { %v7065_v33 = vpop.permute.xlu0 %531  ;;  %v7099_v42 = vpop.permute.xlu1 %673 }
  0xa5   : >> { %vm537_vm11 = vcmp.ne.s16.totalorder %v7065_v33, 0  ;;  %vm9472_vm15 = vcmp.ne.s16.totalorder %v7099_v42, 0 }
  0xa6   : >> { %v540_v34 = vsel %vm537_vm11, %v7023_v26, 0  ;;  %v543_v40 = vsel %vm537_vm11, %v7043_v28, 0  ;;  %v546_v41 = vsel %vm537_vm11, %v7083_v38, 0  ;;  %v682_v45 = vsel %vm9472_vm15, %v7023_v26, 0 }
  0xa7   : >> { %558 = vrot.lane.b32.xlu0 %v540_v34, %s6841_s12  ;;  %v685_v51 = vsel %vm9472_vm15, %v7043_v28, 0  ;;  %v688_v53 = vsel %vm9472_vm15, %v7083_v38, 0  ;;  %vm9496_vm15 = vcmask 1039360   ;;  %v7255_v34 = vld [vmem:[#allocation2 + $0x58] sm:$0xff] }
  0xa8   : >> { %v7072_v35 = vpop.permute.xlu0 %533  ;;  %v7118_v47 = vpop.permute.xlu1 %675 }
  0xa9   : >> { %vm539_vm13 = vcmp.ne.s16.totalorder %v7072_v35, 0  ;;  %v7088_v39 = vsel %vm9473_vm12, %v7065_v33, %v7072_v35  ;;  %vm9474_vm1 = vcmp.ne.s16.totalorder %v7118_v47, 0  ;;  %v7144_v52 = vsel %vm9476_vm9, %v7099_v42, %v7118_v47 }
  0xaa   : >> { %v542_v36 = vsel %vm539_vm13, %v7017_v24, 0  ;;  %v545_v37 = vsel %vm539_vm13, %v7049_v29, 0  ;;  %vm9482_vm14 = vcmp.ne.s16.totalorder %v7088_v39, 0  ;;  %v548_v43 = vsel %vm539_vm13, %v7051_v30, 0 }
  0xab   : >> { %562 = vrot.lane.b32.xlu1 %v542_v36, %s6841_s12  ;;  %568 = vrot.lane.b32.xlu0 %v545_v37, %s6841_s12  ;;  %v541_v44 = vsel %vm9482_vm14, %v7020_v25, 0  ;;  %v544_v46 = vsel %vm9482_vm14, %v7041_v27, 0  ;;  %v547_v48 = vsel %vm9482_vm14, %v7057_v31, 0  ;;  %v684_v49 = vsel %vm9474_vm1, %v7017_v24, 0 }
  0xac   : >> { %v687_v50 = vsel %vm9474_vm1, %v7049_v29, 0  ;;  %v7149_v54 = vpop.permute.xlu1 %748  ;;  %vm9475_vm10 = vcmp.ne.s16.totalorder %v7144_v52, 0  ;;  %v690_v55 = vsel %vm9474_vm1, %v7051_v30, 0  ;;  %v7162_v57 = vpop.permute.xlu0 %746  ;;  %vm9485_vm14 = vcmask 121856  }
  0xad   : >> { %vm9477_vm2 = vcmp.ne.s16.totalorder %v7149_v54, 0  ;;  %v683_v56 = vsel %vm9475_vm10, %v7020_v25, 0  ;;  %vm9481_vm12 = vcmp.ne.s16.totalorder %v7162_v57, 0  ;;  %v686_v59 = vsel %vm9475_vm10, %v7041_v27, 0 }
  0xae   : >> { %v757_v58 = vsel %vm9477_vm2, %v7017_v24, 0  ;;  %v7176_v60 = vsel %vm9496_vm15, %v7162_v57, %v7149_v54  ;;  %v755_v61 = vsel %vm9481_vm12, %v7023_v26, 0  ;;  %v689_v62 = vsel %vm9475_vm10, %v7057_v31, 0 }
  0xaf   : >> { %564 = vrot.lane.b32.xlu1 %v543_v40, %s6841_s12  ;;  %570 = vrot.lane.b32.xlu0 %v546_v41, %s6841_s12  ;;  %vm9478_vm1 = vcmp.ne.s16.totalorder %v7176_v60, 0  ;;  %v758_v1 = vsel %vm9481_vm12, %v7043_v28, 0  ;;  %v760_v2 = vsel %vm9477_vm2, %v7049_v29, 0  ;;  %v763_v6 = vsel %vm9477_vm2, %v7051_v30, 0  ;;  %v7245_v28 = vld [vmem:[#allocation2 + $0x38] sm:$0xff] }
  0xb0   : >> { %v756_v63 = vsel %vm9478_vm1, %v7020_v25, 0  ;;  %v759_v4 = vsel %vm9478_vm1, %v7041_v27, 0  ;;  %v762_v5 = vsel %vm9478_vm1, %v7057_v31, 0  ;;  %v7211_v7 = vpop.permute.xlu0 %831  ;;  %vm9484_vm10 = vcmask 7168   ;;  %v7215_v16 = vpop.permute.xlu1 %833 }
  0xb1   : >> { %vm9479_vm9 = vcmp.ne.s16.totalorder %v7211_v7, 0  ;;  %v761_v18 = vsel %vm9481_vm12, %v7083_v38, 0  ;;  %v7224_v19 = vsel %vm9484_vm10, %v7211_v7, %v7215_v16  ;;  %vm9480_vm1 = vcmp.ne.s16.totalorder %v7215_v16, 0 }
  0xb2   : >> { %vm837_vm2 = vcmp.ne.s16.totalorder %v7224_v19, 0  ;;  %v842_v32 = vsel %vm9479_vm9, %v7041_v27, 0  ;;  %v845_v36 = vsel %vm9479_vm9, %v7057_v31, 0  ;;  %v847_v37 = vsel %vm9480_vm1, %v7255_v34, 0 }
  0xb3   : >> { %574 = vrot.lane.b32.xlu1 %v548_v43, %s6841_s12  ;;  %560 = vrot.lane.b32.xlu0 %v541_v44, %s6841_s12  ;;  %v840_v26 = vsel %vm837_vm2, %v7017_v24, 0 }
  0xb4   : >> { %v616_v40 = vpop.permute.xlu1 %615 }
  0xb7   : >> { %566 = vrot.lane.b32.xlu1 %v544_v46, %s6841_s12  ;;  %700 = vrot.lane.b32.xlu0 %v682_v45, %s6842_s14 }
  0xb8   : >> { %v614_v43 = vpop.permute.xlu1 %613 }
  0xbb   : >> { %625 = vrot.lane.b32.xlu1 %v7083_v38, %s6840_s11  ;;  %572 = vrot.lane.b32.xlu0 %v547_v48, %s6841_s12  ;;  %v618_v38 = vpop.permute.xlu0 %617 }
  0xbc   : >> { %v624_v46 = vpop.permute.xlu1 %623 }
  0xbf   : >> { %704 = vrot.lane.b32.xlu1 %v684_v49, %s6842_s14  ;;  %710 = vrot.lane.b32.xlu0 %v687_v50, %s6842_s14  ;;  %v622_v41 = vpop.permute.xlu0 %621 }
  0xc0   : >> { %v628_v48 = vpop.permute.xlu1 %627 }
  0xc3   : >> { %706 = vrot.lane.b32.xlu1 %v685_v51, %s6842_s14  ;;  %902 = vrot.lane.b32.xlu0 %v6999_v20, %s6842_s14  ;;  %v839_v20 = vsel %vm9479_vm9, %v7020_v25, 0  ;;  %v620_v44 = vpop.permute.xlu0 %619  ;;  %vm9483_vm9 = vcmask 130048  }
  0xc7   : >> { %904 = vrot.lane.b32.xlu1 %v7010_v22, %s6842_s14  ;;  %712 = vrot.lane.b32.xlu0 %v688_v53, %s6842_s14  ;;  %v7234_v22 = vld [vmem:[#allocation2 + $0x18] sm:$0xff]  ;;  %v630_v45 = vpop.permute.xlu0 %629 }
  0xcb   : >> { %716 = vrot.lane.b32.xlu1 %v690_v55, %s6842_s14  ;;  %702 = vrot.lane.b32.xlu0 %v683_v56, %s6842_s14  ;;  %v6323_v56 = vld [vmem:[%s9461_s1 + $0x4] ss:$16 sps:$4 sm:$0xff]  }
  0xcc   : >> { %1481 = vmatprep.mubr.bf16.mxu0 %v6323_v56 }
  0xcf   : >> { %708 = vrot.lane.b32.xlu1 %v686_v59, %s6842_s14  ;;  %777 = vrot.lane.b32.xlu0 %v757_v58, %s6839_s30 }
  0xd3   : >> { %773 = vrot.lane.b32.xlu1 %v755_v61, %s6839_s30  ;;  %714 = vrot.lane.b32.xlu0 %v689_v62, %s6842_s14 }
  0xd7   : >> { %775 = vrot.lane.b32.xlu1 %v756_v63, %s6839_s30  ;;  %779 = vrot.lane.b32.xlu0 %v758_v1, %s6839_s30 }
  0xdb   : >> { %783 = vrot.lane.b32.xlu1 %v760_v2, %s6839_s30  ;;  %781 = vrot.lane.b32.xlu0 %v759_v4, %s6839_s30 }
  0xdf   : >> { %787 = vrot.lane.b32.xlu1 %v762_v5, %s6839_s30  ;;  %789 = vrot.lane.b32.xlu0 %v763_v6, %s6839_s30 }
  0xe3   : >> { %785 = vrot.lane.b32.xlu1 %v761_v18, %s6839_s30  ;;  %1028 = vrot.lane.b32.xlu0 %v7002_v21, %s6841_s12  ;;  %v841_v21 = vsel %vm9480_vm1, %v7234_v22, 0 }
  0xe7   : >> { %1030 = vrot.lane.b32.xlu1 %v7014_v23, %s6841_s12  ;;  %857 = vrot.lane.b32.xlu0 %v839_v20, %s6838_s29  ;;  %v844_v23 = vsel %vm9480_vm1, %v7245_v28, 0 }
  0xeb   : >> { %859 = vrot.lane.b32.xlu0 %v840_v26, %s6838_s29  ;;  %861 = vrot.lane.b32.xlu1 %v841_v21, %s6838_s29  ;;  %v633_v26 = vsel %vm9483_vm9, %v616_v40, %v618_v38 }
  0xef   : >> { %867 = vrot.lane.b32.xlu0 %v844_v23, %s6838_s29  ;;  %863 = vrot.lane.b32.xlu1 %v842_v32, %s6838_s29  ;;  %v632_v32 = vsel %vm9483_vm9, %v614_v43, %v616_v40  ;;  %v637_v40 = vsel %vm9483_vm9, %v628_v48, %v630_v45 }
  0xf3   : >> { %869 = vrot.lane.b32.xlu0 %v845_v36, %s6838_s29  ;;  %873 = vrot.lane.b32.xlu1 %v847_v37, %s6838_s29  ;;  %v635_v36 = vsel %vm9483_vm9, %v622_v41, %v624_v46 }
 0x119   : >> { %v559_v49 = vpop.permute.xlu0 %558 }
 0x11d   : >> { %v563_v50 = vpop.permute.xlu1 %562  ;;  %v569_v51 = vpop.permute.xlu0 %568 }
 0x121   : >> { %v565_v53 = vpop.permute.xlu1 %564  ;;  %v571_v55 = vpop.permute.xlu0 %570 }
 0x125   : >> { %v575_v58 = vpop.permute.xlu1 %574  ;;  %v561_v59 = vpop.permute.xlu0 %560 }
 0x126   : >> { %v578_v61 = vsel %vm9540_vm0, %v561_v59, %v563_v50  ;;  %v577_v62 = vsel %vm9540_vm0, %v559_v49, %v561_v59  ;;  %v634_v50 = vsel %vm9483_vm9, %v620_v44, %v622_v41  ;;  %v843_v59 = vsel %vm837_vm2, %v7049_v29, 0 }
 0x127   : >> { %1449 = vmatprep.subr.bf16.mxu0 %v578_v61 }
 0x128   : >> { %1450 = vmatpush1.bf16.msra.mxu0 %v577_v62 }
 0x129   : >> { %v567_v63 = vpop.permute.xlu1 %566  ;;  %v701_v1 = vpop.permute.xlu0 %700 }
 0x12a   : >> { %v580_v2 = vsel %vm9540_vm0, %v567_v63, %v569_v51  ;;  %v579_v4 = vsel %vm9540_vm0, %v565_v53, %v567_v63 }
 0x12b   : >> { %1451 = vmatprep.subr.bf16.mxu0 %v580_v2  ;;  %v846_v2 = vsel %vm837_vm2, %v7051_v30, 0 }
 0x12c   : >> { %1452 = vmatpush1.bf16.msra.mxu0 %v579_v4 }
 0x12d   : >> { %v626_v5 = vpop.permute.xlu1 %625  ;;  %v573_v6 = vpop.permute.xlu0 %572 }
 0x12e   : >> { %v582_v18 = vsel %vm9540_vm0, %v573_v6, %v575_v58  ;;  %v581_v20 = vsel %vm9540_vm0, %v571_v55, %v573_v6  ;;  %v636_v44 = vsel %vm9483_vm9, %v626_v5, %v628_v48 }
 0x12f   : >> { %1453 = vmatprep.subr.bf16.mxu0 %v582_v18 }
 0x130   : >> { %1454 = vmatpush1.bf16.msra.mxu0 %v581_v20 }
 0x131   : >> { %v705_v21 = vpop.permute.xlu1 %704  ;;  %1455 = vmatprep.subr.bf16.mxu0 %v633_v26  ;;  %v711_v23 = vpop.permute.xlu0 %710 }
 0x134   : >> { %1456 = vmatpush1.bf16.msra.mxu0 %v632_v32 }
 0x135   : >> { %v707_v37 = vpop.permute.xlu1 %706  ;;  %1457 = vmatprep.subr.bf16.mxu0 %v635_v36  ;;  %v7279_v49 = vpop.permute.xlu0 %902 }
 0x136   : >> { %vm9494_vm1 = vcmp.ne.s16.totalorder %v7279_v49, 0 }
 0x137   : >> { %v910_v38 = vsel %vm9494_vm1, %v7020_v25, 0  ;;  %v913_v58 = vsel %vm9494_vm1, %v7041_v27, 0 }
 0x138   : >> { %1458 = vmatpush1.bf16.msra.mxu0 %v634_v50  ;;  %928 = vrot.lane.b32.xlu1 %v910_v38, %s6837_s28  ;;  %v916_v38 = vsel %vm9494_vm1, %v7057_v31, 0 }
 0x139   : >> { %v7288_v43 = vpop.permute.xlu1 %904  ;;  %1459 = vmatprep.subr.bf16.mxu0 %v637_v40  ;;  %v713_v46 = vpop.permute.xlu0 %712 }
 0x13a   : >> { %vm909_vm12 = vcmp.ne.s16.totalorder %v7288_v43, 0  ;;  %v7303_v55 = vsel %vm9485_vm14, %v7279_v49, %v7288_v43 }
 0x13b   : >> { %v912_v41 = vsel %vm909_vm12, %v7234_v22, 0  ;;  %v915_v51 = vsel %vm909_vm12, %v7245_v28, 0  ;;  %vm9495_vm9 = vcmp.ne.s16.totalorder %v7303_v55, 0  ;;  %v918_v50 = vsel %vm909_vm12, %v7255_v34, 0 }
 0x13c   : >> { %932 = vrot.lane.b32.xlu0 %v912_v41, %s6837_s28  ;;  %1460 = vmatpush1.bf16.msra.mxu0 %v636_v44  ;;  %v911_v4 = vsel %vm9495_vm9, %v7017_v24, 0  ;;  %v914_v26 = vsel %vm9495_vm9, %v7049_v29, 0 }
 0x13d   : >> { %938 = vrot.lane.b32.xlu1 %v915_v51, %s6837_s28  ;;  %v717_v45 = vpop.permute.xlu1 %716  ;;  %v703_v53 = vpop.permute.xlu0 %702 }
 0x13e   : >> { %v720_v56 = vsel %vm9485_vm14, %v703_v53, %v705_v21  ;;  %v719_v48 = vsel %vm9485_vm14, %v701_v1, %v703_v53  ;;  %v917_v21 = vsel %vm9495_vm9, %v7051_v30, 0 }
 0x13f   : >> { %1461 = vmatprep.subr.bf16.mxu0 %v720_v56 }
 0x140   : >> { %934 = vrot.lane.b32.xlu0 %v913_v58, %s6837_s28  ;;  %1462 = vmatpush1.bf16.msra.mxu0 %v719_v48 }
 0x141   : >> { %865 = vrot.lane.b32.xlu1 %v843_v59, %s6838_s29  ;;  %v709_v61 = vpop.permute.xlu1 %708  ;;  %v778_v62 = vpop.permute.xlu0 %777 }
 0x142   : >> { %v722_v63 = vsel %vm9485_vm14, %v709_v61, %v711_v23  ;;  %v721_v1 = vsel %vm9485_vm14, %v707_v37, %v709_v61 }
 0x143   : >> { %1463 = vmatprep.subr.bf16.mxu0 %v722_v63 }
 0x144   : >> { %871 = vrot.lane.b32.xlu0 %v846_v2, %s6838_s29  ;;  %1464 = vmatpush1.bf16.msra.mxu0 %v721_v1 }
 0x145   : >> { %930 = vrot.lane.b32.xlu1 %v911_v4, %s6837_s28  ;;  %v774_v5 = vpop.permute.xlu1 %773  ;;  %v715_v6 = vpop.permute.xlu0 %714 }
 0x146   : >> { %v724_v18 = vsel %vm9485_vm14, %v715_v6, %v717_v45  ;;  %v723_v20 = vsel %vm9485_vm14, %v713_v46, %v715_v6 }
 0x147   : >> { %1465 = vmatprep.subr.bf16.mxu0 %v724_v18  ;;  %v6321_v18 = vld [vmem:[%s9461_s1] ss:$16 sps:$4 sm:$0xff]  }
 0x148   : >> { %936 = vrot.lane.b32.xlu0 %v914_v26, %s6837_s28  ;;  %1466 = vmatpush1.bf16.msra.mxu0 %v723_v20  ;;  %v6324_v20 = vld [vmem:[%s9461_s1 + $0x24] ss:$16 sps:$4 sm:$0xff]  }
 0x149   : >> { %942 = vrot.lane.b32.xlu1 %v917_v21, %s6837_s28  ;;  %v776_v23 = vpop.permute.xlu1 %775  ;;  %v780_v32 = vpop.permute.xlu0 %779 }
 0x14a   : >> { %v793_v36 = vsel %vm9484_vm10, %v776_v23, %v778_v62  ;;  %v792_v37 = vsel %vm9484_vm10, %v774_v5, %v776_v23  ;;  %v1176_v23 = vld [vmem:[%s9462_s2] sm:$0xff] }
 0x14b   : >> { %1467 = vmatprep.subr.bf16.mxu0 %v793_v36  ;;  %v6329_v36 = vld [vmem:[%s9461_s1 + $0x40] ss:$16 sps:$4 sm:$0xff]  }
 0x14c   : >> { %944 = vrot.lane.b32.xlu0 %v918_v50, %s6837_s28  ;;  %1468 = vmatpush1.bf16.msra.mxu0 %v792_v37  ;;  %v6330_v37 = vld [vmem:[%s9461_s1 + $0x64] ss:$16 sps:$4 sm:$0xff]   ;;  %v1179_v50 = vld [vmem:[%s9462_s2 + $0x18] sm:$0xff] }
 0x14d   : >> { %940 = vrot.lane.b32.xlu1 %v916_v38, %s6837_s28  ;;  %v784_v40 = vpop.permute.xlu1 %783  ;;  %v782_v46 = vpop.permute.xlu0 %781  ;;  %v1178_v38 = vld [vmem:[%s9462_s2 + $0x10] sm:$0xff] }
 0x14e   : >> { %v795_v41 = vsel %vm9484_vm10, %v782_v46, %v784_v40  ;;  %v794_v44 = vsel %vm9484_vm10, %v780_v32, %v782_v46  ;;  %v1181_v32 = vld [vmem:[%s9462_s2 + $0x28] sm:$0xff]  ;;  %v1183_v40 = vld [vmem:[%s9462_s2 + $0x38] sm:$0xff]  ;;  %v1182_v46 = vld [vmem:[%s9462_s2 + $0x30] sm:$0xff] }
 0x14f   : >> { %1469 = vmatprep.subr.bf16.mxu0 %v795_v41  ;;  %v6332_v41 = vld [vmem:[%s9461_s1 + $0x60] ss:$16 sps:$4 sm:$0xff]  }
 0x150   : >> { %984 = vrot.lane.b32.xlu0 %v7017_v24, %s9489_s17  ;;  %1470 = vmatpush1.bf16.msra.mxu0 %v794_v44  ;;  %v6333_v44 = vld [vmem:[%s9461_s1 + $0x84] ss:$16 sps:$4 sm:$0xff]  }
 0x151   : >> { %986 = vrot.lane.b32.xlu1 %v7234_v22, %s9489_s17  ;;  %v788_v51 = vpop.permute.xlu1 %787  ;;  %v790_v45 = vpop.permute.xlu0 %789 }
 0x152   : >> { %v797_v53 = vsel %vm9484_vm10, %v788_v51, %v790_v45  ;;  %v1184_v45 = vld [vmem:[%s9462_s2 + $0x40] sm:$0xff] }
 0x153   : >> { %1471 = vmatprep.subr.bf16.mxu0 %v797_v53  ;;  %v1189_v53 = vld [vmem:[%s9462_s2 + $0x68] sm:$0xff] }
 0x154   : >> { %982 = vrot.lane.b32.xlu0 %v7020_v25, %s9489_s17 }
 0x155   : >> { %990 = vrot.lane.b32.xlu1 %v7049_v29, %s9489_s17  ;;  %v786_v56 = vpop.permute.xlu1 %785  ;;  %v7358_v58 = vpop.permute.xlu0 %1028 }
 0x156   : >> { %v796_v48 = vsel %vm9484_vm10, %v786_v56, %v788_v51  ;;  %v1185_v51 = vld [vmem:[%s9462_s2 + $0x48] sm:$0xff]  ;;  %v1188_v56 = vld [vmem:[%s9462_s2 + $0x60] sm:$0xff] }
 0x157   : >> { %1472 = vmatpush1.bf16.msra.mxu0 %v796_v48  ;;  %v6335_v48 = vld [vmem:[%s9461_s1 + $0x80] ss:$16 sps:$4 sm:$0xff]  }
 0x158   : >> { %992 = vrot.lane.b32.xlu0 %v7245_v28, %s9489_s17  ;;  %1473 = vmatprep.subr.bf16.mxu0 %v7017_v24 }
 0x159   : >> { %988 = vrot.lane.b32.xlu1 %v7041_v27, %s9489_s17  ;;  %v7365_v59 = vpop.permute.xlu1 %1030  ;;  %v858_v62 = vpop.permute.xlu0 %857 }
 0x15a   : >> { %v7370_v61 = vsel %vm9540_vm0, %v7358_v58, %v7365_v59  ;;  %vm9492_vm14 = vcmp.ne.s16.totalorder %v7365_v59, 0  ;;  %vm9491_vm0 = vcmp.ne.s16.totalorder %v7358_v58, 0 }
 0x15b   : >> { %vm9493_vm10 = vcmp.ne.s16.totalorder %v7370_v61, 0  ;;  %1474 = vmatpush1.bf16.msra.mxu0 %v7020_v25  ;;  %v1036_v5 = vsel %vm9491_vm0, %v7020_v25, 0  ;;  %v1041_v25 = vsel %vm9492_vm14, %v7245_v28, 0  ;;  %v1039_v26 = vsel %vm9491_vm0, %v7041_v27, 0  ;;  %v6326_v28 = vld [vmem:[%s9461_s1 + $0x20] ss:$16 sps:$4 sm:$0xff]  }
 0x15c   : >> { %996 = vrot.lane.b32.xlu0 %v7051_v30, %s9489_s17  ;;  %1475 = vmatprep.subr.bf16.mxu0 %v7049_v29  ;;  %v1037_v63 = vsel %vm9493_vm10, %v7017_v24, 0  ;;  %v1038_v24 = vsel %vm9492_vm14, %v7234_v22, 0  ;;  %v1040_v22 = vsel %vm9493_vm10, %v7049_v29, 0  ;;  %v1043_v29 = vsel %vm9493_vm10, %v7051_v30, 0 }
 0x15d   : >> { %998 = vrot.lane.b32.xlu1 %v7255_v34, %s9489_s17  ;;  %v860_v1 = vpop.permute.xlu0 %859  ;;  %v862_v2 = vpop.permute.xlu1 %861  ;;  %v1044_v21 = vsel %vm9492_vm14, %v7255_v34, 0  ;;  %v1177_v34 = vld [vmem:[%s9462_s2 + $0x8] sm:$0xff] }
 0x15e   : >> { %v876_v4 = vsel %vm9496_vm15, %v860_v1, %v862_v2  ;;  %v875_v6 = vsel %vm9496_vm15, %v858_v62, %v860_v1  ;;  %v6336_v62 = vld [vmem:[%s9461_s1 + $0xa4] ss:$16 sps:$4 sm:$0xff]   ;;  %v1191_v2 = vld [vmem:[%s9462_s2 + $0x78] sm:$0xff] }
 0x15f   : >> { %1476 = vmatpush1.bf16.msra.mxu0 %v7041_v27  ;;  %v6327_v27 = vld [vmem:[%s9461_s1 + $0x44] ss:$16 sps:$4 sm:$0xff]  }
 0x160   : >> { %994 = vrot.lane.b32.xlu0 %v7057_v31, %s9489_s17  ;;  %1477 = vmatprep.subr.bf16.mxu0 %v7051_v30  ;;  %v1042_v30 = vsel %vm9491_vm0, %v7057_v31, 0  ;;  %v1186_v1 = vld [vmem:[%s9462_s2 + $0x50] sm:$0xff]  ;;  %vm9541_vm0 = vcmp.ne.s16.totalorder %v7088_v39, 0 }
 0x161   : >> { %1056 = vrot.lane.b32.xlu1 %v1037_v63, %s9487_s27  ;;  %v1187_v63 = vld [vmem:[%s9462_s2 + $0x58] sm:$0xff]  ;;  %vm9542_vm14 = vmmov %vm9541_vm0 }
 0x163   : >> { %1478 = vmatpush1.bf16.msra.mxu0 %v7057_v31  ;;  %v1180_v31 = vld [vmem:[%s9462_s2 + $0x20] sm:$0xff] }
 0x164   : >> { %1058 = vrot.lane.b32.xlu0 %v1038_v24, %s9487_s27  ;;  %1479 = vmatprep.subr.bf16.mxu0 %v876_v4  ;;  %v1190_v4 = vld [vmem:[%s9462_s2 + $0x70] sm:$0xff] }
 0x165   : >> { %1054 = vrot.lane.b32.xlu1 %v1036_v5, %s9487_s27  ;;  %v6338_v24 = vld [vmem:[%s9461_s1 + $0xa0] ss:$16 sps:$4 sm:$0xff]   ;;  %v6339_v5 = vld [vmem:[%s9461_s1 + $0xc4] ss:$16 sps:$4 sm:$0xff]  }
 0x167   : >> { %1480 = vmatpush1.bf16.msra.mxu0 %v875_v6  ;;  %v7508_v6 = vld [vmem:[#allocation4 + $0x20] sm:$0xff] }
 0x168   : >> { %1062 = vrot.lane.b32.xlu0 %v1040_v22, %s9487_s27  ;;  %v1910_v22 = vsel %vm537_vm11, %v7508_v6, 0 }
 0x169   : >> { %1064 = vrot.lane.b32.xlu1 %v1041_v25, %s9487_s27  ;;  %v7519_v25 = vld [vmem:[#allocation4 + $0x50] sm:$0xff] }
 0x16a   : >> { %1482 = vmatmul.mubr.bf16.vlgmr.msra.gmra.mrb[0].mxu0 %v6321_v18  ;;  %v7510_v18 = vld [vmem:[#allocation4] sm:$0xff] }
 0x16b   : >> { %1491 = vmatprep.mubr.bf16.mxu0 %v6324_v20  ;;  %v1907_v20 = vsel %vm537_vm11, %v7510_v18, 0 }
 0x16c   : >> { %1060 = vrot.lane.b32.xlu0 %v1039_v26, %s9487_s27  ;;  %v7522_v26 = vld [vmem:[#allocation4 + $0x48] sm:$0xff] }
 0x16d   : >> { %1068 = vrot.lane.b32.xlu1 %v1043_v29, %s9487_s27  ;;  %v6341_v29 = vld [vmem:[%s9461_s1 + $0xc0] ss:$16 sps:$4 sm:$0xff]  }
 0x170   : >> { %1070 = vrot.lane.b32.xlu0 %v1044_v21, %s9487_s27  ;;  %v6342_v21 = vld [vmem:[%s9461_s1 + $0xe4] ss:$16 sps:$4 sm:$0xff]  }
 0x171   : >> { %1066 = vrot.lane.b32.xlu1 %v1042_v30, %s9487_s27  ;;  %v7537_v30 = vld [vmem:[#allocation4 + $0x68] sm:$0xff] }
 0x172   : >> { %1492 = vmatmul.mubr.bf16.gmra.mrb[4].mxu0 %v6326_v28  ;;  %v1915_v28 = vsel %vm539_vm13, %v7519_v25, 0 }
 0x173   : >> { %1501 = vmatprep.mubr.bf16.mxu0 %v6327_v27  ;;  %v1914_v27 = vsel %vm9541_vm0, %v7522_v26, 0  ;;  %vm1424_vm0 = vcmask 392192  }
 0x174   : >> { %1194 = vperm.xlu0 %6313, %v1176_v23   ;;  %v7540_v23 = vld [vmem:[#allocation4 + $0x40] sm:$0xff] }
 0x175   : >> { %1199 = vperm.xlu1 %6314, %v1177_v34   ;;  %v1917_v34 = vsel %vm9542_vm14, %v7537_v30, 0 }
 0x178   : >> { %1219 = vperm.xlu0 %6313, %v1181_v32   ;;  %v1913_v32 = vsel %vm537_vm11, %v7540_v23, 0 }
 0x179   : >> { %1214 = vperm.xlu1 %6314, %v1180_v31   ;;  %v7549_v31 = vld [vmem:[#allocation4 + $0x60] sm:$0xff] }
 0x17a   : >> { %1502 = vmatmul.mubr.bf16.gmra.mrb[8].mxu0 %v6329_v36  ;;  %v7552_v36 = vld [vmem:[#allocation4 + $0x70] sm:$0xff] }
 0x17b   : >> { %1511 = vmatprep.mubr.bf16.mxu0 %v6330_v37  ;;  %v6344_v37 = vld [vmem:[%s9461_s1 + $0xe0] ss:$16 sps:$4 sm:$0xff]  }
 0x17c   : >> { %1209 = vperm.xlu0 %6313, %v1179_v50   ;;  %v1916_v50 = vsel %vm537_vm11, %v7549_v31, 0  ;;  %vm9543_vm11 = vcmask 924672  }
 0x17d   : >> { %1204 = vperm.xlu1 %6314, %v1178_v38   ;;  %v6347_v38 = vld [vmem:[%s9461_s1 + $0xc] ss:$16 sps:$4 sm:$0xff]   ;;  %vm9544_vm14 = vmmov %vm9543_vm11 }
 0x17e   : >> { %vm9545_vm10 = vmmov %vm9543_vm11 }
 0x17f   : >> { %vm9546_vm1 = vmmov %vm9545_vm10 }
 0x180   : >> { %1229 = vperm.xlu0 %6313, %v1183_v40   ;;  %v864_v40 = vpop.permute.xlu1 %863  ;;  %vm9547_vm9 = vmmov %vm9546_vm1 }
 0x181   : >> { %1224 = vperm.xlu1 %6314, %v1182_v46   ;;  %v1918_v46 = vsel %vm539_vm13, %v7552_v36, 0 }
 0x182   : >> { %1512 = vmatmul.mubr.bf16.gmra.mrb[12].mxu0 %v6332_v41  ;;  %v868_v41 = vpop.permute.xlu0 %867 }
 0x183   : >> { %1521 = vmatprep.mubr.bf16.mxu0 %v6333_v44 }
 0x184   : >> { %1239 = vperm.xlu0 %6313, %v1185_v51   ;;  %v874_v33 = vpop.permute.xlu1 %873 }
 0x185   : >> { %1234 = vperm.xlu1 %6314, %v1184_v45  }
 0x186   : >> { %v870_v44 = vpop.permute.xlu0 %869 }
 0x188   : >> { %1259 = vperm.xlu0 %6313, %v1189_v53  }
 0x189   : >> { %1254 = vperm.xlu1 %6314, %v1188_v56  }
 0x18a   : >> { %1522 = vmatmul.mubr.bf16.gmra.mrb[16].mxu0 %v6335_v48 }
 0x18b   : >> { %1531 = vmatprep.mubr.bf16.mxu0 %v6336_v62 }
 0x18c   : >> { %1249 = vperm.xlu0 %6313, %v1187_v63  }
 0x18d   : >> { %1244 = vperm.xlu1 %6314, %v1186_v1  }
 0x190   : >> { %1269 = vperm.xlu0 %6313, %v1191_v2  }
 0x191   : >> { %1264 = vperm.xlu1 %6314, %v1190_v4  }
 0x192   : >> { %1532 = vmatmul.mubr.bf16.gmra.mrb[20].mxu0 %v6338_v24 }
 0x193   : >> { %1541 = vmatprep.mubr.bf16.mxu0 %v6339_v5 }
 0x194   : >> { %1937 = vrot.lane.b32.xlu0 %v1910_v22, %s6841_s12 }
 0x195   : >> { %1931 = vrot.lane.b32.xlu1 %v1907_v20, %s6841_s12 }
 0x198   : >> { %1947 = vrot.lane.b32.xlu0 %v1915_v28, %s6841_s12 }
 0x199   : >> { %1945 = vrot.lane.b32.xlu1 %v1914_v27, %s6841_s12 }
 0x19a   : >> { %1542 = vmatmul.mubr.bf16.gmra.mrb[24].mxu0 %v6341_v29 }
 0x19b   : >> { %1551 = vmatprep.mubr.bf16.mxu0 %v6342_v21 }
 0x19c   : >> { %1951 = vrot.lane.b32.xlu0 %v1917_v34, %s6841_s12 }
 0x19d   : >> { %1943 = vrot.lane.b32.xlu1 %v1913_v32, %s6841_s12 }
 0x1a0   : >> { %1949 = vrot.lane.b32.xlu0 %v1916_v50, %s6841_s12 }
 0x1a1   : >> { %1953 = vrot.lane.b32.xlu1 %v1918_v46, %s6841_s12 }
 0x1a2   : >> { %1552 = vmatmul.mubr.bf16.gmra.mrb[28].mxu0 %v6344_v37 }
 0x1a3   : >> { %5743 = vmatprep.mubr.msk.bf16.mxu0 %vm1424_vm0, %v6347_v38 }
 0x1a4   : >> { %2009 = vrot.lane.b32.xlu0 %v7508_v6, %s6840_s11 }
 0x1a5   : >> { %2003 = vrot.lane.b32.xlu1 %v7510_v18, %s6840_s11 }
 0x1a8   : >> { %2019 = vrot.lane.b32.xlu0 %v7519_v25, %s6840_s11 }
 0x1a9   : >> { %2017 = vrot.lane.b32.xlu1 %v7522_v26, %s6840_s11 }
 0x1aa   : >> { %v929_v51 = vpop.permute.xlu1 %928 }
 0x1ac   : >> { %2023 = vrot.lane.b32.xlu0 %v7537_v30, %s6840_s11 }
 0x1ad   : >> { %2015 = vrot.lane.b32.xlu1 %v7540_v23, %s6840_s11 }
 0x1ae   : >> { %v933_v45 = vpop.permute.xlu0 %932 }
 0x1af   : >> { %v939_v53 = vpop.permute.xlu1 %938 }
 0x1b1   : >> { %2025 = vrot.lane.b32.xlu1 %v7552_v36, %s6840_s11 }
 0x1b2   : >> { %v935_v56 = vpop.permute.xlu0 %934 }
 0x1b3   : >> { %v866_v48 = vpop.permute.xlu1 %865 }
 0x1b4   : >> { %v878_v62 = vsel %vm9496_vm15, %v866_v48, %v868_v41  ;;  %v877_v63 = vsel %vm9496_vm15, %v864_v40, %v866_v48 }
 0x1b5   : >> { %1562 = vmatprep.subr.bf16.mxu0 %v878_v62 }
 0x1b6   : >> { %1563 = vmatpush1.bf16.msra.mxu0 %v877_v63  ;;  %v872_v1 = vpop.permute.xlu0 %871 }
 0x1b7   : >> { %v931_v2 = vpop.permute.xlu1 %930  ;;  %v880_v4 = vsel %vm9496_vm15, %v872_v1, %v874_v33  ;;  %v879_v24 = vsel %vm9496_vm15, %v870_v44, %v872_v1  ;;  %vm9548_vm15 = vmmov %vm9546_vm1 }
 0x1b8   : >> { %1564 = vmatprep.subr.bf16.mxu0 %v880_v4  ;;  %v947_v5 = vsel %vm9543_vm11, %v931_v2, %v933_v45  ;;  %v946_v29 = vsel %vm9544_vm14, %v929_v51, %v931_v2  ;;  %vm9497_vm11 = vcmask 916480  }
 0x1ba   : >> { %1565 = vmatpush1.bf16.msra.mxu0 %v879_v24  ;;  %v937_v22 = vpop.permute.xlu0 %936 }
 0x1bb   : >> { %v943_v20 = vpop.permute.xlu1 %942  ;;  %1566 = vmatprep.subr.bf16.mxu0 %v947_v5  ;;  %v949_v28 = vsel %vm9545_vm10, %v937_v22, %v939_v53  ;;  %v948_v34 = vsel %vm9546_vm1, %v935_v56, %v937_v22 }
 0x1be   : >> { %1567 = vmatpush1.bf16.msra.mxu0 %v946_v29  ;;  %v945_v21 = vpop.permute.xlu0 %944 }
 0x1bf   : >> { %v941_v27 = vpop.permute.xlu1 %940  ;;  %1568 = vmatprep.subr.bf16.mxu0 %v949_v28  ;;  %v951_v32 = vsel %vm9547_vm9, %v943_v20, %v945_v21 }
 0x1c0   : >> { %v950_v38 = vsel %vm9548_vm15, %v941_v27, %v943_v20  ;;  %vm9549_vm15 = vcmask 908288  }
 0x1c1   : >> { %vm9550_vm1 = vmmov %vm9549_vm15 }
 0x1c2   : >> { %1569 = vmatpush1.bf16.msra.mxu0 %v948_v34  ;;  %v985_v37 = vpop.permute.xlu0 %984  ;;  %vm9551_vm9 = vmmov %vm9550_vm1 }
 0x1c3   : >> { %v987_v50 = vpop.permute.xlu1 %986  ;;  %1570 = vmatprep.subr.bf16.mxu0 %v951_v32  ;;  %vm9552_vm10 = vmmov %vm9550_vm1 }
 0x1c4   : >> { %v1002_v40 = vsel %vm9497_vm11, %v985_v37, %v987_v50  ;;  %vm9553_vm14 = vmmov %vm9550_vm1 }
 0x1c6   : >> { %1571 = vmatpush1.bf16.msra.mxu0 %v950_v38  ;;  %v983_v46 = vpop.permute.xlu0 %982 }
 0x1c7   : >> { %v991_v41 = vpop.permute.xlu1 %990  ;;  %1572 = vmatprep.subr.bf16.mxu0 %v1002_v40  ;;  %v1001_v33 = vsel %vm9497_vm11, %v983_v46, %v985_v37  ;;  %v6345_v40 = vld [vmem:[%s9461_s1 + $0x8] ss:$16 sps:$4 sm:$0xff]   ;;  %v6348_v46 = vld [vmem:[%s9461_s1 + $0x2c] ss:$16 sps:$4 sm:$0xff]  }
 0x1ca   : >> { %1573 = vmatpush1.bf16.msra.mxu0 %v1001_v33  ;;  %v993_v44 = vpop.permute.xlu0 %992  ;;  %v6351_v33 = vld [vmem:[%s9461_s1 + $0x4c] ss:$16 sps:$4 sm:$0xff]  }
 0x1cb   : >> { %v989_v51 = vpop.permute.xlu1 %988  ;;  %v1004_v45 = vsel %vm9497_vm11, %v991_v41, %v993_v44  ;;  %v6353_v44 = vld [vmem:[%s9461_s1 + $0x48] ss:$16 sps:$4 sm:$0xff]  }
 0x1cc   : >> { %v1003_v53 = vsel %vm9497_vm11, %v989_v51, %v991_v41  ;;  %1574 = vmatprep.subr.bf16.mxu0 %v1004_v45  ;;  %v6350_v41 = vld [vmem:[%s9461_s1 + $0x28] ss:$16 sps:$4 sm:$0xff]   ;;  %v6354_v51 = vld [vmem:[%s9461_s1 + $0x6c] ss:$16 sps:$4 sm:$0xff]  }
 0x1cd   : >> { %v6356_v45 = vld [vmem:[%s9461_s1 + $0x68] ss:$16 sps:$4 sm:$0xff]  }
 0x1ce   : >> { %1575 = vmatpush1.bf16.msra.mxu0 %v1003_v53  ;;  %v997_v56 = vpop.permute.xlu0 %996  ;;  %v6357_v53 = vld [vmem:[%s9461_s1 + $0x8c] ss:$16 sps:$4 sm:$0xff]  }
 0x1cf   : >> { %v999_v48 = vpop.permute.xlu1 %998 }
 0x1d0   : >> { %v1006_v62 = vsel %vm9497_vm11, %v997_v56, %v999_v48  ;;  %v6360_v48 = vld [vmem:[%s9461_s1 + $0xac] ss:$16 sps:$4 sm:$0xff]  }
 0x1d1   : >> { %1576 = vmatprep.subr.bf16.mxu0 %v1006_v62  ;;  %v6362_v62 = vld [vmem:[%s9461_s1 + $0xa8] ss:$16 sps:$4 sm:$0xff]  }
 0x1d2   : >> { %v995_v63 = vpop.permute.xlu0 %994 }
 0x1d3   : >> { %v1057_v1 = vpop.permute.xlu1 %1056  ;;  %v1005_v2 = vsel %vm9497_vm11, %v995_v63, %v997_v56  ;;  %vm9554_vm11 = vmmov %vm9550_vm1  ;;  %v6359_v56 = vld [vmem:[%s9461_s1 + $0x88] ss:$16 sps:$4 sm:$0xff]   ;;  %v6363_v63 = vld [vmem:[%s9461_s1 + $0xcc] ss:$16 sps:$4 sm:$0xff]  }
 0x1d4   : >> { %1577 = vmatpush1.bf16.msra.mxu0 %v1005_v2  ;;  %v6366_v2 = vld [vmem:[%s9461_s1 + $0xec] ss:$16 sps:$4 sm:$0xff]  }
 0x1d6   : >> { %v1059_v4 = vpop.permute.xlu0 %1058 }
 0x1d7   : >> { %v1055_v24 = vpop.permute.xlu1 %1054  ;;  %v1073_v5 = vsel %vm9549_vm15, %v1057_v1, %v1059_v4  ;;  %v6368_v4 = vld [vmem:[%s9461_s1 + $0xe8] ss:$16 sps:$4 sm:$0xff]   ;;  %vm9557_vm15 = vcmp.ne.s16.totalorder %v7144_v52, 0 }
 0x1d8   : >> { %v1072_v22 = vsel %vm9550_vm1, %v1055_v24, %v1057_v1  ;;  %1578 = vmatprep.subr.bf16.mxu0 %v1073_v5  ;;  %v6365_v1 = vld [vmem:[%s9461_s1 + $0xc8] ss:$16 sps:$4 sm:$0xff]   ;;  %vm9558_vm1 = vcmp.ne.s16.totalorder %v7118_v47, 0  ;;  %v2141_v47 = vld [vmem:[#allocation4 + $0x40] sm:$0xff] }
 0x1d9   : >> { %1579 = vmatpush1.bf16.msra.mxu0 %v1072_v22 }
 0x1da   : >> { %v1063_v20 = vpop.permute.xlu0 %1062 }
 0x1db   : >> { %v1065_v29 = vpop.permute.xlu1 %1064 }
 0x1dc   : >> { %v1075_v28 = vsel %vm9551_vm9, %v1063_v20, %v1065_v29  ;;  %vm9560_vm9 = vmmov %vm9557_vm15 }
 0x1dd   : >> { %1580 = vmatprep.subr.bf16.mxu0 %v1075_v28 }
 0x1de   : >> { %v1061_v21 = vpop.permute.xlu0 %1060 }
 0x1df   : >> { %v1069_v27 = vpop.permute.xlu1 %1068  ;;  %v1074_v34 = vsel %vm9552_vm10, %v1061_v21, %v1063_v20  ;;  %vm9561_vm10 = vmmov %vm9560_vm9 }
 0x1e0   : >> { %1581 = vmatpush1.bf16.msra.mxu0 %v1074_v34 }
 0x1e2   : >> { %v1071_v32 = vpop.permute.xlu0 %1070 }
 0x1e3   : >> { %v1067_v37 = vpop.permute.xlu1 %1066  ;;  %v1077_v50 = vsel %vm9553_vm14, %v1069_v27, %v1071_v32 }
 0x1e4   : >> { %v1076_v38 = vsel %vm9554_vm11, %v1067_v37, %v1069_v27  ;;  %1582 = vmatprep.subr.bf16.mxu0 %v1077_v50 }
 0x1e5   : >> { %1583 = vmatpush1.bf16.msra.mxu0 %v1076_v38 }
 0x1e8   : >> { %1595 = vmatmul.mubr.bf16.vlgmr.msra.gmra.mrb[0].mxu0 %v6345_v40 }
 0x1e9   : >> { %5744 = vmatprep.mubr.msk.bf16.mxu0 %vm1424_vm0, %v6348_v46 }
 0x1f0   : >> { %1605 = vmatmul.mubr.bf16.gmra.mrb[4].mxu0 %v6350_v41 }
 0x1f1   : >> { %5745 = vmatprep.mubr.msk.bf16.mxu0 %vm1424_vm0, %v6351_v33 }
 0x1f3   : >> { %v1195_v22 = vpop.permute.xlu0 %1194 }
 0x1f4   : >> { %v1200_v24 = vpop.permute.xlu1 %1199 }
 0x1f7   : >> { %v1220_v37 = vpop.permute.xlu0 %1219 }
 0x1f8   : >> { %1615 = vmatmul.mubr.bf16.gmra.mrb[8].mxu0 %v6353_v44  ;;  %v1215_v21 = vpop.permute.xlu1 %1214 }
 0x1f9   : >> { %5746 = vmatprep.mubr.msk.bf16.mxu0 %vm1424_vm0, %v6354_v51 }
 0x1fc   : >> { %v1205_v33 = vpop.permute.xlu1 %1204 }
 0x200   : >> { %1625 = vmatmul.mubr.bf16.gmra.mrb[12].mxu0 %v6356_v45 }
 0x201   : >> { %5747 = vmatprep.mubr.msk.bf16.mxu0 %vm1424_vm0, %v6357_v53 }
 0x208   : >> { %1635 = vmatmul.mubr.bf16.gmra.mrb[16].mxu0 %v6359_v56  ;;  %v1210_v56 = vpop.permute.xlu0 %1209 }
 0x209   : >> { %5748 = vmatprep.mubr.msk.bf16.mxu0 %vm1424_vm0, %v6360_v48 }
 0x210   : >> { %1645 = vmatmul.mubr.bf16.gmra.mrb[20].mxu0 %v6362_v62 }
 0x211   : >> { %5749 = vmatprep.mubr.msk.bf16.mxu0 %vm1424_vm0, %v6363_v63 }
 0x218   : >> { %1655 = vmatmul.mubr.bf16.gmra.mrb[24].mxu0 %v6365_v1 }
 0x219   : >> { %5750 = vmatprep.mubr.msk.bf16.mxu0 %vm1424_vm0, %v6366_v2  ;;  %vm9555_vm0 = vcmp.ne.s16.totalorder %v7088_v39, 0 }
 0x21a   : >> { %vm9556_vm11 = vmmov %vm9555_vm0 }
 0x220   : >> { %1665 = vmatmul.mubr.bf16.gmra.mrb[28].mxu0 %v6368_v4 }
 0x2bb   : >> { %v1596_v5 = vpop.f32.mrb[0].mxu0 }
 0x2bc   : >> { %v1598_v20 = vpop.f32.mrb[1].mxu0  ;;  %v6120_v27 = vadd.f32 %v1596_v5, %v1195_v22 }
 0x2bd   : >> { %v1600_v29 = vpop.f32.mrb[2].mxu0  ;;  %v6121_v34 = vadd.f32 %v1598_v20, %v1195_v22 }
 0x2be   : >> { %v1602_v28 = vpop.f32.mrb[3].mxu0  ;;  %v6122_v32 = vadd.f32 %v1600_v29, %v1200_v24  ;;  %v5751_v50 = vmul.f32 -1.442695, %v6120_v27 }
 0x2bf   : >> { %v5752_v40 = vmul.f32 -1.442695, %v6121_v34  ;;  %v6123_v46 = vadd.f32 %v1602_v28, %v1200_v24 }
 0x2c0   : >> { %v5753_v44 = vmul.f32 -1.442695, %v6122_v32  ;;  %6497 = vpow2.f32 %v5751_v50 }
 0x2c1   : >> { %6499 = vpow2.f32 %v5752_v40  ;;  %v5754_v48 = vmul.f32 -1.442695, %v6123_v46 }
 0x2c2   : >> { %6501 = vpow2.f32 %v5753_v44 }
 0x2c3   : >> { %v1606_v38 = vpop.f32.mrb[4].mxu0  ;;  %6503 = vpow2.f32 %v5754_v48 }
 0x2c4   : >> { %v1608_v41 = vpop.f32.mrb[5].mxu0  ;;  %v6124_v45 = vadd.f32 %v1606_v38, %v1205_v33 }
 0x2c5   : >> { %v1610_v51 = vpop.f32.mrb[6].mxu0  ;;  %v6125_v62 = vadd.f32 %v1608_v41, %v1205_v33 }
 0x2c6   : >> { %v1612_v53 = vpop.f32.mrb[7].mxu0  ;;  %v6126_v63 = vadd.f32 %v1610_v51, %v1210_v56  ;;  %v5755_v1 = vmul.f32 -1.442695, %v6124_v45  ;;  %v1225_v45 = vpop.permute.xlu1 %1224 }
 0x2c7   : >> { %v6127_v2 = vadd.f32 %v1612_v53, %v1210_v56  ;;  %v5756_v5 = vmul.f32 -1.442695, %v6125_v62  ;;  %v1230_v62 = vpop.permute.xlu0 %1229 }
 0x2c8   : >> { %v5757_v20 = vmul.f32 -1.442695, %v6126_v63  ;;  %6505 = vpow2.f32 %v5755_v1 }
 0x2c9   : >> { %v5758_v27 = vmul.f32 -1.442695, %v6127_v2  ;;  %6507 = vpow2.f32 %v5756_v5 }
 0x2ca   : >> { %v6498_v46 = vpop.eup %6497  ;;  %6509 = vpow2.f32 %v5757_v20 }
 0x2cb   : >> { %v1616_v4 = vpop.f32.mrb[8].mxu0  ;;  %v6500_v33 = vpop.eup %6499  ;;  %6511 = vpow2.f32 %v5758_v27 }
 0x2cc   : >> { %v6128_v22 = vadd.f32 %v1616_v4, %v1215_v21  ;;  %v1618_v24 = vpop.f32.mrb[9].mxu0  ;;  %v6502_v51 = vpop.eup %6501  ;;  %v1700_v63 = vadd.f32 1.0, %v6500_v33 }
 0x2cd   : >> { %v6129_v29 = vadd.f32 %v1618_v24, %v1215_v21  ;;  %v1620_v28 = vpop.f32.mrb[10].mxu0  ;;  %v1699_v21 = vadd.f32 1.0, %v6498_v46  ;;  %v6504_v2 = vpop.eup %6503  ;;  %v1701_v4 = vadd.f32 1.0, %v6502_v51 }
 0x2ce   : >> { %v6130_v34 = vadd.f32 %v1620_v28, %v1220_v37  ;;  %v1622_v32 = vpop.f32.mrb[11].mxu0  ;;  %v5759_v50 = vmul.f32 -1.442695, %v6128_v22  ;;  %v1702_v27 = vadd.f32 1.0, %v6504_v2 }
 0x2cf   : >> { %v6131_v38 = vadd.f32 %v1622_v32, %v1220_v37  ;;  %v5760_v40 = vmul.f32 -1.442695, %v6129_v29 }
 0x2d0   : >> { %v5761_v41 = vmul.f32 -1.442695, %v6130_v34  ;;  %6513 = vpow2.f32 %v5759_v50 }
 0x2d1   : >> { %v5762_v44 = vmul.f32 -1.442695, %v6131_v38  ;;  %6515 = vpow2.f32 %v5760_v40  ;;  %v1235_v38 = vpop.permute.xlu1 %1234 }
 0x2d2   : >> { %6517 = vpow2.f32 %v5761_v41  ;;  %v6506_v20 = vpop.eup %6505 }
 0x2d3   : >> { %v1626_v53 = vpop.f32.mrb[12].mxu0  ;;  %6519 = vpow2.f32 %v5762_v44  ;;  %v6508_v34 = vpop.eup %6507  ;;  %v1703_v40 = vadd.f32 1.0, %v6506_v20 }
 0x2d4   : >> { %v6132_v56 = vadd.f32 %v1626_v53, %v1225_v45  ;;  %v1628_v48 = vpop.f32.mrb[13].mxu0  ;;  %6521 = vrcp.f32 %v1699_v21  ;;  %v6510_v50 = vpop.eup %6509 }
 0x2d5   : >> { %v6133_v37 = vadd.f32 %v1628_v48, %v1225_v45  ;;  %v1630_v1 = vpop.f32.mrb[14].mxu0  ;;  %6523 = vrcp.f32 %v1700_v63  ;;  %v6512_v41 = vpop.eup %6511  ;;  %v1704_v45 = vadd.f32 1.0, %v6508_v34 }
 0x2d6   : >> { %v6134_v5 = vadd.f32 %v1630_v1, %v1230_v62  ;;  %v1632_v22 = vpop.f32.mrb[15].mxu0  ;;  %v5763_v24 = vmul.f32 -1.442695, %v6132_v56  ;;  %6525 = vrcp.f32 %v1701_v4  ;;  %v1705_v56 = vadd.f32 1.0, %v6510_v50  ;;  %v1240_v4 = vpop.permute.xlu0 %1239 }
 0x2d7   : >> { %v5764_v29 = vmul.f32 -1.442695, %v6133_v37  ;;  %v6135_v28 = vadd.f32 %v1632_v22, %v1230_v62  ;;  %v1706_v63 = vadd.f32 1.0, %v6512_v41 }
 0x2d8   : >> { %v5765_v32 = vmul.f32 -1.442695, %v6134_v5  ;;  %6527 = vpow2.f32 %v5763_v24  ;;  %v1255_v5 = vpop.permute.xlu1 %1254 }
 0x2d9   : >> { %6529 = vpow2.f32 %v5764_v29  ;;  %v5766_v33 = vmul.f32 -1.442695, %v6135_v28 }
 0x2da   : >> { %v6514_v51 = vpop.eup %6513  ;;  %6531 = vrcp.f32 %v1702_v27 }
 0x2db   : >> { %v1636_v46 = vpop.f32.mrb[16].mxu0  ;;  %v6516_v21 = vpop.eup %6515  ;;  %6533 = vpow2.f32 %v5765_v32  ;;  %v1747_v1 = vadd.f32 1.0, %v6514_v51 }
 0x2dc   : >> { %v1638_v44 = vpop.f32.mrb[17].mxu0  ;;  %v6518_v62 = vpop.eup %6517  ;;  %6535 = vrcp.f32 %v1703_v40  ;;  %v6136_v2 = vadd.f32 %v1636_v46, %v1235_v38  ;;  %v1748_v22 = vadd.f32 1.0, %v6516_v21 }
 0x2dd   : >> { %v1640_v53 = vpop.f32.mrb[18].mxu0  ;;  %v6520_v37 = vpop.eup %6519  ;;  %6537 = vpow2.f32 %v5766_v33  ;;  %v6137_v24 = vadd.f32 %v1638_v44, %v1235_v38  ;;  %v1749_v29 = vadd.f32 1.0, %v6518_v62 }
 0x2de   : >> { %v1642_v48 = vpop.f32.mrb[19].mxu0  ;;  %6539 = vrcp.f32 %v1704_v45  ;;  %v7657_v20 = vpop.eup %6521  ;;  %v6138_v28 = vadd.f32 %v1640_v53, %v1240_v4  ;;  %v1750_v34 = vadd.f32 1.0, %v6520_v37  ;;  %v5767_v46 = vmul.f32 -1.442695, %v6136_v2 }
 0x2df   : >> { %6541 = vrcp.f32 %v1705_v56  ;;  %v7659_v27 = vpop.eup %6523  ;;  %v6139_v32 = vadd.f32 %v1642_v48, %v1240_v4  ;;  %v5768_v51 = vmul.f32 -1.442695, %v6137_v24  ;;  %v1245_v56 = vpop.permute.xlu1 %1244 }
 0x2e0   : >> { %6543 = vrcp.f32 %v1706_v63  ;;  %v7661_v40 = vpop.eup %6525  ;;  %v5769_v45 = vmul.f32 -1.442695, %v6138_v28  ;;  %v1260_v63 = vpop.permute.xlu0 %1259 }
 0x2e1   : >> { %6545 = vrcp.f32 %v1747_v1  ;;  %v5770_v62 = vmul.f32 -1.442695, %v6139_v32 }
 0x2e2   : >> { %v6528_v33 = vpop.eup %6527  ;;  %6547 = vrcp.f32 %v1748_v22 }
 0x2e3   : >> { %v1646_v50 = vpop.f32.mrb[20].mxu0  ;;  %v6530_v44 = vpop.eup %6529  ;;  %6549 = vrcp.f32 %v1749_v29  ;;  %v1751_v37 = vadd.f32 1.0, %v6528_v33 }
 0x2e4   : >> { %v1648_v41 = vpop.f32.mrb[21].mxu0  ;;  %v7663_v53 = vpop.eup %6531  ;;  %6551 = vrcp.f32 %v1750_v34  ;;  %v6140_v1 = vadd.f32 %v1646_v50, %v1245_v56  ;;  %v1752_v4 = vadd.f32 1.0, %v6530_v44 }
 0x2e5   : >> { %v1650_v38 = vpop.f32.mrb[22].mxu0  ;;  %v6534_v48 = vpop.eup %6533  ;;  %6553 = vpow2.f32 %v5767_v46  ;;  %v6141_v24 = vadd.f32 %v1648_v41, %v1245_v56 }
 0x2e6   : >> { %v1652_v21 = vpop.f32.mrb[23].mxu0  ;;  %v7665_v2 = vpop.eup %6535  ;;  %6555 = vpow2.f32 %v5768_v51  ;;  %v1753_v28 = vadd.f32 1.0, %v6534_v48  ;;  %v5771_v34 = vmul.f32 -1.442695, %v6140_v1 }
 0x2e7   : >> { %v6538_v22 = vpop.eup %6537  ;;  %6557 = vpow2.f32 %v5769_v45  ;;  %v1250_v8 = vpop.permute.xlu0 %1249  ;;  %v5772_v45 = vmul.f32 -1.442695, %v6141_v24 }
 0x2e8   : >> { %v7667_v29 = vpop.eup %6539  ;;  %6559 = vpow2.f32 %v5770_v62  ;;  %v1754_v50 = vadd.f32 1.0, %v6538_v22  ;;  %v6142_v62 = vadd.f32 %v1650_v38, %v1250_v8  ;;  %v1265_v22 = vpop.permute.xlu1 %1264 }
 0x2e9   : >> { %v7669_v15 = vpop.eup %6541  ;;  %6561 = vrcp.f32 %v1751_v37  ;;  %v6143_v37 = vadd.f32 %v1652_v21, %v1250_v8 }
 0x2ea   : >> { %v7671_v46 = vpop.eup %6543  ;;  %6563 = vrcp.f32 %v1752_v4  ;;  %v5773_v14 = vmul.f32 -1.442695, %v6142_v62 }
 0x2eb   : >> { %v1656_v0 = vpop.f32.mrb[24].mxu0  ;;  %v6546_v51 = vpop.eup %6545  ;;  %v5774_v3 = vmul.f32 -1.442695, %v6143_v37 }
 0x2ec   : >> { %v6144_v32 = vadd.f32 %v1656_v0, %v1255_v5  ;;  %v1658_v33 = vpop.f32.mrb[25].mxu0  ;;  %v6548_v56 = vpop.eup %6547 }
 0x2ed   : >> { %v1660_v44 = vpop.f32.mrb[26].mxu0  ;;  %v6145_v48 = vadd.f32 %v1658_v33, %v1255_v5  ;;  %v6550_v9 = vpop.eup %6549 }
 0x2ee   : >> { %6565 = vtanh.f32 %v6144_v32  ;;  %v1662_v41 = vpop.f32.mrb[27].mxu0  ;;  %v6146_v1 = vadd.f32 %v1660_v44, %v1260_v63  ;;  %v6552_v0 = vpop.eup %6551 }
 0x2ef   : >> { %6567 = vrcp.f32 %v1753_v28  ;;  %v6147_v12 = vadd.f32 %v1662_v41, %v1260_v63  ;;  %v6554_v13 = vpop.eup %6553 }
 0x2f0   : >> { %6569 = vpow2.f32 %v5771_v34  ;;  %v6556_v4 = vpop.eup %6555  ;;  %v1795_v33 = vadd.f32 1.0, %v6554_v13  ;;  %v1827_v34 = vld [vmem:[#allocation3] sm:$0xff] }
 0x2f1   : >> { %6571 = vrcp.f32 %v1754_v50  ;;  %v6558_v32 = vpop.eup %6557  ;;  %v1796_v50 = vadd.f32 1.0, %v6556_v4 }
 0x2f2   : >> { %6573 = vpow2.f32 %v5772_v45  ;;  %v6560_v5 = vpop.eup %6559  ;;  %v1270_v45 = vpop.permute.xlu0 %1269  ;;  %v1797_v10 = vadd.f32 1.0, %v6558_v32 }
 0x2f3   : >> { %6575 = vtanh.f32 %v6145_v48  ;;  %v1666_v24 = vpop.f32.mrb[28].mxu0  ;;  %v6562_v21 = vpop.eup %6561 }
 0x2f4   : >> { %6577 = vtanh.f32 %v6146_v1  ;;  %v6148_v28 = vadd.f32 %v1666_v24, %v1265_v22  ;;  %v1668_v38 = vpop.f32.mrb[29].mxu0  ;;  %v7673_v44 = vpop.eup %6563  ;;  %v1835_v1 = vmul.f32 %v6546_v51, %v1827_v34 }
 0x2f5   : >> { %6579 = vtanh.f32 %v6147_v12  ;;  %v1670_v8 = vpop.f32.mrb[30].mxu0  ;;  %v6149_v41 = vadd.f32 %v1668_v38, %v1265_v22  ;;  %v1829_v22 = vld [vmem:[#allocation3 + $0x10] sm:$0xff]  ;;  %v1798_v38 = vadd.f32 1.0, %v6560_v5 }
 0x2f6   : >> { %6581 = vtanh.f32 %v6148_v28  ;;  %v1672_v63 = vpop.f32.mrb[31].mxu0  ;;  %v6150_v48 = vadd.f32 %v1670_v8, %v1270_v45  ;;  %v1828_v28 = vld [vmem:[#allocation3 + $0x8] sm:$0xff]  ;;  %v1830_v8 = vld [vmem:[#allocation3 + $0x18] sm:$0xff] }
 0x2f7   : >> { %6583 = vpow2.f32 %v5773_v14  ;;  %v6151_v24 = vadd.f32 %v1672_v63, %v1270_v45  ;;  %v1837_v63 = vmul.f32 %v6550_v9, %v1829_v22 }
 0x2f8   : >> { %v6566_v62 = vpop.eup %6565  ;;  %6585 = vpow2.f32 %v5774_v3 }
 0x2f9   : >> { %v7675_v37 = vpop.eup %6567  ;;  %6587 = vrcp.f32 %v1795_v33  ;;  %v1843_v12 = vmul.f32 %v6566_v62, %v7657_v20  ;;  %v1836_v20 = vmul.f32 %v6548_v56, %v1828_v28  ;;  %v1831_v33 = vld [vmem:[#allocation3 + $0x20] sm:$0xff]  ;;  %v1834_v28 = vld [vmem:[#allocation3 + $0x38] sm:$0xff] }
 0x2fa   : >> { %v6570_v13 = vpop.eup %6569  ;;  %6589 = vrcp.f32 %v1796_v50 }
 0x2fb   : >> { %v7678_v4 = vpop.eup %6571  ;;  %v1851_v17 = vadd.f32 %v1843_v12, %v1835_v1  ;;  %6591 = vtanh.f32 %v6149_v41  ;;  %v1799_v11 = vadd.f32 1.0, %v6570_v13  ;;  %v1838_v41 = vmul.f32 %v6552_v0, %v1830_v8  ;;  %v1833_v13 = vld [vmem:[#allocation3 + $0x30] sm:$0xff] }
 0x2fc   : >> { %v6574_v14 = vpop.eup %6573  ;;  %6593 = vtanh.f32 %v6150_v48  ;;  %v1839_v1 = vmul.f32 %v6562_v21, %v1831_v33 }
 0x2fd   : >> { %v6576_v3 = vpop.eup %6575  ;;  %6595 = vtanh.f32 %v1851_v17  ;;  %1875 = vst [vmem:[#allocation3] sm:$0xff] %v1851_v17 }
 0x2fe   : >> { %v6578_v51 = vpop.eup %6577  ;;  %v1844_v34 = vmul.f32 %v6576_v3, %v7659_v27  ;;  %6597 = vtanh.f32 %v6151_v24  ;;  %v1800_v24 = vadd.f32 1.0, %v6574_v14  ;;  %v1841_v3 = vmul.f32 %v7675_v37, %v1833_v13 }
 0x2ff   : >> { %v6580_v50 = vpop.eup %6579  ;;  %6599 = vrcp.f32 %v1797_v10  ;;  %v1845_v32 = vmul.f32 %v6578_v51, %v7661_v40  ;;  %v1832_v10 = vld [vmem:[#allocation3 + $0x28] sm:$0xff] }
 0x300   : >> { %v6582_v45 = vpop.eup %6581  ;;  %6601 = vrcp.f32 %v1798_v38  ;;  %v1852_v5 = vadd.f32 %v1844_v34, %v1836_v20  ;;  %v1846_v62 = vmul.f32 %v6580_v50, %v7663_v53  ;;  %v1842_v50 = vmul.f32 %v7678_v4, %v1834_v28 }
 0x301   : >> { %v6584_v48 = vpop.eup %6583  ;;  %6603 = vrcp.f32 %v1799_v11  ;;  %v1853_v17 = vadd.f32 %v1845_v32, %v1837_v63  ;;  %v1847_v56 = vmul.f32 %v6582_v45, %v7665_v2  ;;  %v1840_v2 = vmul.f32 %v7673_v44, %v1832_v10 }
 0x302   : >> { %v6586_v12 = vpop.eup %6585  ;;  %6605 = vtanh.f32 %v1852_v5  ;;  %1876 = vst [vmem:[#allocation3 + $0x8] sm:$0xff] %v1852_v5  ;;  %v1854_v27 = vadd.f32 %v1846_v62, %v1838_v41  ;;  %v1801_v21 = vadd.f32 1.0, %v6584_v48 }
 0x303   : >> { %v6588_v9 = vpop.eup %6587  ;;  %6607 = vtanh.f32 %v1853_v17  ;;  %1877 = vst [vmem:[#allocation3 + $0x10] sm:$0xff] %v1853_v17  ;;  %v1855_v40 = vadd.f32 %v1847_v56, %v1839_v1  ;;  %v1802_v14 = vadd.f32 1.0, %v6586_v12 }
 0x304   : >> { %v6590_v0 = vpop.eup %6589  ;;  %6609 = vtanh.f32 %v1854_v27  ;;  %1878 = vst [vmem:[#allocation3 + $0x18] sm:$0xff] %v1854_v27 }
 0x305   : >> { %v6592_v53 = vpop.eup %6591  ;;  %6611 = vtanh.f32 %v1855_v40  ;;  %1879 = vst [vmem:[#allocation3 + $0x20] sm:$0xff] %v1855_v40 }
 0x306   : >> { %v6594_v11 = vpop.eup %6593  ;;  %v1848_v22 = vmul.f32 %v6592_v53, %v7667_v29  ;;  %6613 = vrcp.f32 %v1800_v24 }
 0x307   : >> { %v6596_v38 = vpop.eup %6595  ;;  %v1849_v8 = vmul.f32 %v6594_v11, %v7669_v15  ;;  %6615 = vrcp.f32 %v1801_v21 }
 0x308   : >> { %v6598_v51 = vpop.eup %6597  ;;  %v1867_v20 = vmul.f32 %v6596_v38, %v6588_v9  ;;  %v1856_v33 = vadd.f32 %v1848_v22, %v1840_v2 }
 0x309   : >> { %v6600_v34 = vpop.eup %6599  ;;  %v1857_v63 = vadd.f32 %v1849_v8, %v1841_v3  ;;  %v1850_v44 = vmul.f32 %v6598_v51, %v7671_v46  ;;  %v2070_v8 = vsel %vm9561_vm10, %v7522_v26, 0  ;;  %vm9569_vm10 = vcmp.ne.s16.totalorder %v7162_v57, 0 }
 0x30a   : >> { %v6602_v32 = vpop.eup %6601  ;;  %6617 = vtanh.f32 %v1856_v33  ;;  %1880 = vst [vmem:[#allocation3 + $0x28] sm:$0xff] %v1856_v33 }
 0x30b   : >> { %v6604_v29 = vpop.eup %6603  ;;  %6619 = vtanh.f32 %v1857_v63  ;;  %1881 = vst [vmem:[#allocation3 + $0x30] sm:$0xff] %v1857_v63  ;;  %v1858_v37 = vadd.f32 %v1850_v44, %v1842_v50  ;;  %v7802_v44 = vld [vmem:[#allocation4 + $0x50] sm:$0xff] }
 0x30c   : >> { %v6606_v15 = vpop.eup %6605  ;;  %6621 = vrcp.f32 %v1802_v14 }
 0x30d   : >> { %v6608_v45 = vpop.eup %6607  ;;  %v1868_v41 = vmul.f32 %v6606_v15, %v6590_v0  ;;  %6623 = vtanh.f32 %v1858_v37  ;;  %1882 = vst [vmem:[#allocation3 + $0x38] sm:$0xff] %v1858_v37  ;;  %v7814_v15 = vld [vmem:[#allocation4 + $0x68] sm:$0xff] }
 0x30e   : >> { %v6610_v5 = vpop.eup %6609  ;;  %v1869_v62 = vmul.f32 %v6608_v45, %v6600_v34  ;;  %v2138_v34 = vld [vmem:[#allocation4 + $0x20] sm:$0xff] }
 0x30f   : >> { %v6612_v4 = vpop.eup %6611  ;;  %v1870_v48 = vmul.f32 %v6610_v5, %v6602_v32  ;;  %v7805_v32 = vld [vmem:[#allocation4 + $0x70] sm:$0xff] }
 0x310   : >> { %v7690_v1 = vpack.c.bf16 %v1869_v62, %v1867_v20  ;;  %v1871_v46 = vmul.f32 %v6612_v4, %v6604_v29  ;;  %v6614_v56 = vpop.eup %6613  ;;  %v2144_v62 = vld [vmem:[#allocation4 + $0x60] sm:$0xff] }
 0x311   : >> { %v7692_v17 = vpack.c.bf16 %v1870_v48, %v1868_v41  ;;  %v6616_v12 = vpop.eup %6615  ;;  %v6371_v41 = vld [vmem:[%s9463_s3 + $0x4] ss:$20 sps:$4 sm:$0xff]  }
 0x312   : >> { %1887 = vst [vmem:[#allocation2 + $0x28] sm:$0xff] %v7690_v1  ;;  %2005 = vrot.lane.b32.xlu1 %v7690_v1, %s6840_s11  ;;  %v1908_v40 = vsel %vm9555_vm0, %v7690_v1, 0  ;;  %v2064_v38 = vsel %vm9557_vm15, %v7690_v1, 0  ;;  %vm9565_vm15 = vmmov %vm9558_vm1  ;;  %3031 = vmatprep.mubr.bf16.mxu1 %v6371_v41  ;;  %v7834_v48 = vld [vmem:[#allocation4 + $0x18] sm:$0xff] }
 0x313   : >> { %1888 = vst [vmem:[#allocation2 + $0x30] sm:$0xff] %v7692_v17  ;;  %2007 = vrot.lane.b32.xlu0 %v7692_v17, %s6840_s11  ;;  %v1909_v24 = vsel %vm539_vm13, %v7692_v17, 0  ;;  %v2065_v39 = vsel %vm9558_vm1, %v7692_v17, 0  ;;  %v2074_v14 = vsel %vm9565_vm15, %v7552_v36, 0 }
 0x314   : >> { %v6618_v27 = vpop.eup %6617 }
 0x315   : >> { %v6620_v9 = vpop.eup %6619  ;;  %v1872_v10 = vmul.f32 %v6618_v27, %v6614_v56  ;;  %v7847_v56 = vld [vmem:[#allocation4 + $0x38] sm:$0xff] }
 0x316   : >> { %v6622_v0 = vpop.eup %6621  ;;  %v1873_v13 = vmul.f32 %v6620_v9, %v6616_v12  ;;  %1933 = vrot.lane.b32.xlu1 %v1908_v40, %s6841_s12  ;;  %v7856_v9 = vld [vmem:[#allocation4 + $0x58] sm:$0xff]  ;;  %v7861_v40 = vpop.permute.xlu0 %1937  ;;  %v2336_v19 = vsel %vm909_vm12, %v7847_v56, 0 }
 0x317   : >> { %v6624_v53 = vpop.eup %6623  ;;  %1935 = vrot.lane.b32.xlu0 %v1909_v24, %s6841_s12 }
 0x318   : >> { %v7708_v21 = vpack.c.bf16 %v1873_v13, %v1871_v46  ;;  %v1874_v11 = vmul.f32 %v6624_v53, %v6622_v0  ;;  %v2254_v13 = vsel %vm837_vm2, %v7802_v44, 0  ;;  %v2257_v53 = vsel %vm837_vm2, %v7805_v32, 0 }
 0x31a   : >> { %1889 = vst [vmem:[#allocation2 + $0x48] sm:$0xff] %v7708_v21  ;;  %v7711_v2 = vpack.c.bf16 %v1874_v11, %v1872_v10  ;;  %v1911_v28 = vsel %vm9556_vm11, %v7708_v21, 0  ;;  %v2067_v3 = vsel %vm9560_vm9, %v7708_v21, 0  ;;  %vm9564_vm11 = vmmov %vm9558_vm1  ;;  %v7876_v11 = vpop.permute.xlu0 %1947 }
 0x31b   : >> { %2011 = vrot.lane.b32.xlu0 %v7708_v21, %s6840_s11  ;;  %v2071_v26 = vsel %vm9564_vm11, %v7519_v25, 0  ;;  %vm9566_vm1 = vmmov %vm9560_vm9  ;;  %v2135_v25 = vld [vmem:[#allocation4] sm:$0xff] }
 0x31c   : >> { %1890 = vst [vmem:[#allocation2 + $0x50] sm:$0xff] %v7711_v2  ;;  %2013 = vrot.lane.b32.xlu1 %v7711_v2, %s6840_s11  ;;  %v1912_v22 = vsel %vm539_vm13, %v7711_v2, 0  ;;  %vm9559_vm13 = vcmp.ne.s16.totalorder %v7099_v42, 0  ;;  %v2147_v20 = vsel %vm9569_vm10, %v2135_v25, 0  ;;  %v7787_v42 = vld [vmem:[#allocation4 + $0x48] sm:$0xff]  ;;  %v2339_v25 = vsel %vm909_vm12, %v7856_v9, 0 }
 0x31d   : >> { %v2063_v35 = vsel %vm9559_vm13, %v7510_v18, 0  ;;  %vm9562_vm14 = vmmov %vm9559_vm13 }
 0x31e   : >> { %v2066_v18 = vsel %vm9562_vm14, %v7508_v6, 0  ;;  %vm9563_vm0 = vmmov %vm9559_vm13  ;;  %v2073_v6 = vsel %vm9566_vm1, %v7537_v30, 0  ;;  %vm9567_vm13 = vcmp.ne.s16.totalorder %v7176_v60, 0  ;;  %vm9570_vm14 = vcmp.ne.s16.totalorder %v7149_v54, 0  ;;  %v7837_v54 = vpop.permute.xlu1 %1931 }
 0x31f   : >> { %1939 = vrot.lane.b32.xlu0 %v1911_v28, %s6841_s12  ;;  %v2069_v51 = vsel %vm9563_vm0, %v7540_v23, 0  ;;  %v2148_v23 = vsel %vm9567_vm13, %v7690_v1, 0  ;;  %vm9568_vm9 = vmmov %vm9563_vm0  ;;  %v2149_v52 = vsel %vm9570_vm14, %v7692_v17, 0  ;;  %v2248_v60 = vsel %vm837_vm2, %v7692_v17, 0 }
 0x320   : >> { %1941 = vrot.lane.b32.xlu1 %v1912_v22, %s6841_s12  ;;  %v2072_v36 = vsel %vm9568_vm9, %v7549_v31, 0  ;;  %vm9571_vm0 = vmmov %vm9564_vm11  ;;  %v7883_v22 = vld [vmem:[#allocation4 + $0x78] sm:$0xff] }
 0x321   : >> { %v2068_v30 = vsel %vm9571_vm0, %v7711_v2, 0  ;;  %vm9572_vm11 = vmmov %vm9567_vm13 }
 0x322   : >> { %vm9573_vm15 = vmmov %vm9572_vm11  ;;  %v7858_v10 = vpop.permute.xlu1 %1945 }
 0x323   : >> { %2021 = vrot.lane.b32.xlu0 %v7549_v31, %s6840_s11  ;;  %v2151_v31 = vsel %vm9572_vm11, %v7708_v21, 0  ;;  %v2154_v33 = vsel %vm9573_vm15, %v7787_v42, 0  ;;  %vm9574_vm1 = vmmov %vm9569_vm10  ;;  %vm9581_vm15 = vcmp.ne.s16.totalorder %v7215_v16, 0  ;;  %s6848_s11 = smov 8  }
 0x324   : >> { %2089 = vrot.lane.b32.xlu1 %v2064_v38, %s6842_s14  ;;  %v2150_v50 = vsel %vm9574_vm1, %v2138_v34, 0  ;;  %vm9575_vm13 = vmmov %vm9574_vm1  ;;  %v2249_v46 = vsel %vm9581_vm15, %v7834_v48, 0 }
 0x325   : >> { %v2153_v63 = vsel %vm9575_vm13, %v2141_v47, 0  ;;  %vm9576_vm9 = vmmov %vm9570_vm14  ;;  %v2342_v47 = vsel %vm909_vm12, %v7883_v22, 0 }
 0x326   : >> { %v2155_v29 = vsel %vm9576_vm9, %v7802_v44, 0  ;;  %vm9577_vm10 = vmmov %vm9576_vm9  ;;  %v7871_v24 = vpop.permute.xlu1 %1943 }
 0x327   : >> { %2091 = vrot.lane.b32.xlu0 %v2065_v39, %s6842_s14  ;;  %v2158_v37 = vsel %vm9577_vm10, %v7805_v32, 0  ;;  %vm9578_vm14 = vmmov %vm9572_vm11 }
 0x328   : >> { %2087 = vrot.lane.b32.xlu1 %v2063_v35, %s6842_s14  ;;  %v2157_v45 = vsel %vm9578_vm14, %v7814_v15, 0  ;;  %vm9579_vm0 = vmmov %vm9576_vm9 }
 0x329   : >> { %v2152_v5 = vsel %vm9579_vm0, %v7711_v2, 0  ;;  %vm9580_vm11 = vmmov %vm9574_vm1  ;;  %vm9582_vm1 = vcmp.ne.s16.totalorder %v7211_v7, 0 }
 0x32a   : >> { %v2156_v4 = vsel %vm9580_vm11, %v2144_v62, 0  ;;  %v2247_v57 = vsel %vm9582_vm1, %v7690_v1, 0  ;;  %vm9583_vm13 = vmmov %vm9582_vm1  ;;  %v7892_v35 = vpop.permute.xlu1 %1953 }
 0x32b   : >> { %2095 = vrot.lane.b32.xlu0 %v2067_v3, %s6842_s14  ;;  %v2250_v12 = vsel %vm9583_vm13, %v7708_v21, 0  ;;  %vm9584_vm9 = vmmov %vm9581_vm15  ;;  %v7895_v3 = vpop.permute.xlu0 %1951  ;;  %vm9589_vm15 = vcmp.ne.s16.totalorder %v7303_v55, 0 }
 0x32c   : >> { %2101 = vrot.lane.b32.xlu1 %v2070_v8, %s6842_s14  ;;  %v2252_v27 = vsel %vm9584_vm9, %v7847_v56, 0  ;;  %vm9585_vm10 = vmmov %vm9584_vm9  ;;  %v2333_v8 = vsel %vm909_vm12, %v7834_v48, 0  ;;  %v2332_v7 = vsel %vm9589_vm15, %v7692_v17, 0  ;;  %vm9598_vm12 = vcmask 138240  }
 0x32d   : >> { %v2255_v0 = vsel %vm9585_vm10, %v7856_v9, 0  ;;  %vm9586_vm14 = vmmov %vm9582_vm1 }
 0x32e   : >> { %v2253_v28 = vsel %vm9586_vm14, %v7787_v42, 0  ;;  %vm9587_vm0 = vmmov %vm9582_vm1  ;;  %v7905_v16 = vpop.permute.xlu1 %2003  ;;  %vm9590_vm1 = vcmp.ne.s16.totalorder %v7279_v49, 0 }
 0x32f   : >> { %2093 = vrot.lane.b32.xlu0 %v2066_v18, %s6842_s14  ;;  %v2256_v38 = vsel %vm9587_vm0, %v7814_v15, 0  ;;  %vm9588_vm11 = vmmov %vm9584_vm9  ;;  %v2251_v18 = vsel %vm837_vm2, %v7711_v2, 0 }
 0x330   : >> { %2099 = vrot.lane.b32.xlu1 %v2069_v51, %s6842_s14  ;;  %v2258_v39 = vsel %vm9588_vm11, %v7883_v22, 0  ;;  %v7910_v51 = vpop.permute.xlu0 %1949  ;;  %vm9591_vm13 = vmmov %vm9590_vm1 }
 0x331   : >> { %vm9592_vm2 = vmmov %vm9589_vm15 }
 0x332   : >> { %vm9593_vm9 = vmmov %vm9592_vm2 }
 0x333   : >> { %2103 = vrot.lane.b32.xlu0 %v2071_v26, %s6842_s14  ;;  %v2331_v26 = vsel %vm9590_vm1, %v7690_v1, 0  ;;  %vm9594_vm10 = vmmov %vm9590_vm1 }
 0x334   : >> { %2109 = vrot.lane.b32.xlu1 %v2074_v14, %s6842_s14  ;;  %v2334_v14 = vsel %vm9591_vm13, %v7708_v21, 0  ;;  %vm9595_vm14 = vmmov %vm9592_vm2 }
 0x335   : >> { %vm9596_vm0 = vmmov %vm9590_vm1 }
 0x336   : >> { %vm9599_vm11 = vmmov %vm9598_vm12 }
 0x337   : >> { %2107 = vrot.lane.b32.xlu0 %v2073_v6, %s6842_s14  ;;  %v7920_v6 = vpop.permute.xlu1 %2017  ;;  %vm9600_vm15 = vmmov %vm9599_vm11 }
 0x338   : >> { %2173 = vrot.lane.b32.xlu1 %v2148_v23, %s6839_s30  ;;  %v7926_v23 = vpop.permute.xlu0 %2009  ;;  %vm9601_vm1 = vmmov %vm9599_vm11 }
 0x339   : >> { %vm9602_vm13 = vmmov %vm9601_vm1 }
 0x33b   : >> { %2105 = vrot.lane.b32.xlu0 %v2072_v36, %s6842_s14  ;;  %v2338_v36 = vsel %vm9592_vm2, %v7802_v44, 0  ;;  %vm9603_vm2 = vmmov %vm9601_vm1 }
 0x33c   : >> { %2171 = vrot.lane.b32.xlu1 %v2147_v20, %s6839_s30  ;;  %v7937_v20 = vpop.permute.xlu1 %2015 }
 0x33f   : >> { %2175 = vrot.lane.b32.xlu0 %v2149_v52, %s6839_s30  ;;  %v7939_v52 = vpop.permute.xlu0 %2019 }
 0x340   : >> { %2097 = vrot.lane.b32.xlu1 %v2068_v30, %s6842_s14  ;;  %v2341_v30 = vsel %vm9593_vm9, %v7805_v32, 0  ;;  %v7952_v34 = vpop.permute.xlu1 %2025  ;;  %s9597_s14 = smov 112   ;;  %vm9604_vm9 = vmmov %vm9601_vm1 }
 0x343   : >> { %2179 = vrot.lane.b32.xlu0 %v2151_v31, %s6839_s30  ;;  %v2337_v31 = vsel %vm9594_vm10, %v7787_v42, 0  ;;  %vm9605_vm10 = vcmp.ne.s16.totalorder %v7370_v61, 0 }
 0x344   : >> { %2185 = vrot.lane.b32.xlu1 %v2154_v33, %s6839_s30  ;;  %v2335_v33 = vsel %vm9595_vm14, %v7711_v2, 0  ;;  %vm9607_vm14 = vmmov %vm9601_vm1 }
 0x347   : >> { %2177 = vrot.lane.b32.xlu0 %v2150_v50, %s6839_s30  ;;  %v7958_v50 = vpop.permute.xlu0 %2023 }
 0x348   : >> { %2183 = vrot.lane.b32.xlu1 %v2153_v63, %s6839_s30  ;;  %v2340_v63 = vsel %vm9596_vm0, %v7814_v15, 0  ;;  %vm9608_vm0 = vcmask 130048  }
 0x34b   : >> { %2187 = vrot.lane.b32.xlu0 %v2155_v29, %s6839_s30 }
 0x34c   : >> { %2193 = vrot.lane.b32.xlu1 %v2158_v37, %s6839_s30 }
 0x34f   : >> { %2191 = vrot.lane.b32.xlu0 %v2157_v45, %s6839_s30 }
 0x350   : >> { %2181 = vrot.lane.b32.xlu1 %v2152_v5, %s6839_s30 }
 0x353   : >> { %2189 = vrot.lane.b32.xlu0 %v2156_v4, %s6839_s30 }
 0x354   : >> { %2273 = vrot.lane.b32.xlu1 %v2248_v60, %s6838_s29 }
 0x357   : >> { %2275 = vrot.lane.b32.xlu0 %v2249_v46, %s6838_s29  ;;  %v1960_v46 = vsel %vm9602_vm13, %v7858_v10, %v7876_v11 }
 0x358   : >> { %2271 = vrot.lane.b32.xlu1 %v2247_v57, %s6838_s29 }
 0x35b   : >> { %2277 = vrot.lane.b32.xlu0 %v2250_v12, %s6838_s29 }
 0x35c   : >> { %2281 = vrot.lane.b32.xlu1 %v2252_v27, %s6838_s29  ;;  %v1959_v27 = vsel %vm9603_vm2, %v7871_v24, %v7858_v10  ;;  %v1961_v10 = vsel %vm9607_vm14, %v7910_v51, %v7895_v3  ;;  %vm9617_vm14 = vcmp.ne.s16.totalorder %v7370_v61, 0 }
 0x35f   : >> { %2287 = vrot.lane.b32.xlu0 %v2255_v0, %s6838_s29 }
 0x360   : >> { %2285 = vrot.lane.b32.xlu1 %v2254_v13, %s6838_s29 }
 0x363   : >> { %2291 = vrot.lane.b32.xlu0 %v2257_v53, %s6838_s29  ;;  %v2488_v53 = vsel %vm9605_vm10, %v7692_v17, 0  ;;  %vm9616_vm10 = vmmov %vm9608_vm0 }
 0x364   : >> { %2283 = vrot.lane.b32.xlu1 %v2253_v28, %s6838_s29  ;;  %v2032_v51 = vsel %vm9616_vm10, %v7920_v6, %v7939_v52 }
 0x367   : >> { %2289 = vrot.lane.b32.xlu0 %v2256_v38, %s6838_s29 }
 0x368   : >> { %2293 = vrot.lane.b32.xlu1 %v2258_v39, %s6838_s29 }
 0x36b   : >> { %2359 = vrot.lane.b32.xlu0 %v2333_v8, %s6837_s28 }
 0x36c   : >> { %2357 = vrot.lane.b32.xlu1 %v2332_v7, %s6837_s28 }
 0x36f   : >> { %2279 = vrot.lane.b32.xlu0 %v2251_v18, %s6838_s29 }
 0x370   : >> { %2355 = vrot.lane.b32.xlu1 %v2331_v26, %s6837_s28 }
 0x373   : >> { %2361 = vrot.lane.b32.xlu0 %v2334_v14, %s6837_s28 }
 0x374   : >> { %2365 = vrot.lane.b32.xlu1 %v2336_v19, %s6837_s28  ;;  %v2491_v19 = vsel %vm9617_vm14, %v7711_v2, 0 }
 0x377   : >> { %2371 = vrot.lane.b32.xlu0 %v2339_v25, %s6837_s28 }
 0x378   : >> { %2369 = vrot.lane.b32.xlu1 %v2338_v36, %s6837_s28 }
 0x37b   : >> { %2375 = vrot.lane.b32.xlu0 %v2341_v30, %s6837_s28 }
 0x37c   : >> { %2367 = vrot.lane.b32.xlu1 %v2337_v31, %s6837_s28 }
 0x37f   : >> { %2363 = vrot.lane.b32.xlu0 %v2335_v33, %s6837_s28 }
 0x380   : >> { %2377 = vrot.lane.b32.xlu1 %v2342_v47, %s6837_s28 }
 0x383   : >> { %2373 = vrot.lane.b32.xlu0 %v2340_v63, %s6837_s28  ;;  %s9606_s28 = smov 111  }
 0x384   : >> { %2429 = vrot.lane.b32.xlu1 %v7692_v17, %s9597_s14  ;;  %v2006_v55 = vpop.permute.xlu1 %2005 }
 0x385   : >> { %v2008_v29 = vpop.permute.xlu0 %2007 }
 0x386   : >> { %v2028_v24 = vsel %vm9608_vm0, %v2006_v55, %v2008_v29 }
 0x387   : >> { %2431 = vrot.lane.b32.xlu0 %v7834_v48, %s9597_s14 }
 0x388   : >> { %2427 = vrot.lane.b32.xlu1 %v7690_v1, %s9597_s14  ;;  %v1934_v43 = vpop.permute.xlu1 %1933 }
 0x389   : >> { %v1936_v37 = vpop.permute.xlu0 %1935  ;;  %v1955_v49 = vsel %vm9599_vm11, %v7837_v54, %v1934_v43  ;;  %vm9610_vm11 = vcmp.ne.s16.totalorder %v7358_v58, 0  ;;  %v2683_v58 = vld [vmem:[%s9464_s4 + $0x20] sm:$0xff] }
 0x38a   : >> { %v1956_v45 = vsel %vm9598_vm12, %v1934_v43, %v1936_v37  ;;  %vm9609_vm12 = vcmp.ne.s16.totalorder %v7365_v59, 0  ;;  %v2487_v39 = vsel %vm9610_vm11, %v7690_v1, 0  ;;  %vm9613_vm13 = vmmov %vm9610_vm11  ;;  %v2680_v43 = vld [vmem:[%s9464_s4 + $0x8] sm:$0xff] }
 0x38b   : >> { %2435 = vrot.lane.b32.xlu0 %v7711_v2, %s9597_s14  ;;  %2999 = vmatprep.subr.bf16.mxu1 %v1956_v45  ;;  %v2489_v38 = vsel %vm9609_vm12, %v7834_v48, 0  ;;  %v2490_v48 = vsel %vm9613_vm13, %v7708_v21, 0  ;;  %vm9614_vm2 = vmmov %vm9609_vm12 }
 0x38c   : >> { %2437 = vrot.lane.b32.xlu1 %v7847_v56, %s9597_s14  ;;  %3000 = vmatpush1.bf16.msra.mxu1 %v1955_v49  ;;  %v2492_v18 = vsel %vm9614_vm2, %v7847_v56, 0 }
 0x38d   : >> { %v2012_v41 = vpop.permute.xlu0 %2011 }
 0x38e   : >> { %v2014_v5 = vpop.permute.xlu1 %2013 }
 0x38f   : >> { %2433 = vrot.lane.b32.xlu0 %v7708_v21, %s9597_s14 }
 0x390   : >> { %2441 = vrot.lane.b32.xlu1 %v7802_v44, %s9597_s14 }
 0x391   : >> { %v1940_v62 = vpop.permute.xlu0 %1939 }
 0x392   : >> { %v1942_v4 = vpop.permute.xlu1 %1941  ;;  %v1957_v60 = vsel %vm9600_vm15, %v7861_v40, %v1940_v62  ;;  %v1962_v40 = vsel %vm9604_vm9, %v7895_v3, %v7892_v35  ;;  %vm9611_vm15 = vmmov %vm9608_vm0 }
 0x393   : >> { %2443 = vrot.lane.b32.xlu0 %v7856_v9, %s9597_s14  ;;  %v1958_v54 = vsel %vm9601_vm1, %v1940_v62, %v1942_v4  ;;  %v2027_v35 = vsel %vm9611_vm15, %v7905_v16, %v2006_v55  ;;  %vm9612_vm1 = vmmov %vm9608_vm0  ;;  %v2679_v55 = vld [vmem:[%s9464_s4] sm:$0xff] }
 0x394   : >> { %2439 = vrot.lane.b32.xlu1 %v7787_v42, %s9597_s14  ;;  %3001 = vmatprep.subr.bf16.mxu1 %v1958_v54  ;;  %v2030_v3 = vsel %vm9612_vm1, %v2012_v41, %v2014_v5  ;;  %vm9615_vm9 = vmmov %vm9608_vm0  ;;  %v2684_v5 = vld [vmem:[%s9464_s4 + $0x28] sm:$0xff] }
 0x395   : >> { %3002 = vmatpush1.bf16.msra.mxu1 %v1957_v60  ;;  %v2022_v57 = vpop.permute.xlu0 %2021  ;;  %v2029_v16 = vsel %vm9615_vm9, %v7926_v23, %v2012_v41  ;;  %vm9618_vm0 = vmmov %vm9617_vm14  ;;  %v2681_v60 = vld [vmem:[%s9464_s4 + $0x10] sm:$0xff] }
 0x396   : >> { %v7992_v12 = vpop.permute.xlu1 %2089  ;;  %3003 = vmatprep.subr.bf16.mxu1 %v1960_v46  ;;  %v2494_v56 = vsel %vm9618_vm0, %v7802_v44, 0  ;;  %vm9619_vm12 = vmmov %vm9612_vm1 }
 0x397   : >> { %2447 = vrot.lane.b32.xlu0 %v7805_v32, %s9597_s14  ;;  %v2031_v23 = vsel %vm9619_vm12, %v7937_v20, %v7920_v6  ;;  %vm9620_vm11 = vmmov %vm9612_vm1 }
 0x398   : >> { %2449 = vrot.lane.b32.xlu1 %v7883_v22, %s9597_s14  ;;  %v2034_v25 = vsel %vm9620_vm11, %v7958_v50, %v7952_v34  ;;  %vm9621_vm15 = vmmov %vm9614_vm2  ;;  %vm9624_vm2 = vcmask 121856  }
 0x399   : >> { %3004 = vmatpush1.bf16.msra.mxu1 %v1959_v27  ;;  %v2092_v0 = vpop.permute.xlu0 %2091  ;;  %v2495_v30 = vsel %vm9621_vm15, %v7856_v9, 0  ;;  %vm9622_vm1 = vmmov %vm9613_vm13 }
 0x39a   : >> { %v2088_v13 = vpop.permute.xlu1 %2087  ;;  %3005 = vmatprep.subr.bf16.mxu1 %v1962_v40  ;;  %v2493_v31 = vsel %vm9622_vm1, %v7787_v42, 0  ;;  %vm9623_vm13 = vmmov %vm9615_vm9  ;;  %v2112_v20 = vsel %vm9624_vm2, %v7992_v12, %v2092_v0  ;;  %v2685_v40 = vld [vmem:[%s9464_s4 + $0x30] sm:$0xff] }
 0x39b   : >> { %2445 = vrot.lane.b32.xlu0 %v7814_v15, %s9597_s14  ;;  %v2033_v6 = vsel %vm9623_vm13, %v2022_v57, %v7958_v50  ;;  %vm9625_vm9 = vmmov %vm9618_vm0  ;;  %v2682_v57 = vld [vmem:[%s9464_s4 + $0x18] sm:$0xff]  ;;  %s6844_s14 = smov 121  }
 0x39c   : >> { %2513 = vrot.lane.b32.xlu1 %v2488_v53, %s9606_s28  ;;  %v2497_v9 = vsel %vm9625_vm9, %v7805_v32, 0  ;;  %vm9626_vm10 = vmmov %vm9621_vm15  ;;  %vm9635_vm9 = vcmask 7168   ;;  %v2686_v53 = vld [vmem:[%s9464_s4 + $0x38] sm:$0xff] }
 0x39d   : >> { %3006 = vmatpush1.bf16.msra.mxu1 %v1961_v10  ;;  %v2096_v11 = vpop.permute.xlu0 %2095  ;;  %v2498_v47 = vsel %vm9626_vm10, %v7883_v22, 0  ;;  %vm9627_vm14 = vmmov %vm9624_vm2 }
 0x39e   : >> { %v8014_v28 = vpop.permute.xlu1 %2101  ;;  %3007 = vmatprep.subr.bf16.mxu1 %v2028_v24  ;;  %v2111_v50 = vsel %vm9627_vm14, %v2088_v13, %v7992_v12  ;;  %vm9628_vm0 = vmmov %vm9622_vm1  ;;  %v2687_v24 = vld [vmem:[%s9464_s4 + $0x40] sm:$0xff] }
 0x39f   : >> { %2515 = vrot.lane.b32.xlu0 %v2489_v38, %s9606_s28  ;;  %v2496_v61 = vsel %vm9628_vm0, %v7814_v15, 0  ;;  %vm9629_vm12 = vmmov %vm9624_vm2 }
 0x3a0   : >> { %2511 = vrot.lane.b32.xlu1 %v2487_v39, %s9606_s28  ;;  %vm9630_vm11 = vmmov %vm9624_vm2  ;;  %v2688_v39 = vld [vmem:[%s9464_s4 + $0x48] sm:$0xff] }
 0x3a1   : >> { %3008 = vmatpush1.bf16.msra.mxu1 %v2027_v35  ;;  %v2094_v8 = vpop.permute.xlu0 %2093  ;;  %vm9631_vm15 = vmmov %vm9624_vm2 }
 0x3a2   : >> { %v2100_v7 = vpop.permute.xlu1 %2099  ;;  %3009 = vmatprep.subr.bf16.mxu1 %v2030_v3  ;;  %v2113_v22 = vsel %vm9630_vm11, %v2094_v8, %v2096_v11  ;;  %vm9632_vm1 = vmmov %vm9624_vm2  ;;  %v2691_v8 = vld [vmem:[%s9464_s4 + $0x60] sm:$0xff] }
 0x3a3   : >> { %2517 = vrot.lane.b32.xlu0 %v2490_v48, %s9606_s28  ;;  %v2115_v41 = vsel %vm9632_vm1, %v2100_v7, %v8014_v28  ;;  %vm9633_vm13 = vmmov %vm9632_vm1 }
 0x3a4   : >> { %2521 = vrot.lane.b32.xlu1 %v2492_v18, %s9606_s28  ;;  %vm9634_vm2 = vmmov %vm9632_vm1  ;;  %v2692_v18 = vld [vmem:[%s9464_s4 + $0x68] sm:$0xff] }
 0x3a5   : >> { %3010 = vmatpush1.bf16.msra.mxu1 %v2029_v16  ;;  %v2104_v26 = vpop.permute.xlu0 %2103  ;;  %vm9636_vm10 = vmmov %vm9635_vm9 }
 0x3a6   : >> { %v2110_v14 = vpop.permute.xlu1 %2109  ;;  %3011 = vmatprep.subr.bf16.mxu1 %v2032_v51  ;;  %v2116_v37 = vsel %vm9631_vm15, %v8014_v28, %v2104_v26  ;;  %vm9637_vm14 = vmmov %vm9635_vm9  ;;  %v2689_v26 = vld [vmem:[%s9464_s4 + $0x50] sm:$0xff] }
 0x3a7   : >> { %2519 = vrot.lane.b32.xlu0 %v2491_v19, %s9606_s28  ;;  %vm9638_vm0 = vmmov %vm9635_vm9 }
 0x3a8   : >> { %2525 = vrot.lane.b32.xlu1 %v2494_v56, %s9606_s28  ;;  %vm9640_vm11 = vmmov %vm9638_vm0  ;;  %v6369_v56 = vld [vmem:[%s9463_s3] ss:$20 sps:$4 sm:$0xff]  }
 0x3a9   : >> { %3012 = vmatpush1.bf16.msra.mxu1 %v2031_v23  ;;  %v2108_v36 = vpop.permute.xlu0 %2107  ;;  %vm9641_vm15 = vmmov %vm9638_vm0  ;;  %v2690_v23 = vld [vmem:[%s9464_s4 + $0x58] sm:$0xff] }
 0x3aa   : >> { %v2174_v52 = vpop.permute.xlu1 %2173  ;;  %3013 = vmatprep.subr.bf16.mxu1 %v2034_v25  ;;  %v2118_v62 = vsel %vm9633_vm13, %v2108_v36, %v2110_v14  ;;  %vm9642_vm1 = vmmov %vm9638_vm0  ;;  %vm9643_vm13 = vcmask 1039360  }
 0x3ab   : >> { %2527 = vrot.lane.b32.xlu0 %v2495_v30, %s9606_s28 }
 0x3ac   : >> { %2523 = vrot.lane.b32.xlu1 %v2493_v31, %s9606_s28  ;;  %v2694_v31 = vld [vmem:[%s9464_s4 + $0x78] sm:$0xff] }
 0x3ad   : >> { %3014 = vmatpush1.bf16.msra.mxu1 %v2033_v6  ;;  %v2106_v33 = vpop.permute.xlu0 %2105 }
 0x3ae   : >> { %v2172_v34 = vpop.permute.xlu1 %2171  ;;  %3015 = vmatprep.subr.bf16.mxu1 %v2112_v20  ;;  %v2117_v46 = vsel %vm9634_vm2, %v2106_v33, %v2108_v36  ;;  %v2693_v36 = vld [vmem:[%s9464_s4 + $0x70] sm:$0xff]  ;;  %v6374_v33 = vld [vmem:[%s9463_s3 + $0x28] ss:$20 sps:$4 sm:$0xff]   ;;  %vm9644_vm2 = vmmov %vm9643_vm13 }
 0x3af   : >> { %2531 = vrot.lane.b32.xlu0 %v2497_v9, %s9606_s28  ;;  %v2195_v13 = vsel %vm9636_vm10, %v2172_v34, %v2174_v52  ;;  %v6375_v34 = vld [vmem:[%s9463_s3 + $0x54] ss:$20 sps:$4 sm:$0xff]   ;;  %vm9646_vm10 = vmmov %vm9644_vm2 }
 0x3b0   : >> { %2533 = vrot.lane.b32.xlu1 %v2498_v47, %s9606_s28 }
 0x3b1   : >> { %3016 = vmatpush1.bf16.msra.mxu1 %v2111_v50  ;;  %v2176_v63 = vpop.permute.xlu0 %2175 }
 0x3b2   : >> { %v2098_v29 = vpop.permute.xlu1 %2097  ;;  %v2196_v12 = vsel %vm9635_vm9, %v2174_v52, %v2176_v63  ;;  %v6372_v52 = vld [vmem:[%s9463_s3 + $0x2c] ss:$20 sps:$4 sm:$0xff]   ;;  %vm9645_vm9 = vmmov %vm9644_vm2 }
 0x3b3   : >> { %2529 = vrot.lane.b32.xlu0 %v2496_v61, %s9606_s28  ;;  %v2114_v59 = vsel %vm9629_vm12, %v2096_v11, %v2098_v29  ;;  %vm9639_vm12 = vmmov %vm9638_vm0  ;;  %v6380_v61 = vld [vmem:[%s9463_s3 + $0x78] ss:$20 sps:$4 sm:$0xff]   ;;  %s6845_s28 = smov 119  }
 0x3b4   : >> { %2697 = vperm.xlu1 %6314, %v2679_v55   ;;  %3017 = vmatprep.subr.bf16.mxu1 %v2114_v59 }
 0x3b5   : >> { %3018 = vmatpush1.bf16.msra.mxu1 %v2113_v22  ;;  %v2180_v45 = vpop.permute.xlu0 %2179 }
 0x3b6   : >> { %v2186_v49 = vpop.permute.xlu1 %2185  ;;  %3019 = vmatprep.subr.bf16.mxu1 %v2116_v37 }
 0x3b7   : >> { %2702 = vperm.xlu0 %6313, %v2680_v43   ;;  %v6381_v43 = vld [vmem:[%s9463_s3 + $0xa4] ss:$20 sps:$4 sm:$0xff]  }
 0x3b8   : >> { %2717 = vperm.xlu1 %6314, %v2683_v58  }
 0x3b9   : >> { %3020 = vmatpush1.bf16.msra.mxu1 %v2115_v41  ;;  %v2178_v4 = vpop.permute.xlu0 %2177 }
 0x3ba   : >> { %v2184_v54 = vpop.permute.xlu1 %2183  ;;  %3021 = vmatprep.subr.bf16.mxu1 %v2118_v62  ;;  %v2197_v38 = vsel %vm9638_vm0, %v2178_v4, %v2180_v45  ;;  %vm9648_vm0 = vmmov %vm9644_vm2  ;;  %v6383_v62 = vld [vmem:[%s9463_s3 + $0xa0] ss:$20 sps:$4 sm:$0xff]  }
 0x3bb   : >> { %2722 = vperm.xlu0 %6313, %v2684_v5   ;;  %v2199_v48 = vsel %vm9640_vm11, %v2184_v54, %v2186_v49  ;;  %vm9650_vm11 = vmmov %vm9648_vm0  ;;  %v6384_v54 = vld [vmem:[%s9463_s3 + $0xcc] ss:$20 sps:$4 sm:$0xff]  }
 0x3bc   : >> { %2707 = vperm.xlu1 %6314, %v2681_v60  }
 0x3bd   : >> { %3022 = vmatpush1.bf16.msra.mxu1 %v2117_v46  ;;  %v2188_v27 = vpop.permute.xlu0 %2187 }
 0x3be   : >> { %v2194_v0 = vpop.permute.xlu1 %2193  ;;  %3023 = vmatprep.subr.bf16.mxu1 %v2196_v12  ;;  %v2200_v35 = vsel %vm9639_vm12, %v2186_v49, %v2188_v27  ;;  %vm9649_vm12 = vmmov %vm9648_vm0 }
 0x3bf   : >> { %2712 = vperm.xlu0 %6313, %v2682_v57  }
 0x3c0   : >> { %2727 = vperm.xlu1 %6314, %v2685_v40  }
 0x3c1   : >> { %3024 = vmatpush1.bf16.msra.mxu1 %v2195_v13  ;;  %v2192_v10 = vpop.permute.xlu0 %2191  ;;  %v6386_v13 = vld [vmem:[%s9463_s3 + $0xc8] ss:$20 sps:$4 sm:$0xff]  }
 0x3c2   : >> { %v2182_v11 = vpop.permute.xlu1 %2181  ;;  %v2202_v16 = vsel %vm9641_vm15, %v2192_v10, %v2194_v0  ;;  %vm9651_vm15 = vcmask 924672  }
 0x3c3   : >> { %2732 = vperm.xlu0 %6313, %v2686_v53   ;;  %v2198_v28 = vsel %vm9637_vm14, %v2180_v45, %v2182_v11  ;;  %vm9647_vm14 = vmmov %vm9644_vm2 }
 0x3c4   : >> { %2737 = vperm.xlu1 %6314, %v2687_v24   ;;  %3025 = vmatprep.subr.bf16.mxu1 %v2198_v28  ;;  %v6387_v24 = vld [vmem:[%s9463_s3 + $0xf4] ss:$20 sps:$4 sm:$0xff]  }
 0x3c5   : >> { %3026 = vmatpush1.bf16.msra.mxu1 %v2197_v38  ;;  %v2190_v3 = vpop.permute.xlu0 %2189 }
 0x3c6   : >> { %v2274_v7 = vpop.permute.xlu1 %2273  ;;  %3027 = vmatprep.subr.bf16.mxu1 %v2200_v35  ;;  %v2201_v19 = vsel %vm9642_vm1, %v2190_v3, %v2192_v10  ;;  %vm9652_vm1 = vmmov %vm9651_vm15 }
 0x3c7   : >> { %2742 = vperm.xlu0 %6313, %v2688_v39  }
 0x3c8   : >> { %2757 = vperm.xlu1 %6314, %v2691_v8   ;;  %v6389_v8 = vld [vmem:[%s9463_s3 + $0xf0] ss:$20 sps:$4 sm:$0xff]  }
 0x3c9   : >> { %3028 = vmatpush1.bf16.msra.mxu1 %v2199_v48  ;;  %v2276_v51 = vpop.permute.xlu0 %2275 }
 0x3ca   : >> { %v2272_v14 = vpop.permute.xlu1 %2271  ;;  %3029 = vmatprep.subr.bf16.mxu1 %v2202_v16  ;;  %v2296_v47 = vsel %vm9643_vm13, %v2274_v7, %v2276_v51  ;;  %vm9653_vm13 = vmmov %vm9652_vm1 }
 0x3cb   : >> { %2762 = vperm.xlu0 %6313, %v2692_v18   ;;  %v6390_v18 = vld [vmem:[%s9463_s3 + $0x11c] ss:$20 sps:$4 sm:$0xff]  }
 0x3cc   : >> { %2747 = vperm.xlu1 %6314, %v2689_v26  }
 0x3cd   : >> { %3030 = vmatpush1.bf16.msra.mxu1 %v2201_v19  ;;  %v2278_v25 = vpop.permute.xlu0 %2277 }
 0x3ce   : >> { %v2282_v30 = vpop.permute.xlu1 %2281  ;;  %3112 = vmatprep.subr.bf16.mxu1 %v7692_v17 }
 0x3cf   : >> { %2752 = vperm.xlu0 %6313, %v2690_v23   ;;  %v6392_v23 = vld [vmem:[%s9463_s3 + $0x118] ss:$20 sps:$4 sm:$0xff]  }
 0x3d0   : >> { %2767 = vperm.xlu1 %6314, %v2693_v36   ;;  %3032 = vmatmul.mubr.bf16.vlgmr.msra.gmra.mrb[0].mxu1 %v6369_v56  ;;  %v6395_v36 = vld [vmem:[%s9463_s3 + $0xc] ss:$20 sps:$4 sm:$0xff]  }
 0x3d1   : >> { %3113 = vmatpush1.bf16.msra.mxu1 %v7690_v1  ;;  %v2288_v6 = vpop.permute.xlu0 %2287  ;;  %3041 = vmatprep.mubr.bf16.mxu1 %v6372_v52 }
 0x3d2   : >> { %v2286_v20 = vpop.permute.xlu1 %2285  ;;  %3114 = vmatprep.subr.bf16.mxu1 %v7711_v2 }
 0x3d3   : >> { %2772 = vperm.xlu0 %6313, %v2694_v31   ;;  %v2300_v59 = vsel %vm9647_vm14, %v2286_v20, %v2288_v6  ;;  %vm9657_vm14 = vmmov %vm9652_vm1 }
 0x3d5   : >> { %3115 = vmatpush1.bf16.msra.mxu1 %v7708_v21  ;;  %v2292_v17 = vpop.permute.xlu0 %2291  ;;  %v6377_v21 = vld [vmem:[%s9463_s3 + $0x50] ss:$20 sps:$4 sm:$0xff]  }
 0x3d6   : >> { %v2284_v9 = vpop.permute.xlu1 %2283  ;;  %3116 = vmatprep.subr.bf16.mxu1 %v7802_v44  ;;  %v6378_v44 = vld [vmem:[%s9463_s3 + $0x7c] ss:$20 sps:$4 sm:$0xff]  }
 0x3d7   : >> { %v2299_v45 = vsel %vm9648_vm0, %v2284_v9, %v2286_v20  ;;  %vm9658_vm0 = vmmov %vm9652_vm1 }
 0x3d8   : >> { %3042 = vmatmul.mubr.bf16.gmra.mrb[4].mxu1 %v6374_v33 }
 0x3d9   : >> { %3117 = vmatpush1.bf16.msra.mxu1 %v7787_v42  ;;  %v2290_v1 = vpop.permute.xlu0 %2289  ;;  %3051 = vmatprep.mubr.bf16.mxu1 %v6375_v34  ;;  %v2295_v42 = vsel %vm9644_vm2, %v2272_v14, %v2274_v7  ;;  %vm9654_vm2 = vmmov %vm9652_vm1 }
 0x3da   : >> { %v2294_v2 = vpop.permute.xlu1 %2293  ;;  %3118 = vmatprep.subr.bf16.mxu1 %v7805_v32  ;;  %v2301_v5 = vsel %vm9650_vm11, %v2290_v1, %v2292_v17  ;;  %v6393_v1 = vld [vmem:[%s9463_s3 + $0x8] ss:$20 sps:$4 sm:$0xff]  }
 0x3db   : >> { %v2302_v58 = vsel %vm9649_vm12, %v2292_v17, %v2294_v2  ;;  %vm9659_vm12 = vcmask 916480   ;;  %v6396_v2 = vld [vmem:[%s9463_s3 + $0x34] ss:$20 sps:$4 sm:$0xff]  }
 0x3dc   : >> { %vm9660_vm11 = vmmov %vm9659_vm12 }
 0x3dd   : >> { %3119 = vmatpush1.bf16.msra.mxu1 %v7814_v15  ;;  %v2360_v50 = vpop.permute.xlu0 %2359 }
 0x3de   : >> { %v2358_v63 = vpop.permute.xlu1 %2357  ;;  %3120 = vmatprep.subr.bf16.mxu1 %v2296_v47 }
 0x3df   : >> { %v2380_v4 = vsel %vm9651_vm15, %v2358_v63, %v2360_v50  ;;  %vm9661_vm15 = vmmov %vm9660_vm11 }
 0x3e0   : >> { %3052 = vmatmul.mubr.bf16.gmra.mrb[8].mxu1 %v6377_v21 }
 0x3e1   : >> { %3121 = vmatpush1.bf16.msra.mxu1 %v2295_v42  ;;  %v2280_v32 = vpop.permute.xlu0 %2279  ;;  %3061 = vmatprep.mubr.bf16.mxu1 %v6378_v44 }
 0x3e2   : >> { %v2356_v55 = vpop.permute.xlu1 %2355  ;;  %v2298_v29 = vsel %vm9645_vm9, %v2280_v32, %v2282_v30  ;;  %v2297_v15 = vsel %vm9646_vm10, %v2278_v25, %v2280_v32  ;;  %vm9655_vm9 = vmmov %vm9652_vm1  ;;  %v6398_v32 = vld [vmem:[%s9463_s3 + $0x30] ss:$20 sps:$4 sm:$0xff]  }
 0x3e3   : >> { %3122 = vmatprep.subr.bf16.mxu1 %v2298_v29  ;;  %v2379_v57 = vsel %vm9652_vm1, %v2356_v55, %v2358_v63  ;;  %vm9656_vm10 = vmmov %vm9652_vm1  ;;  %v6399_v55 = vld [vmem:[%s9463_s3 + $0x5c] ss:$20 sps:$4 sm:$0xff]  }
 0x3e4   : >> { %vm9662_vm1 = vmmov %vm9660_vm11 }
 0x3e5   : >> { %3123 = vmatpush1.bf16.msra.mxu1 %v2297_v15  ;;  %v2362_v22 = vpop.permute.xlu0 %2361 }
 0x3e6   : >> { %v2366_v37 = vpop.permute.xlu1 %2365  ;;  %3124 = vmatprep.subr.bf16.mxu1 %v2300_v59 }
 0x3e8   : >> { %3062 = vmatmul.mubr.bf16.gmra.mrb[12].mxu1 %v6380_v61 }
 0x3e9   : >> { %3125 = vmatpush1.bf16.msra.mxu1 %v2299_v45  ;;  %v2372_v49 = vpop.permute.xlu0 %2371  ;;  %3071 = vmatprep.mubr.bf16.mxu1 %v6381_v43  ;;  %v6401_v45 = vld [vmem:[%s9463_s3 + $0x58] ss:$20 sps:$4 sm:$0xff]  }
 0x3ea   : >> { %v2370_v41 = vpop.permute.xlu1 %2369  ;;  %3126 = vmatprep.subr.bf16.mxu1 %v2302_v58 }
 0x3eb   : >> { %v2384_v53 = vsel %vm9655_vm9, %v2370_v41, %v2372_v49  ;;  %vm9665_vm9 = vmmov %vm9662_vm1  ;;  %v6402_v49 = vld [vmem:[%s9463_s3 + $0x84] ss:$20 sps:$4 sm:$0xff]  }
 0x3ed   : >> { %3127 = vmatpush1.bf16.msra.mxu1 %v2301_v5  ;;  %v2376_v60 = vpop.permute.xlu0 %2375 }
 0x3ee   : >> { %v2368_v46 = vpop.permute.xlu1 %2367  ;;  %3128 = vmatprep.subr.bf16.mxu1 %v2380_v4 }
 0x3ef   : >> { %v2383_v28 = vsel %vm9656_vm10, %v2368_v46, %v2370_v41  ;;  %vm9666_vm10 = vmmov %vm9662_vm1  ;;  %v6405_v46 = vld [vmem:[%s9463_s3 + $0xac] ss:$20 sps:$4 sm:$0xff]  }
 0x3f0   : >> { %3072 = vmatmul.mubr.bf16.gmra.mrb[16].mxu1 %v6383_v62 }
 0x3f1   : >> { %3129 = vmatpush1.bf16.msra.mxu1 %v2379_v57  ;;  %v2364_v12 = vpop.permute.xlu0 %2363  ;;  %3081 = vmatprep.mubr.bf16.mxu1 %v6384_v54  ;;  %v6404_v54 = vld [vmem:[%s9463_s3 + $0x80] ss:$20 sps:$4 sm:$0xff]   ;;  %v6407_v57 = vld [vmem:[%s9463_s3 + $0xa8] ss:$20 sps:$4 sm:$0xff]  }
 0x3f2   : >> { %v2378_v27 = vpop.permute.xlu1 %2377  ;;  %v2382_v40 = vsel %vm9653_vm13, %v2364_v12, %v2366_v37  ;;  %v2381_v0 = vsel %vm9654_vm2, %v2362_v22, %v2364_v12  ;;  %vm9663_vm13 = vmmov %vm9662_vm1  ;;  %v6408_v12 = vld [vmem:[%s9463_s3 + $0xd4] ss:$20 sps:$4 sm:$0xff]  }
 0x3f3   : >> { %3130 = vmatprep.subr.bf16.mxu1 %v2382_v40  ;;  %v2386_v38 = vsel %vm9657_vm14, %v2376_v60, %v2378_v27  ;;  %vm9664_vm2 = vmmov %vm9662_vm1  ;;  %vm9667_vm14 = vcmask 908288   ;;  %v6410_v27 = vld [vmem:[%s9463_s3 + $0xd0] ss:$20 sps:$4 sm:$0xff]  }
 0x3f4   : >> { %v6411_v40 = vld [vmem:[%s9463_s3 + $0xfc] ss:$20 sps:$4 sm:$0xff]  }
 0x3f5   : >> { %3131 = vmatpush1.bf16.msra.mxu1 %v2381_v0  ;;  %v2374_v10 = vpop.permute.xlu0 %2373  ;;  %v6413_v0 = vld [vmem:[%s9463_s3 + $0xf8] ss:$20 sps:$4 sm:$0xff]  }
 0x3f6   : >> { %v2430_v11 = vpop.permute.xlu1 %2429  ;;  %3132 = vmatprep.subr.bf16.mxu1 %v2384_v53  ;;  %v2385_v3 = vsel %vm9658_vm0, %v2374_v10, %v2376_v60  ;;  %vm9668_vm0 = vmmov %vm9667_vm14  ;;  %v6416_v53 = vld [vmem:[%s9463_s3 + $0x120] ss:$20 sps:$4 sm:$0xff]   ;;  %v9675_v10 = vmov 0  }
 0x3f8   : >> { %3082 = vmatmul.mubr.bf16.gmra.mrb[20].mxu1 %v6386_v13  ;;  %v6414_v13 = vld [vmem:[%s9463_s3 + $0x124] ss:$20 sps:$4 sm:$0xff]  }
 0x3f9   : >> { %3133 = vmatpush1.bf16.msra.mxu1 %v2383_v28  ;;  %v2432_v39 = vpop.permute.xlu0 %2431  ;;  %3091 = vmatprep.mubr.bf16.mxu1 %v6387_v24  ;;  %v6417_v24 = vld [vmem:[%s9463_s3 + $0x10] ss:$20 sps:$4 sm:$0xff]   ;;  %v6419_v28 = vld [vmem:[%s9463_s3 + $0x60] ss:$20 sps:$4 sm:$0xff]  }
 0x3fa   : >> { %v2428_v35 = vpop.permute.xlu1 %2427  ;;  %3134 = vmatprep.subr.bf16.mxu1 %v2386_v38  ;;  %v2452_v7 = vsel %vm9659_vm12, %v2430_v11, %v2432_v39  ;;  %vm9669_vm12 = vmmov %vm9668_vm0  ;;  %v6420_v38 = vld [vmem:[%s9463_s3 + $0x88] ss:$20 sps:$4 sm:$0xff]   ;;  %v6421_v39 = vld [vmem:[%s9463_s3 + $0xb0] ss:$20 sps:$4 sm:$0xff]  }
 0x3fb   : >> { %v2451_v51 = vsel %vm9660_vm11, %v2428_v35, %v2430_v11  ;;  %vm9670_vm11 = vmmov %vm9668_vm0  ;;  %v6418_v11 = vld [vmem:[%s9463_s3 + $0x38] ss:$20 sps:$4 sm:$0xff]  }
 0x3fc   : >> { %v6422_v35 = vld [vmem:[%s9463_s3 + $0xd8] ss:$20 sps:$4 sm:$0xff]  }
 0x3fd   : >> { %3135 = vmatpush1.bf16.msra.mxu1 %v2385_v3  ;;  %v2436_v48 = vpop.permute.xlu0 %2435  ;;  %v6423_v3 = vld [vmem:[%s9463_s3 + $0x100] ss:$20 sps:$4 sm:$0xff]  }
 0x3fe   : >> { %v2438_v16 = vpop.permute.xlu1 %2437  ;;  %3136 = vmatprep.subr.bf16.mxu1 %v2452_v7 }
 0x3ff   : >> { %v2454_v26 = vsel %vm9661_vm15, %v2436_v48, %v2438_v16  ;;  %vm9671_vm15 = vmmov %vm9668_vm0 }
 0x400   : >> { %3092 = vmatmul.mubr.bf16.gmra.mrb[24].mxu1 %v6389_v8  ;;  %v6424_v8 = vld [vmem:[%s9463_s3 + $0x128] ss:$20 sps:$4 sm:$0xff]  }
 0x401   : >> { %3137 = vmatpush1.bf16.msra.mxu1 %v2451_v51  ;;  %v2434_v14 = vpop.permute.xlu0 %2433  ;;  %3101 = vmatprep.mubr.bf16.mxu1 %v6390_v18  ;;  %v9685_v18 = vld [vmem:[#allocation19_spill] sm:$0xff] }
 0x402   : >> { %v2442_v19 = vpop.permute.xlu1 %2441  ;;  %3138 = vmatprep.subr.bf16.mxu1 %v2454_v26  ;;  %v2453_v56 = vsel %vm9662_vm1, %v2434_v14, %v2436_v48  ;;  %vm9672_vm1 = vmmov %vm9668_vm0 }
 0x405   : >> { %3139 = vmatpush1.bf16.msra.mxu1 %v2453_v56  ;;  %v2444_v25 = vpop.permute.xlu0 %2443  ;;  %v6426_v56 = vld [vmem:[%s9467_s7] sm:$0xff]  }
 0x406   : >> { %v2440_v52 = vpop.permute.xlu1 %2439  ;;  %v2456_v30 = vsel %vm9663_vm13, %v2442_v19, %v2444_v25  ;;  %vm9673_vm13 = vmmov %vm9668_vm0  ;;  %v6428_v25 = vld [vmem:[%s9467_s7 + $0x8] sm:$0xff]  }
 0x407   : >> { %v2455_v31 = vsel %vm9664_vm2, %v2440_v52, %v2442_v19  ;;  %3140 = vmatprep.subr.bf16.mxu1 %v2456_v30  ;;  %vm9674_vm2 = vmmov %vm9668_vm0  ;;  %v6425_v19 = vld [vmem:[%s9467_s7 + $0x40] sm:$0xff]   ;;  %v6430_v52 = vld [vmem:[%s9467_s7 + $0x10] sm:$0xff]  }
 0x408   : >> { %3102 = vmatmul.mubr.bf16.gmra.mrb[28].mxu1 %v6392_v23  ;;  %5928 = vmatprep.subr.bf16.mxu0 %v6425_v19  ;;  %v6427_v23 = vld [vmem:[%s9467_s7 + $0x48] sm:$0xff]   ;;  %v6431_v30 = vld [vmem:[%s9467_s7 + $0x58] sm:$0xff]  }
 0x409   : >> { %3141 = vmatpush1.bf16.msra.mxu1 %v2455_v31  ;;  %v2448_v6 = vpop.permute.xlu0 %2447  ;;  %3144 = vmatprep.mubr.bf16.mxu1 %v6395_v36  ;;  %v6429_v36 = vld [vmem:[%s9467_s7 + $0x50] sm:$0xff]   ;;  %v6432_v31 = vld [vmem:[%s9467_s7 + $0x18] sm:$0xff]  }
 0x40a   : >> { %v2450_v20 = vpop.permute.xlu1 %2449  ;;  %5929 = vmatpush3.bf16.msra.mxu0 %v6426_v56 }
 0x40b   : >> { %v2458_v33 = vsel %vm9665_vm9, %v2448_v6, %v2450_v20  ;;  %vm9676_vm9 = vcmask 523264   ;;  %5930 = vmatprep.subr.bf16.mxu0 %v6427_v23  ;;  %v6434_v20 = vld [vmem:[%s9467_s7 + $0x20] sm:$0xff]  }
 0x40c   : >> { %3142 = vmatprep.subr.bf16.mxu1 %v2458_v33  ;;  %v6435_v33 = vld [vmem:[%s9467_s7 + $0x68] sm:$0xff]  }
 0x40d   : >> { %v2446_v17 = vpop.permute.xlu0 %2445 }
 0x40e   : >> { %v2514_v34 = vpop.permute.xlu1 %2513  ;;  %v2457_v9 = vsel %vm9666_vm10, %v2446_v17, %v2448_v6  ;;  %vm9677_vm10 = vmmov %vm9676_vm9  ;;  %5931 = vmatpush3.bf16.msra.mxu0 %v6428_v25  ;;  %v6433_v6 = vld [vmem:[%s9467_s7 + $0x60] sm:$0xff]   ;;  %v6436_v17 = vld [vmem:[%s9467_s7 + $0x28] sm:$0xff]  }
 0x40f   : >> { %3143 = vmatpush1.bf16.msra.mxu1 %v2457_v9  ;;  %5932 = vmatprep.subr.bf16.mxu0 %v6429_v36  ;;  %v6438_v9 = vld [vmem:[%s9467_s7 + $0x30] sm:$0xff]  }
 0x411   : >> { %v2516_v21 = vpop.permute.xlu0 %2515 }
 0x412   : >> { %v2512_v47 = vpop.permute.xlu1 %2511  ;;  %3145 = vmatmul.mubr.bf16.vlgmr.msra.gmra.mrb[0].mxu1 %v6393_v1  ;;  %v2536_v50 = vsel %vm9667_vm14, %v2514_v34, %v2516_v21  ;;  %vm9678_vm14 = vmmov %vm9676_vm9  ;;  %5933 = vmatpush3.bf16.msra.mxu0 %v6430_v52  ;;  %v6439_v1 = vld [vmem:[%s9467_s7 + $0x78] sm:$0xff]   ;;  %v8384_v21 = vld [vmem:[#allocation6 + $0x28] sm:$0xff] }
 0x413   : >> { %v2535_v44 = vsel %vm9668_vm0, %v2512_v47, %v2514_v34  ;;  %3225 = vmatprep.subr.bf16.mxu1 %v2536_v50  ;;  %3154 = vmatprep.mubr.bf16.mxu1 %v6396_v2  ;;  %vm9679_vm0 = vmmov %vm9676_vm9  ;;  %v6437_v34 = vld [vmem:[%s9467_s7 + $0x70] sm:$0xff]   ;;  %v6440_v2 = vld [vmem:[%s9467_s7 + $0x38] sm:$0xff]  }
 0x414   : >> { %3226 = vmatpush1.bf16.msra.mxu1 %v2535_v44  ;;  %5934 = vmatprep.subr.bf16.mxu0 %v6431_v30  ;;  %v8386_v47 = vld [vmem:[#allocation6 + $0x38] sm:$0xff]  ;;  %v8410_v30 = vld [vmem:[#allocation6] sm:$0xff] }
 0x415   : >> { %v2518_v63 = vpop.permute.xlu0 %2517 }
 0x416   : >> { %v2522_v42 = vpop.permute.xlu1 %2521  ;;  %5935 = vmatpush3.bf16.msra.mxu0 %v6432_v31 }
 0x417   : >> { %5936 = vmatprep.subr.bf16.mxu0 %v6433_v6 }
 0x419   : >> { %v2520_v29 = vpop.permute.xlu0 %2519 }
 0x41a   : >> { %v2526_v15 = vpop.permute.xlu1 %2525  ;;  %v2537_v61 = vsel %vm9669_vm12, %v2518_v63, %v2520_v29  ;;  %3155 = vmatmul.mubr.bf16.gmra.mrb[4].mxu1 %v6398_v32  ;;  %v2538_v59 = vsel %vm9670_vm11, %v2520_v29, %v2522_v42  ;;  %vm9680_vm12 = vmmov %vm9679_vm0  ;;  %5937 = vmatpush3.bf16.msra.mxu0 %v6434_v20 }
 0x41b   : >> { %3227 = vmatprep.subr.bf16.mxu1 %v2538_v59  ;;  %3164 = vmatprep.mubr.bf16.mxu1 %v6399_v55  ;;  %vm9681_vm11 = vmmov %vm9679_vm0 }
 0x41c   : >> { %3228 = vmatpush1.bf16.msra.mxu1 %v2537_v61  ;;  %5938 = vmatprep.subr.bf16.mxu0 %v6435_v33 }
 0x41d   : >> { %v2528_v22 = vpop.permute.xlu0 %2527 }
 0x41e   : >> { %v2524_v43 = vpop.permute.xlu1 %2523  ;;  %v2540_v37 = vsel %vm9671_vm15, %v2526_v15, %v2528_v22  ;;  %vm9682_vm15 = vmmov %vm9679_vm0  ;;  %5939 = vmatpush3.bf16.msra.mxu0 %v6436_v17 }
 0x41f   : >> { %v2539_v58 = vsel %vm9672_vm1, %v2524_v43, %v2526_v15  ;;  %3229 = vmatprep.subr.bf16.mxu1 %v2540_v37  ;;  %vm9683_vm1 = vmmov %vm9679_vm0  ;;  %5940 = vmatprep.subr.bf16.mxu0 %v6437_v34 }
 0x420   : >> { %3230 = vmatpush1.bf16.msra.mxu1 %v2539_v58 }
 0x421   : >> { %v2532_v41 = vpop.permute.xlu0 %2531 }
 0x422   : >> { %v2534_v5 = vpop.permute.xlu1 %2533  ;;  %3165 = vmatmul.mubr.bf16.gmra.mrb[8].mxu1 %v6401_v45  ;;  %5941 = vmatpush3.bf16.msra.mxu0 %v6438_v9 }
 0x423   : >> { %v2542_v62 = vsel %vm9673_vm13, %v2532_v41, %v2534_v5  ;;  %3174 = vmatprep.mubr.bf16.mxu1 %v6402_v49  ;;  %vm3854_vm13 = vmpackc.low %vm6962_vm6, %vm6962_vm6  ;;  %5942 = vmatprep.subr.bf16.mxu0 %v6439_v1 }
 0x424   : >> { %3231 = vmatprep.subr.bf16.mxu1 %v2542_v62  ;;  %v3855_v48 = vsel %vm3854_vm13, 65537, %v9675_v10  ;;  %vm9742_vm6 = vmmov (%p469_p4), %vm9739_vm3 }
 0x425   : >> { %v2530_v4 = vpop.permute.xlu0 %2529  ;;  %v8322_v16 = vrot.slane %v3855_v48, %v9685_v18 }
 0x426   : >> { %v2541_v60 = vsel %vm9674_vm2, %v2530_v4, %v2532_v41  ;;  %vm3745_vm2 = vmpackc.low %vm6958_vm5, %vm6958_vm5  ;;  %5943 = vmatpush3.bf16.msra.mxu0 %v6440_v2 }
 0x427   : >> { %3232 = vmatpush1.bf16.msra.mxu1 %v2541_v60  ;;  %3860 = vrot.lane.b32.xlu1 %v8322_v16, %s6844_s14  ;;  %v3746_v26 = vsel %vm3745_vm2, 65537, %v9675_v10  ;;  %vm9741_vm5 = vmmov (%p469_p4), %vm9739_vm3 }
 0x428   : >> { %v3750_v14 = vrot.slane %v3746_v26, %v9685_v18 }
 0x42a   : >> { %3175 = vmatmul.mubr.bf16.gmra.mrb[12].mxu1 %v6404_v54  ;;  %3751 = vrot.lane.b32.xlu0 %v3750_v14, %s6845_s28 }
 0x42b   : >> { %3184 = vmatprep.mubr.bf16.mxu1 %v6405_v46  ;;  %3916 = vrot.lane.b32.xlu1 %v3750_v14, %s6838_s29 }
 0x42e   : >> { %4006 = vrot.lane.b32.xlu0 %v3750_v14, %s6846_s25 }
 0x42f   : >> { %3975 = vrot.lane.b32.xlu1 %v8322_v16, %s6839_s30 }
 0x432   : >> { %3185 = vmatmul.mubr.bf16.gmra.mrb[16].mxu1 %v6407_v57 }
 0x433   : >> { %3194 = vmatprep.mubr.bf16.mxu1 %v6408_v12  ;;  %v2698_v50 = vpop.permute.xlu1 %2697 }
 0x436   : >> { %v2703_v44 = vpop.permute.xlu0 %2702 }
 0x437   : >> { %v2718_v63 = vpop.permute.xlu1 %2717 }
 0x43a   : >> { %3195 = vmatmul.mubr.bf16.gmra.mrb[20].mxu1 %v6410_v27  ;;  %v2723_v42 = vpop.permute.xlu0 %2722 }
 0x43b   : >> { %3204 = vmatprep.mubr.bf16.mxu1 %v6411_v40  ;;  %v2708_v32 = vpop.permute.xlu1 %2707 }
 0x43e   : >> { %v2713_v55 = vpop.permute.xlu0 %2712 }
 0x43f   : >> { %v8392_v29 = vpop.permute.xlu1 %2727 }
 0x442   : >> { %3205 = vmatmul.mubr.bf16.gmra.mrb[24].mxu1 %v6413_v0  ;;  %v8394_v15 = vpop.permute.xlu0 %2732 }
 0x443   : >> { %3214 = vmatprep.mubr.bf16.mxu1 %v6414_v13  ;;  %v8396_v59 = vpop.permute.xlu1 %2737 }
 0x446   : >> { %v8398_v58 = vpop.permute.xlu0 %2742 }
 0x447   : >> { %v8400_v5 = vpop.permute.xlu1 %2757 }
 0x44a   : >> { %3215 = vmatmul.mubr.bf16.gmra.mrb[28].mxu1 %v6416_v53  ;;  %v8402_v27 = vpop.permute.xlu0 %2762 }
 0x44b   : >> { %3257 = vmatprep.mubr.bf16.mxu1 %v9675_v10  ;;  %v8404_v13 = vpop.permute.xlu1 %2747 }
 0x44f   : >> { %v8408_v51 = vpop.permute.xlu1 %2767 }
 0x452   : >> { %5815 = vmatmul.mubr.msk.bf16.vlgmr.msra.gmra.mrb[0].mxu1 %vm9676_vm9, %v6417_v24  ;;  %vm9687_vm9 = vmmov %vm9679_vm0 }
 0x453   : >> { %3267 = vmatprep.mubr.bf16.mxu1 %v9675_v10  ;;  %3969 = vst.msk [vmem:[#allocation10 + $0x90] sm:$0xff] %vm9687_vm9, %v8384_v21  ;;  %vm9690_vm13 = vmmov %vm9687_vm9 }
 0x454   : >> { %vm9691_vm2 = vmmov %vm9687_vm9 }
 0x455   : >> { %vm9692_vm9 = vmmov %vm9691_vm2 }
 0x45a   : >> { %5816 = vmatmul.mubr.msk.bf16.gmra.mrb[4].mxu1 %vm9677_vm10, %v6418_v11  ;;  %vm9688_vm10 = vmmov %vm9679_vm0 }
 0x45b   : >> { %3277 = vmatprep.mubr.bf16.mxu1 %v9675_v10  ;;  %3970 = vst.msk [vmem:[#allocation10 + $0x98] sm:$0xff] %vm9688_vm10, %v8386_v47  ;;  %vm9693_vm10 = vmmov %vm9691_vm2 }
 0x462   : >> { %5817 = vmatmul.mubr.msk.bf16.gmra.mrb[8].mxu1 %vm9678_vm14, %v6419_v28 }
 0x463   : >> { %3287 = vmatprep.mubr.bf16.mxu1 %v9675_v10 }
 0x46a   : >> { %5818 = vmatmul.mubr.msk.bf16.gmra.mrb[12].mxu1 %vm9679_vm0, %v6420_v38 }
 0x46b   : >> { %3297 = vmatprep.mubr.bf16.mxu1 %v9675_v10 }
 0x472   : >> { %5819 = vmatmul.mubr.msk.bf16.gmra.mrb[16].mxu1 %vm9680_vm12, %v6421_v39  ;;  %v8406_v39 = vpop.permute.xlu0 %2752 }
 0x473   : >> { %3307 = vmatprep.mubr.bf16.mxu1 %v9675_v10 }
 0x476   : >> { %v8412_v6 = vpop.permute.xlu0 %2772 }
 0x47a   : >> { %5820 = vmatmul.mubr.msk.bf16.gmra.mrb[20].mxu1 %vm9681_vm11, %v6422_v35  ;;  %vm3895_vm11 = vcmask 56320  }
 0x47b   : >> { %3317 = vmatprep.mubr.bf16.mxu1 %v9675_v10 }
 0x482   : >> { %5821 = vmatmul.mubr.msk.bf16.gmra.mrb[24].mxu1 %vm9682_vm15, %v6423_v3  ;;  %vm9689_vm15 = vmmov %vm9683_vm1 }
 0x483   : >> { %3327 = vmatprep.mubr.bf16.mxu1 %v9675_v10 }
 0x48a   : >> { %5822 = vmatmul.mubr.msk.bf16.gmra.mrb[28].mxu1 %vm9683_vm1, %v6424_v8  ;;  %vm3786_vm1 = vcmask 72704  }
 0x499   : >> { %v8414_v33 = vpop.permute.xlu1 %3860 }
 0x49a   : >> { %vm3862_vm14 = vcmp.ne.s16.totalorder %v8414_v33, 0 }
 0x525   : >> { %v3259_v61 = vpop.f32.mrb[0].mxu1 }
 0x526   : >> { %v3261_v22 = vpop.f32.mrb[1].mxu1  ;;  %v6152_v45 = vadd.f32 %v3259_v61, %v2698_v50 }
 0x527   : >> { %v3263_v43 = vpop.f32.mrb[2].mxu1  ;;  %v6153_v49 = vadd.f32 %v3261_v22, %v2698_v50  ;;  %v3863_v50 = vsel %vm3862_vm14, %v8410_v30, 0 }
 0x528   : >> { %v3265_v37 = vpop.f32.mrb[3].mxu1  ;;  %v6154_v41 = vadd.f32 %v3263_v43, %v2703_v44  ;;  %v5823_v62 = vmul.f32 -1.442695, %v6152_v45  ;;  %3879 = vrot.lane.b32.xlu0 %v3863_v50, %s6846_s25  ;;  %v8424_v43 = vpop.permute.xlu0 %3751  ;;  %v8427_v45 = vld [vmem:[#allocation6 + $0x10] sm:$0xff] }
 0x529   : >> { %v5824_v60 = vmul.f32 -1.442695, %v6153_v49  ;;  %v6155_v54 = vadd.f32 %v3265_v37, %v2703_v44  ;;  %vm3753_vm0 = vcmp.ne.s16.totalorder %v8424_v43, 0 }
 0x52a   : >> { %v5825_v57 = vmul.f32 -1.442695, %v6154_v41  ;;  %6625 = vpow2.f32 %v5823_v62  ;;  %v3754_v62 = vsel %vm3753_vm0, %v8410_v30, 0 }
 0x52b   : >> { %6627 = vpow2.f32 %v5824_v60  ;;  %v5826_v53 = vmul.f32 -1.442695, %v6155_v54 }
 0x52c   : >> { %6629 = vpow2.f32 %v5825_v57  ;;  %3770 = vrot.lane.b32.xlu0 %v3754_v62, %s6847_s26 }
 0x52d   : >> { %v3269_v4 = vpop.f32.mrb[4].mxu1  ;;  %6631 = vpow2.f32 %v5826_v53 }
 0x52e   : >> { %v3271_v46 = vpop.f32.mrb[5].mxu1  ;;  %v6156_v40 = vadd.f32 %v3269_v4, %v2708_v32 }
 0x52f   : >> { %v3273_v12 = vpop.f32.mrb[6].mxu1  ;;  %v6157_v10 = vadd.f32 %v3271_v46, %v2708_v32  ;;  %v3865_v46 = vsel %vm3862_vm14, %v8427_v45, 0 }
 0x530   : >> { %v3275_v0 = vpop.f32.mrb[7].mxu1  ;;  %v6158_v24 = vadd.f32 %v3273_v12, %v2713_v55  ;;  %v5827_v11 = vmul.f32 -1.442695, %v6156_v40  ;;  %v3868_v40 = vsel %vm3862_vm14, %v8384_v21, 0  ;;  %3883 = vrot.lane.b32.xlu0 %v3865_v46, %s6846_s25 }
 0x531   : >> { %v6159_v28 = vadd.f32 %v3275_v0, %v2713_v55  ;;  %v5828_v35 = vmul.f32 -1.442695, %v6157_v10  ;;  %3889 = vrot.lane.b32.xlu1 %v3868_v40, %s6846_s25 }
 0x532   : >> { %v5829_v7 = vmul.f32 -1.442695, %v6158_v24  ;;  %6633 = vpow2.f32 %v5827_v11 }
 0x533   : >> { %v5830_v26 = vmul.f32 -1.442695, %v6159_v28  ;;  %6635 = vpow2.f32 %v5828_v35 }
 0x534   : >> { %v6626_v36 = vpop.eup %6625  ;;  %6637 = vpow2.f32 %v5829_v7  ;;  %v3756_v7 = vsel %vm3753_vm0, %v8427_v45, 0 }
 0x535   : >> { %v3279_v38 = vpop.f32.mrb[8].mxu1  ;;  %v6628_v31 = vpop.eup %6627  ;;  %6639 = vpow2.f32 %v5830_v26  ;;  %v3362_v9 = vadd.f32 1.0, %v6626_v36  ;;  %v8448_v26 = vld [vmem:[#allocation6 + $0x20] sm:$0xff]  ;;  %3774 = vrot.lane.b32.xlu0 %v3756_v7, %s6847_s26  ;;  %v3870_v36 = vsel %vm3862_vm14, %v8386_v47, 0 }
 0x536   : >> { %v6160_v3 = vadd.f32 %v3279_v38, %v2718_v63  ;;  %v3281_v8 = vpop.f32.mrb[9].mxu1  ;;  %v6630_v17 = vpop.eup %6629  ;;  %v3363_v44 = vadd.f32 1.0, %v6628_v31  ;;  %v3759_v38 = vsel %vm3753_vm0, %v8384_v21, 0 }
 0x537   : >> { %v6161_v48 = vadd.f32 %v3281_v8, %v2718_v63  ;;  %v3283_v18 = vpop.f32.mrb[10].mxu1  ;;  %v6632_v32 = vpop.eup %6631  ;;  %v3364_v55 = vadd.f32 1.0, %v6630_v17  ;;  %3780 = vrot.lane.b32.xlu1 %v3759_v38, %s6847_s26  ;;  %v3867_v17 = vsel %vm3862_vm14, %v8448_v26, 0 }
 0x538   : >> { %v6162_v14 = vadd.f32 %v3283_v18, %v2723_v42  ;;  %v3285_v19 = vpop.f32.mrb[11].mxu1  ;;  %v5831_v56 = vmul.f32 -1.442695, %v6160_v3  ;;  %v3365_v4 = vadd.f32 1.0, %v6632_v32  ;;  %v8494_v38 = vpop.permute.xlu1 %3916 }
 0x539   : >> { %v6163_v23 = vadd.f32 %v3285_v19, %v2723_v42  ;;  %v5832_v25 = vmul.f32 -1.442695, %v6161_v48  ;;  %3887 = vrot.lane.b32.xlu0 %v3867_v17, %s6846_s25  ;;  %vm3918_vm12 = vcmp.ne.s16.totalorder %v8494_v38, 0 }
 0x53a   : >> { %v5833_v52 = vmul.f32 -1.442695, %v6162_v14  ;;  %6641 = vpow2.f32 %v5831_v56  ;;  %v3923_v33 = vsel %vm3918_vm12, %v8448_v26, 0 }
 0x53b   : >> { %v5834_v20 = vmul.f32 -1.442695, %v6163_v23  ;;  %6643 = vpow2.f32 %v5832_v25  ;;  %3893 = vrot.lane.b32.xlu1 %v3870_v36, %s6846_s25 }
 0x53c   : >> { %6645 = vpow2.f32 %v5833_v52  ;;  %v6634_v49 = vpop.eup %6633 }
 0x53d   : >> { %v3289_v34 = vpop.f32.mrb[12].mxu1  ;;  %6647 = vpow2.f32 %v5834_v20  ;;  %v6636_v60 = vpop.eup %6635  ;;  %v3366_v12 = vadd.f32 1.0, %v6634_v49 }
 0x53e   : >> { %v6164_v1 = vadd.f32 %v3289_v34, %v8392_v29  ;;  %v3291_v2 = vpop.f32.mrb[13].mxu1  ;;  %6649 = vrcp.f32 %v3362_v9  ;;  %v6638_v57 = vpop.eup %6637  ;;  %v3367_v11 = vadd.f32 1.0, %v6636_v60 }
 0x53f   : >> { %v6165_v63 = vadd.f32 %v3291_v2, %v8392_v29  ;;  %v3293_v42 = vpop.f32.mrb[14].mxu1  ;;  %6651 = vrcp.f32 %v3363_v44  ;;  %v6640_v0 = vpop.eup %6639  ;;  %v3368_v3 = vadd.f32 1.0, %v6638_v57 }
 0x540   : >> { %v6166_v61 = vadd.f32 %v3293_v42, %v8394_v15  ;;  %v3295_v22 = vpop.f32.mrb[15].mxu1  ;;  %v5835_v37 = vmul.f32 -1.442695, %v6164_v1  ;;  %6653 = vrcp.f32 %v3364_v55  ;;  %v3369_v18 = vadd.f32 1.0, %v6640_v0 }
 0x541   : >> { %v5836_v41 = vmul.f32 -1.442695, %v6165_v63  ;;  %v6167_v29 = vadd.f32 %v3295_v22, %v8394_v15  ;;  %v3761_v55 = vsel %vm3753_vm0, %v8386_v47, 0 }
 0x542   : >> { %v5837_v54 = vmul.f32 -1.442695, %v6166_v61  ;;  %6655 = vpow2.f32 %v5835_v37  ;;  %v3758_v37 = vsel %vm3753_vm0, %v8448_v26, 0  ;;  %3784 = vrot.lane.b32.xlu1 %v3761_v55, %s6847_s26 }
 0x543   : >> { %6657 = vpow2.f32 %v5836_v41  ;;  %v5838_v53 = vmul.f32 -1.442695, %v6167_v29  ;;  %v8478_v29 = vld [vmem:[#allocation6 + $0x30] sm:$0xff]  ;;  %3778 = vrot.lane.b32.xlu0 %v3758_v37, %s6847_s26 }
 0x544   : >> { %v6642_v24 = vpop.eup %6641  ;;  %6659 = vrcp.f32 %v3365_v4 }
 0x545   : >> { %v3299_v15 = vpop.f32.mrb[16].mxu1  ;;  %v6644_v35 = vpop.eup %6643  ;;  %6661 = vpow2.f32 %v5837_v54  ;;  %v3410_v19 = vadd.f32 1.0, %v6642_v24 }
 0x546   : >> { %v3301_v10 = vpop.f32.mrb[17].mxu1  ;;  %v6646_v48 = vpop.eup %6645  ;;  %6663 = vrcp.f32 %v3366_v12  ;;  %v6168_v56 = vadd.f32 %v3299_v15, %v8396_v59  ;;  %v3411_v23 = vadd.f32 1.0, %v6644_v35  ;;  %v3869_v15 = vsel %vm3862_vm14, %v8478_v29, 0 }
 0x547   : >> { %v3303_v28 = vpop.f32.mrb[18].mxu1  ;;  %v6648_v14 = vpop.eup %6647  ;;  %6665 = vpow2.f32 %v5838_v53  ;;  %v6169_v25 = vadd.f32 %v3301_v10, %v8396_v59  ;;  %v3412_v31 = vadd.f32 1.0, %v6646_v48  ;;  %3891 = vrot.lane.b32.xlu0 %v3869_v15, %s6846_s25 }
 0x548   : >> { %v3305_v8 = vpop.f32.mrb[19].mxu1  ;;  %6667 = vrcp.f32 %v3367_v11  ;;  %v8457_v52 = vpop.eup %6649  ;;  %v6170_v20 = vadd.f32 %v3303_v28, %v8398_v58  ;;  %v3413_v59 = vadd.f32 1.0, %v6648_v14  ;;  %v5839_v50 = vmul.f32 -1.442695, %v6168_v56 }
 0x549   : >> { %6669 = vrcp.f32 %v3368_v3  ;;  %v8463_v34 = vpop.eup %6651  ;;  %v6171_v9 = vadd.f32 %v3305_v8, %v8398_v58  ;;  %v5840_v42 = vmul.f32 -1.442695, %v6169_v25 }
 0x54a   : >> { %6671 = vrcp.f32 %v3369_v18  ;;  %v8466_v2 = vpop.eup %6653  ;;  %v5841_v58 = vmul.f32 -1.442695, %v6170_v20  ;;  %v3760_v18 = vsel %vm3753_vm0, %v8478_v29, 0 }
 0x54b   : >> { %6673 = vrcp.f32 %v3410_v19  ;;  %v5842_v41 = vmul.f32 -1.442695, %v6171_v9  ;;  %3782 = vrot.lane.b32.xlu0 %v3760_v18, %s6847_s26 }
 0x54c   : >> { %v6656_v63 = vpop.eup %6655  ;;  %6675 = vrcp.f32 %v3411_v23 }
 0x54d   : >> { %v3309_v1 = vpop.f32.mrb[20].mxu1  ;;  %v6658_v61 = vpop.eup %6657  ;;  %6677 = vrcp.f32 %v3412_v31  ;;  %v3414_v4 = vadd.f32 1.0, %v6656_v63 }
 0x54e   : >> { %v3311_v44 = vpop.f32.mrb[21].mxu1  ;;  %v8476_v49 = vpop.eup %6659  ;;  %6679 = vrcp.f32 %v3413_v59  ;;  %v6172_v60 = vadd.f32 %v3309_v1, %v8404_v13  ;;  %v3415_v46 = vadd.f32 1.0, %v6658_v61  ;;  %v3490_v61 = vld [vmem:[#allocation5] sm:$0xff] }
 0x54f   : >> { %v3313_v32 = vpop.f32.mrb[22].mxu1  ;;  %v6662_v62 = vpop.eup %6661  ;;  %6681 = vpow2.f32 %v5839_v50  ;;  %v6173_v12 = vadd.f32 %v3311_v44, %v8404_v13 }
 0x550   : >> { %v3315_v22 = vpop.f32.mrb[23].mxu1  ;;  %v8482_v54 = vpop.eup %6663  ;;  %6683 = vpow2.f32 %v5840_v42  ;;  %v3416_v0 = vadd.f32 1.0, %v6662_v62  ;;  %v5843_v24 = vmul.f32 -1.442695, %v6172_v60  ;;  %v6174_v19 = vadd.f32 %v3313_v32, %v8406_v39 }
 0x551   : >> { %v6666_v57 = vpop.eup %6665  ;;  %6685 = vpow2.f32 %v5841_v58  ;;  %v5844_v7 = vmul.f32 -1.442695, %v6173_v12  ;;  %v6175_v25 = vadd.f32 %v3315_v22, %v8406_v39 }
 0x552   : >> { %v8489_v40 = vpop.eup %6667  ;;  %6687 = vpow2.f32 %v5842_v41  ;;  %v3417_v13 = vadd.f32 1.0, %v6666_v57  ;;  %v5845_v9 = vmul.f32 -1.442695, %v6174_v19 }
 0x553   : >> { %v8491_v10 = vpop.eup %6669  ;;  %6689 = vrcp.f32 %v3414_v4  ;;  %v5846_v50 = vmul.f32 -1.442695, %v6175_v25 }
 0x554   : >> { %v8496_v35 = vpop.eup %6671  ;;  %6691 = vrcp.f32 %v3415_v46 }
 0x555   : >> { %v3319_v53 = vpop.f32.mrb[24].mxu1  ;;  %v6674_v8 = vpop.eup %6673 }
 0x556   : >> { %v6176_v11 = vadd.f32 %v3319_v53, %v8400_v5  ;;  %v3321_v28 = vpop.f32.mrb[25].mxu1  ;;  %v8502_v14 = vpop.eup %6675  ;;  %v3498_v46 = vmul.f32 %v6674_v8, %v3490_v61  ;;  %v3491_v53 = vld [vmem:[#allocation5 + $0x8] sm:$0xff] }
 0x557   : >> { %v3323_v3 = vpop.f32.mrb[26].mxu1  ;;  %v6177_v56 = vadd.f32 %v3321_v28, %v8400_v5  ;;  %v8507_v23 = vpop.eup %6677  ;;  %v3919_v5 = vsel %vm3918_vm12, %v8410_v30, 0 }
 0x558   : >> { %6693 = vtanh.f32 %v6176_v11  ;;  %v3325_v48 = vpop.f32.mrb[27].mxu1  ;;  %v6178_v36 = vadd.f32 %v3323_v3, %v8402_v27  ;;  %v8511_v31 = vpop.eup %6679  ;;  %3935 = vrot.lane.b32.xlu0 %v3919_v5, %s6839_s30 }
 0x559   : >> { %6695 = vrcp.f32 %v3416_v0  ;;  %v6179_v20 = vadd.f32 %v3325_v48, %v8402_v27  ;;  %v6682_v17 = vpop.eup %6681  ;;  %v3494_v48 = vld [vmem:[#allocation5 + $0x20] sm:$0xff] }
 0x55a   : >> { %6697 = vpow2.f32 %v5843_v24  ;;  %v6684_v59 = vpop.eup %6683  ;;  %v3458_v27 = vadd.f32 1.0, %v6682_v17 }
 0x55b   : >> { %6699 = vrcp.f32 %v3417_v13  ;;  %v6686_v39 = vpop.eup %6685  ;;  %v3459_v58 = vadd.f32 1.0, %v6684_v59 }
 0x55c   : >> { %6701 = vpow2.f32 %v5844_v7  ;;  %v6688_v42 = vpop.eup %6687  ;;  %3815 = vrot.lane.b32.xlu0 %v8410_v30, %s6848_s11  ;;  %v3460_v24 = vadd.f32 1.0, %v6686_v39  ;;  %v3493_v30 = vld [vmem:[#allocation5 + $0x18] sm:$0xff]  ;;  %v3499_v7 = vmul.f32 %v8502_v14, %v3491_v53  ;;  %v3495_v39 = vld [vmem:[#allocation5 + $0x28] sm:$0xff] }
 0x55d   : >> { %6703 = vtanh.f32 %v6177_v56  ;;  %v3329_v1 = vpop.f32.mrb[28].mxu1  ;;  %v6690_v55 = vpop.eup %6689  ;;  %v3461_v13 = vadd.f32 1.0, %v6688_v42 }
 0x55e   : >> { %6705 = vtanh.f32 %v6178_v36  ;;  %v6180_v44 = vadd.f32 %v3329_v1, %v8408_v51  ;;  %v3331_v63 = vpop.f32.mrb[29].mxu1  ;;  %v8520_v37 = vpop.eup %6691 }
 0x55f   : >> { %6707 = vtanh.f32 %v6179_v20  ;;  %v3333_v32 = vpop.f32.mrb[30].mxu1  ;;  %v6181_v41 = vadd.f32 %v3331_v63, %v8408_v51  ;;  %v3921_v51 = vsel %vm3918_vm12, %v8427_v45, 0  ;;  %v3501_v20 = vmul.f32 %v8511_v31, %v3493_v30 }
 0x560   : >> { %6709 = vtanh.f32 %v6180_v44  ;;  %v3335_v22 = vpop.f32.mrb[31].mxu1  ;;  %v6182_v4 = vadd.f32 %v3333_v32, %v8412_v6  ;;  %3939 = vrot.lane.b32.xlu0 %v3921_v51, %s6839_s30 }
 0x561   : >> { %6711 = vpow2.f32 %v5845_v9  ;;  %v6183_v15 = vadd.f32 %v3335_v22, %v8412_v6  ;;  %v3502_v9 = vmul.f32 %v6690_v55, %v3494_v48  ;;  %v3924_v55 = vsel %vm3918_vm12, %v8384_v21, 0 }
 0x562   : >> { %v6694_v62 = vpop.eup %6693  ;;  %6713 = vpow2.f32 %v5846_v50 }
 0x563   : >> { %v8524_v60 = vpop.eup %6695  ;;  %6715 = vrcp.f32 %v3458_v27  ;;  %v3506_v57 = vmul.f32 %v6694_v62, %v8457_v52  ;;  %v3492_v52 = vld [vmem:[#allocation5 + $0x10] sm:$0xff]  ;;  %v3497_v27 = vld [vmem:[#allocation5 + $0x38] sm:$0xff] }
 0x564   : >> { %v6698_v12 = vpop.eup %6697  ;;  %6717 = vrcp.f32 %v3459_v58  ;;  %v3500_v56 = vmul.f32 %v8507_v23, %v3492_v52  ;;  %3819 = vrot.lane.b32.xlu0 %v8427_v45, %s6848_s11 }
 0x565   : >> { %v8533_v0 = vpop.eup %6699  ;;  %v3514_v11 = vadd.f32 %v3506_v57, %v3498_v46  ;;  %6719 = vtanh.f32 %v6181_v41  ;;  %v3462_v8 = vadd.f32 1.0, %v6698_v12 }
 0x566   : >> { %v6702_v28 = vpop.eup %6701  ;;  %6721 = vtanh.f32 %v6182_v4 }
 0x567   : >> { %v6704_v3 = vpop.eup %6703  ;;  %6723 = vtanh.f32 %v3514_v11  ;;  %3538 = vst [vmem:[#allocation5] sm:$0xff] %v3514_v11  ;;  %v3463_v44 = vadd.f32 1.0, %v6702_v28 }
 0x568   : >> { %v6706_v6 = vpop.eup %6705  ;;  %v3507_v18 = vmul.f32 %v6704_v3, %v8463_v34  ;;  %6725 = vtanh.f32 %v6183_v15  ;;  %4061 = vrot.lane.b32.xlu0 %v8322_v16, %s6847_s26 }
 0x569   : >> { %v6708_v19 = vpop.eup %6707  ;;  %6727 = vrcp.f32 %v3460_v24  ;;  %v3508_v25 = vmul.f32 %v6706_v6, %v8466_v2  ;;  %v3926_v24 = vsel %vm3918_vm12, %v8386_v47, 0 }
 0x56a   : >> { %v6710_v36 = vpop.eup %6709  ;;  %6729 = vrcp.f32 %v3461_v13  ;;  %v3515_v17 = vadd.f32 %v3507_v18, %v3499_v7  ;;  %v3509_v5 = vmul.f32 %v6708_v19, %v8476_v49  ;;  %v3496_v49 = vld [vmem:[#allocation5 + $0x30] sm:$0xff] }
 0x56b   : >> { %v6712_v59 = vpop.eup %6711  ;;  %6731 = vrcp.f32 %v3462_v8  ;;  %v3516_v14 = vadd.f32 %v3508_v25, %v3500_v56  ;;  %v3510_v34 = vmul.f32 %v6710_v36, %v8482_v54  ;;  %v3503_v54 = vmul.f32 %v8520_v37, %v3495_v39 }
 0x56c   : >> { %v6714_v23 = vpop.eup %6713  ;;  %6733 = vtanh.f32 %v3515_v17  ;;  %3539 = vst [vmem:[#allocation5 + $0x8] sm:$0xff] %v3515_v17  ;;  %v3517_v2 = vadd.f32 %v3509_v5, %v3501_v20  ;;  %v3464_v42 = vadd.f32 1.0, %v6712_v59  ;;  %v3504_v58 = vmul.f32 %v8524_v60, %v3496_v49  ;;  %3945 = vrot.lane.b32.xlu0 %v3924_v55, %s6839_s30  ;;  %v8565_v17 = vpop.permute.xlu0 %4006 }
 0x56d   : >> { %v6716_v1 = vpop.eup %6715  ;;  %6735 = vtanh.f32 %v3516_v14  ;;  %3540 = vst [vmem:[#allocation5 + $0x10] sm:$0xff] %v3516_v14  ;;  %v3518_v31 = vadd.f32 %v3510_v34, %v3502_v9  ;;  %v3465_v62 = vadd.f32 1.0, %v6714_v23  ;;  %v3505_v37 = vmul.f32 %v8533_v0, %v3497_v27  ;;  %v8575_v23 = vpop.permute.xlu1 %3975 }
 0x56e   : >> { %v6718_v50 = vpop.eup %6717  ;;  %6737 = vtanh.f32 %v3517_v2  ;;  %3541 = vst [vmem:[#allocation5 + $0x18] sm:$0xff] %v3517_v2 }
 0x56f   : >> { %v6720_v63 = vpop.eup %6719  ;;  %6739 = vtanh.f32 %v3518_v31  ;;  %3542 = vst [vmem:[#allocation5 + $0x20] sm:$0xff] %v3518_v31 }
 0x570   : >> { %v6722_v45 = vpop.eup %6721  ;;  %v3511_v32 = vmul.f32 %v6720_v63, %v8489_v40  ;;  %6741 = vrcp.f32 %v3463_v44  ;;  %3825 = vrot.lane.b32.xlu0 %v8384_v21, %s6848_s11 }
 0x571   : >> { %v6724_v61 = vpop.eup %6723  ;;  %v3512_v22 = vmul.f32 %v6722_v45, %v8491_v10  ;;  %6743 = vrcp.f32 %v3464_v42 }
 0x572   : >> { %v6726_v41 = vpop.eup %6725  ;;  %v3519_v4 = vadd.f32 %v3511_v32, %v3503_v54  ;;  %v3530_v16 = vmul.f32 %v6724_v61, %v6716_v1 }
 0x573   : >> { %v6728_v46 = vpop.eup %6727  ;;  %v3520_v57 = vadd.f32 %v3512_v22, %v3504_v58  ;;  %v3513_v40 = vmul.f32 %v6726_v41, %v8496_v35 }
 0x574   : >> { %v6730_v12 = vpop.eup %6729  ;;  %6745 = vtanh.f32 %v3519_v4  ;;  %3543 = vst [vmem:[#allocation5 + $0x28] sm:$0xff] %v3519_v4  ;;  %3949 = vrot.lane.b32.xlu0 %v3926_v24, %s6839_s30 }
 0x575   : >> { %v6732_v60 = vpop.eup %6731  ;;  %6747 = vtanh.f32 %v3520_v57  ;;  %3544 = vst [vmem:[#allocation5 + $0x30] sm:$0xff] %v3520_v57  ;;  %v3521_v10 = vadd.f32 %v3513_v40, %v3505_v37 }
 0x576   : >> { %v6734_v15 = vpop.eup %6733  ;;  %6749 = vrcp.f32 %v3465_v62 }
 0x577   : >> { %v6736_v51 = vpop.eup %6735  ;;  %6751 = vtanh.f32 %v3521_v10  ;;  %3545 = vst [vmem:[#allocation5 + $0x38] sm:$0xff] %v3521_v10  ;;  %v3531_v53 = vmul.f32 %v6734_v15, %v6718_v50 }
 0x578   : >> { %v6738_v0 = vpop.eup %6737  ;;  %v3532_v35 = vmul.f32 %v6736_v51, %v6728_v46  ;;  %3829 = vrot.lane.b32.xlu0 %v8386_v47, %s6848_s11 }
 0x579   : >> { %v6740_v11 = vpop.eup %6739  ;;  %v3533_v28 = vmul.f32 %v6738_v0, %v6730_v12 }
 0x57a   : >> { %v3546_v52 = vpack.c.bf16 %v3532_v35, %v3530_v16  ;;  %v3534_v13 = vmul.f32 %v6740_v11, %v6732_v60  ;;  %v6742_v30 = vpop.eup %6741 }
 0x57b   : >> { %v3547_v3 = vpack.c.bf16 %v3533_v28, %v3531_v53  ;;  %v6744_v8 = vpop.eup %6743 }
 0x57c   : >> { %3550 = vst [vmem:[#allocation4 + $0x48] sm:$0xff] %v3546_v52 }
 0x57d   : >> { %3551 = vst [vmem:[#allocation4 + $0x50] sm:$0xff] %v3547_v3  ;;  %3714 = vmatprep.mubr.bf16.mxu0 %v3547_v3 }
 0x57e   : >> { %v6746_v6 = vpop.eup %6745  ;;  %3715 = vmatmul.mubr.bf16.vlgmr.msra.gmra.mrb[32].mxu0 %v3546_v52 }
 0x57f   : >> { %v6748_v7 = vpop.eup %6747  ;;  %v3535_v48 = vmul.f32 %v6746_v6, %v6742_v30 }
 0x580   : >> { %v6750_v18 = vpop.eup %6749  ;;  %v3536_v19 = vmul.f32 %v6748_v7, %v6744_v8 }
 0x581   : >> { %v6752_v56 = vpop.eup %6751 }
 0x582   : >> { %v3537_v25 = vmul.f32 %v6752_v56, %v6750_v18  ;;  %v3548_v36 = vpack.c.bf16 %v3536_v19, %v3534_v13  ;;  %v3925_v19 = vsel %vm3918_vm12, %v8478_v29, 0  ;;  %v4175_v56 = vld [vmem:[%s9466_s6 + $0x18] sm:$0xff] }
 0x584   : >> { %v3549_v20 = vpack.c.bf16 %v3537_v25, %v3535_v48  ;;  %3552 = vst [vmem:[#allocation4 + $0x68] sm:$0xff] %v3548_v36  ;;  %v6443_v25 = vld [vmem:[%s9465_s5 + $0x4] ss:$20 sps:$4 sm:$0xff]  }
 0x586   : >> { %3553 = vst [vmem:[#allocation4 + $0x70] sm:$0xff] %v3549_v20  ;;  %3722 = vmatprep.mubr.bf16.mxu0 %v3549_v20  ;;  %v4179_v20 = vld [vmem:[%s9466_s6 + $0x38] sm:$0xff] }
 0x587   : >> { %3723 = vmatmul.mubr.bf16.gmra.mrb[36].mxu0 %v3548_v36  ;;  %v4177_v36 = vld [vmem:[%s9466_s6 + $0x28] sm:$0xff] }
 0x588   : >> { %4524 = vmatprep.mubr.bf16.mxu0 %v6443_v25 }
 0x59a   : >> { %v8567_v5 = vpop.permute.xlu0 %3879 }
 0x59e   : >> { %v8569_v59 = vpop.permute.xlu0 %3770 }
 0x5a2   : >> { %v8571_v9 = vpop.permute.xlu0 %3883 }
 0x5a3   : >> { %v3890_v1 = vpop.permute.xlu1 %3889 }
 0x5a7   : >> { %v8573_v14 = vpop.permute.xlu0 %3774 }
 0x5a9   : >> { %v3781_v31 = vpop.permute.xlu1 %3780 }
 0x5ab   : >> { %v3888_v34 = vpop.permute.xlu0 %3887 }
 0x5ac   : >> { %v3898_v39 = vsel %vm3895_vm11, %v3888_v34, %v3890_v1  ;;  %v4181_v34 = vld [vmem:[%s9466_s6 + $0x48] sm:$0xff] }
 0x5ad   : >> { %3906 = vst.msk [vmem:[#allocation10 + $0x50] sm:$0xff] %vm9689_vm15, %v3898_v39  ;;  %v3894_v44 = vpop.permute.xlu1 %3893  ;;  %vm9694_vm15 = vmmov %vm9691_vm2  ;;  %v6455_v39 = vld [vmem:[%s9465_s5 + $0xc] ss:$20 sps:$4 sm:$0xff]  }
 0x5ae   : >> { %4621 = vmatprep.mubr.bf16.mxu1 %v6455_v39 }
 0x5b4   : >> { %v3785_v45 = vpop.permute.xlu1 %3784 }
 0x5b5   : >> { %v3779_v2 = vpop.permute.xlu0 %3778 }
 0x5b6   : >> { %v3789_v50 = vsel %vm3786_vm1, %v3779_v2, %v3781_v31  ;;  %v4187_v2 = vld [vmem:[%s9466_s6 + $0x78] sm:$0xff] }
 0x5b7   : >> { %3797 = vst.msk [vmem:[#allocation10 + $0x10] sm:$0xff] %vm9690_vm13, %v3789_v50  ;;  %vm9695_vm13 = vmmov %vm9691_vm2  ;;  %v4174_v50 = vld [vmem:[%s9466_s6 + $0x10] sm:$0xff] }
 0x5b9   : >> { %v3892_v49 = vpop.permute.xlu0 %3891 }
 0x5ba   : >> { %v3899_v63 = vsel %vm3895_vm11, %v3892_v49, %v3894_v44  ;;  %v4176_v49 = vld [vmem:[%s9466_s6 + $0x20] sm:$0xff] }
 0x5bb   : >> { %3907 = vst.msk [vmem:[#allocation10 + $0x58] sm:$0xff] %vm9691_vm2, %v3899_v63  ;;  %vm4008_vm2 = vcmp.ne.s16.totalorder %v8565_v17, 0  ;;  %v4183_v17 = vld [vmem:[%s9466_s6 + $0x58] sm:$0xff]  ;;  %v4180_v44 = vld [vmem:[%s9466_s6 + $0x40] sm:$0xff]  ;;  %v4182_v63 = vld [vmem:[%s9466_s6 + $0x50] sm:$0xff] }
 0x5bc   : >> { %v4012_v24 = vsel %vm4008_vm2, %v8386_v47, 0 }
 0x5bd   : >> { %v3783_v42 = vpop.permute.xlu0 %3782 }
 0x5be   : >> { %v3790_v54 = vsel %vm3786_vm1, %v3783_v42, %v3785_v45  ;;  %v4184_v42 = vld [vmem:[%s9466_s6 + $0x60] sm:$0xff] }
 0x5bf   : >> { %3798 = vst.msk [vmem:[#allocation10 + $0x18] sm:$0xff] %vm9692_vm9, %v3790_v54  ;;  %v4186_v54 = vld [vmem:[%s9466_s6 + $0x70] sm:$0xff] }
 0x5ca   : >> { %v8597_v10 = vpop.permute.xlu0 %3935 }
 0x5ce   : >> { %v8608_v0 = vpop.permute.xlu0 %3815 }
 0x5d2   : >> { %v8620_v11 = vpop.permute.xlu0 %3939 }
 0x5d6   : >> { %v8632_v3 = vpop.permute.xlu0 %3819 }
 0x5da   : >> { %v4062_v43 = vpop.permute.xlu0 %4061 }
 0x5de   : >> { %v3946_v45 = vpop.permute.xlu0 %3945 }
 0x651   : >> { %v5944_v27 = vpop.f32.mrb[32].mxu0 }
 0x652   : >> { %v5945_v32 = vpop.f32.mrb[33].mxu0 }
 0x653   : >> { %v5946_v55 = vadd.f32 %v5945_v32, %v5944_v27  ;;  %v5947_v61 = vpop.f32.mrb[34].mxu0  ;;  %v3826_v27 = vpop.permute.xlu0 %3825 }
 0x654   : >> { %v5948_v58 = vpop.f32.mrb[35].mxu0 }
 0x655   : >> { %v5949_v22 = vadd.f32 %v5948_v58, %v5947_v61 }
 0x657   : >> { %v3731_v41 = vpack.c.bf16 %v5949_v22, %v5946_v55  ;;  %v8736_v32 = vpop.permute.xlu0 %3949 }
 0x659   : >> { %3733 = vst.msk [vmem:[#allocation6 + $0x8] sm:$0xff] %vm9693_vm10, %v3731_v41  ;;  %vm3977_vm10 = vcmp.ne.s16.totalorder %v8575_v23, 0  ;;  %v4185_v23 = vld [vmem:[%s9466_s6 + $0x68] sm:$0xff] }
 0x65a   : >> { %v5950_v62 = vpop.f32.mrb[36].mxu0  ;;  %v3980_v8 = vsel %vm3977_vm10, %v8384_v21, 0  ;;  %v3981_v6 = vsel %vm3977_vm10, %v8386_v47, 0 }
 0x65b   : >> { %v5951_v4 = vpop.f32.mrb[37].mxu0  ;;  %v8741_v22 = vpop.permute.xlu0 %3829 }
 0x65c   : >> { %v5952_v16 = vadd.f32 %v5951_v4, %v5950_v62  ;;  %v5953_v46 = vpop.f32.mrb[38].mxu0 }
 0x65d   : >> { %v5954_v37 = vpop.f32.mrb[39].mxu0 }
 0x65e   : >> { %v5955_v57 = vadd.f32 %v5954_v37, %v5953_v46 }
 0x660   : >> { %v8586_v40 = vld [vmem:[#allocation6 + $0x8] sm:$0xff]  ;;  %v3732_v12 = vpack.c.bf16 %v5955_v57, %v5952_v16 }
 0x661   : >> { %3967 = vst.msk [vmem:[#allocation10 + $0x80] sm:$0xff] %vm9694_vm15, %v8586_v40  ;;  %3817 = vrot.lane.b32.xlu1 %v8586_v40, %s6848_s11  ;;  %v3864_v60 = vsel %vm3862_vm14, %v8586_v40, 0  ;;  %v3755_v15 = vsel %vm3753_vm0, %v8586_v40, 0  ;;  %v3920_v35 = vsel %vm3918_vm12, %v8586_v40, 0  ;;  %v3978_v28 = vsel %vm3977_vm10, %v8586_v40, 0  ;;  %vm9697_vm15 = vmmov %vm9692_vm9 }
 0x662   : >> { %3734 = vst.msk [vmem:[#allocation6 + $0x18] sm:$0xff] %vm9695_vm13, %v3732_v12  ;;  %v4009_v38 = vsel %vm4008_vm2, %v8586_v40, 0  ;;  %vm9698_vm13 = vmmov %vm9692_vm9 }
 0x665   : >> { %3881 = vrot.lane.b32.xlu1 %v3864_v60, %s6846_s25 }
 0x669   : >> { %v3964_v51 = vld [vmem:[#allocation6 + $0x18] sm:$0xff]  ;;  %3772 = vrot.lane.b32.xlu1 %v3755_v15, %s6847_s26 }
 0x66a   : >> { %3968 = vst.msk [vmem:[#allocation10 + $0x88] sm:$0xff] %vm9692_vm9, %v3964_v51  ;;  %v4010_v53 = vsel %vm4008_vm2, %v3964_v51, 0  ;;  %v3866_v52 = vsel %vm3862_vm14, %v3964_v51, 0  ;;  %v3979_v13 = vsel %vm3977_vm10, %v3964_v51, 0  ;;  %v3757_v30 = vsel %vm3753_vm0, %v3964_v51, 0 }
 0x66b   : >> { %4019 = vrot.lane.b32.xlu0 %v4010_v53, %s6844_s14  ;;  %vm4063_vm14 = vcmp.ne.s16.totalorder %v4062_v43, 0  ;;  %v3922_v48 = vsel %vm3918_vm12, %v3964_v51, 0  ;;  %vm3831_vm0 = vcmask 64512   ;;  %vm9696_vm12 = vmmov %vm9692_vm9  ;;  %v4138_v43 = vld [vmem:[#allocation10 + $0x10] sm:$0xff] }
 0x66c   : >> { %v4065_v7 = vsel %vm4063_vm14, %v3964_v51, 0  ;;  %v4067_v18 = vsel %vm4063_vm14, %v8386_v47, 0  ;;  %v4064_v1 = vsel %vm4063_vm14, %v8586_v40, 0  ;;  %v4066_v31 = vsel %vm4063_vm14, %v8384_v21, 0 }
 0x66d   : >> { %3937 = vrot.lane.b32.xlu1 %v3920_v35, %s6839_s30 }
 0x66f   : >> { %4023 = vrot.lane.b32.xlu0 %v4012_v24, %s6844_s14 }
 0x671   : >> { %3821 = vrot.lane.b32.xlu1 %v3964_v51, %s6848_s11 }
 0x673   : >> { %3986 = vrot.lane.b32.xlu0 %v3978_v28, %s6838_s29 }
 0x675   : >> { %3885 = vrot.lane.b32.xlu1 %v3866_v52, %s6846_s25 }
 0x677   : >> { %3988 = vrot.lane.b32.xlu0 %v3979_v13, %s6838_s29 }
 0x679   : >> { %3776 = vrot.lane.b32.xlu1 %v3757_v30, %s6847_s26  ;;  %s6849_s26 = smov 120  }
 0x67b   : >> { %3990 = vrot.lane.b32.xlu0 %v3980_v8, %s6838_s29  ;;  %v4146_v8 = vld [vmem:[#allocation10 + $0x50] sm:$0xff] }
 0x67d   : >> { %3943 = vrot.lane.b32.xlu1 %v3923_v33, %s6839_s30 }
 0x67f   : >> { %3992 = vrot.lane.b32.xlu0 %v3981_v6, %s6838_s29 }
 0x681   : >> { %3823 = vrot.lane.b32.xlu1 %v8448_v26, %s6848_s11  ;;  %v4173_v26 = vld [vmem:[%s9466_s6 + $0x8] sm:$0xff] }
 0x683   : >> { %4074 = vrot.lane.b32.xlu0 %v4065_v7, %s6845_s28  ;;  %v4147_v7 = vld [vmem:[#allocation10 + $0x58] sm:$0xff] }
 0x685   : >> { %3941 = vrot.lane.b32.xlu1 %v3922_v48, %s6839_s30 }
 0x687   : >> { %4078 = vrot.lane.b32.xlu0 %v4067_v18, %s6845_s28 }
 0x689   : >> { %3947 = vrot.lane.b32.xlu1 %v3925_v19, %s6839_s30 }
 0x68b   : >> { %4195 = vperm.xlu0 %6313, %v4173_v26   ;;  %v4139_v26 = vld [vmem:[#allocation10 + $0x18] sm:$0xff] }
 0x68d   : >> { %3827 = vrot.lane.b32.xlu1 %v8478_v29, %s6848_s11  ;;  %v4011_v29 = vsel %vm4008_vm2, %v8384_v21, 0  ;;  %vm9699_vm2 = vmmov %vm9692_vm9  ;;  %vm9700_vm9 = vcmask 7168  }
 0x68e   : >> { %vm9701_vm10 = vmmov %vm9699_vm2 }
 0x68f   : >> { %4205 = vperm.xlu0 %6313, %v4175_v56   ;;  %vm9702_vm14 = vmmov %vm9699_vm2 }
 0x691   : >> { %4017 = vrot.lane.b32.xlu1 %v4009_v38, %s6844_s14 }
 0x693   : >> { %4215 = vperm.xlu0 %6313, %v4177_v36  }
 0x695   : >> { %4021 = vrot.lane.b32.xlu1 %v4011_v29, %s6844_s14 }
 0x697   : >> { %4225 = vperm.xlu0 %6313, %v4179_v20  }
 0x699   : >> { %4041 = vrot.lane.b32.xlu1 %v8586_v40, %s6849_s26 }
 0x69b   : >> { %4235 = vperm.xlu0 %6313, %v4181_v34  }
 0x69d   : >> { %4043 = vrot.lane.b32.xlu1 %v3964_v51, %s6849_s26 }
 0x69f   : >> { %4245 = vperm.xlu0 %6313, %v4183_v17  }
 0x6a1   : >> { %4045 = vrot.lane.b32.xlu1 %v8384_v21, %s6849_s26  ;;  %v4178_v21 = vld [vmem:[%s9466_s6 + $0x30] sm:$0xff] }
 0x6a3   : >> { %4255 = vperm.xlu0 %6313, %v4185_v23  }
 0x6a5   : >> { %4047 = vrot.lane.b32.xlu1 %v8386_v47, %s6849_s26  ;;  %v4172_v47 = vld [vmem:[%s9466_s6] sm:$0xff] }
 0x6a7   : >> { %4265 = vperm.xlu0 %6313, %v4187_v2  }
 0x6a9   : >> { %4072 = vrot.lane.b32.xlu1 %v4064_v1, %s6845_s28 }
 0x6ad   : >> { %4076 = vrot.lane.b32.xlu1 %v4066_v31, %s6845_s28 }
 0x6b1   : >> { %4190 = vperm.xlu1 %6314, %v4172_v47   ;;  %v4152_v47 = vld [vmem:[#allocation10 + $0x80] sm:$0xff] }
 0x6b5   : >> { %4200 = vperm.xlu1 %6314, %v4174_v50   ;;  %v6441_v50 = vld [vmem:[%s9465_s5] ss:$20 sps:$4 sm:$0xff]  }
 0x6b9   : >> { %4210 = vperm.xlu1 %6314, %v4176_v49  }
 0x6bd   : >> { %4220 = vperm.xlu1 %6314, %v4178_v21   ;;  %v6444_v21 = vld [vmem:[%s9465_s5 + $0x2c] ss:$20 sps:$4 sm:$0xff]  }
 0x6c1   : >> { %4230 = vperm.xlu1 %6314, %v4180_v44  }
 0x6c5   : >> { %4240 = vperm.xlu1 %6314, %v4182_v63   ;;  %v4153_v63 = vld [vmem:[#allocation10 + $0x88] sm:$0xff] }
 0x6c9   : >> { %4250 = vperm.xlu1 %6314, %v4184_v42  }
 0x6cd   : >> { %4260 = vperm.xlu1 %6314, %v4186_v54  }
 0x6d3   : >> { %v3818_v55 = vpop.permute.xlu1 %3817 }
 0x6d4   : >> { %v3832_v61 = vsel %vm3831_vm0, %v8608_v0, %v3818_v55  ;;  %v6447_v55 = vld [vmem:[%s9465_s5 + $0x54] ss:$20 sps:$4 sm:$0xff]  }
 0x6d5   : >> { %3840 = vst.msk [vmem:[#allocation10 + $0x20] sm:$0xff] %vm9696_vm12, %v3832_v61  ;;  %vm9703_vm12 = vmmov %vm9699_vm2  ;;  %v4155_v61 = vld [vmem:[#allocation10 + $0x98] sm:$0xff] }
 0x6d7   : >> { %v3882_v58 = vpop.permute.xlu1 %3881 }
 0x6d8   : >> { %v3896_v41 = vsel %vm3895_vm11, %v8567_v5, %v3882_v58 }
 0x6d9   : >> { %3904 = vst.msk [vmem:[#allocation10 + $0x40] sm:$0xff] %vm9697_vm15, %v3896_v41  ;;  %vm9704_vm15 = vmmov %vm9699_vm2 }
 0x6db   : >> { %v3773_v62 = vpop.permute.xlu1 %3772 }
 0x6dc   : >> { %v3787_v4 = vsel %vm3786_vm1, %v8569_v59, %v3773_v62  ;;  %v4140_v38 = vld [vmem:[#allocation10 + $0x20] sm:$0xff] }
 0x6dd   : >> { %3795 = vst.msk [vmem:[#allocation10] sm:$0xff] %vm9698_vm13, %v3787_v4  ;;  %v4020_v16 = vpop.permute.xlu0 %4019  ;;  %vm9705_vm13 = vmmov %vm9699_vm2  ;;  %v6449_v4 = vld [vmem:[%s9465_s5 + $0x50] ss:$20 sps:$4 sm:$0xff]  }
 0x6de   : >> { %4030 = vst.msk [vmem:[#allocation10 + $0xc8] sm:$0xff] %vm9699_vm2, %v4020_v16 }
 0x6df   : >> { %v3938_v46 = vpop.permute.xlu1 %3937 }
 0x6e0   : >> { %v3951_v37 = vsel %vm9700_vm9, %v8597_v10, %v3938_v46  ;;  %v4144_v57 = vld [vmem:[#allocation10 + $0x40] sm:$0xff]  ;;  %vm9706_vm9 = vmmov %vm9699_vm2  ;;  %v6450_v46 = vld [vmem:[%s9465_s5 + $0x7c] ss:$20 sps:$4 sm:$0xff]  }
 0x6e1   : >> { %3959 = vst.msk [vmem:[#allocation10 + $0x60] sm:$0xff] %vm9701_vm10, %v3951_v37  ;;  %v4024_v40 = vpop.permute.xlu0 %4023  ;;  %5956 = vmatprep.subr.bf16.mxu0 %v4144_v57  ;;  %vm9707_vm10 = vmmov %vm9699_vm2 }
 0x6e2   : >> { %4032 = vst.msk [vmem:[#allocation10 + $0xd8] sm:$0xff] %vm9702_vm14, %v4024_v40  ;;  %vm9708_vm14 = vcmask 7168  }
 0x6e3   : >> { %v3822_v5 = vpop.permute.xlu1 %3821 }
 0x6e4   : >> { %v3833_v59 = vsel %vm3831_vm0, %v8632_v3, %v3822_v5  ;;  %v4136_v12 = vld [vmem:[#allocation10] sm:$0xff] }
 0x6e5   : >> { %3841 = vst.msk [vmem:[#allocation10 + $0x28] sm:$0xff] %vm9703_vm12, %v3833_v59  ;;  %v3987_v60 = vpop.permute.xlu0 %3986  ;;  %5957 = vmatpush3.bf16.msra.mxu0 %v4136_v12  ;;  %vm9709_vm12 = vmmov %vm9699_vm2  ;;  %v4161_v49 = vld [vmem:[#allocation10 + $0xc8] sm:$0xff] }
 0x6e6   : >> { %3998 = vst.msk [vmem:[#allocation10 + $0xa0] sm:$0xff] %vm9704_vm15, %v3987_v60  ;;  %v6452_v60 = vld [vmem:[%s9465_s5 + $0x78] ss:$20 sps:$4 sm:$0xff]  }
 0x6e7   : >> { %v3886_v15 = vpop.permute.xlu1 %3885 }
 0x6e8   : >> { %v3897_v10 = vsel %vm3895_vm11, %v8571_v9, %v3886_v15  ;;  %vm9710_vm11 = vmmov %vm9699_vm2  ;;  %v4148_v56 = vld [vmem:[#allocation10 + $0x60] sm:$0xff] }
 0x6e9   : >> { %3905 = vst.msk [vmem:[#allocation10 + $0x48] sm:$0xff] %vm9705_vm13, %v3897_v10  ;;  %v3989_v51 = vpop.permute.xlu0 %3988  ;;  %vm9713_vm13 = vmmov %vm9708_vm14  ;;  %v6456_v10 = vld [vmem:[%s9465_s5 + $0xa4] ss:$20 sps:$4 sm:$0xff]  }
 0x6ea   : >> { %3999 = vst.msk [vmem:[#allocation10 + $0xa8] sm:$0xff] %vm9699_vm2, %v3989_v51 }
 0x6eb   : >> { %v3777_v53 = vpop.permute.xlu1 %3776 }
 0x6ec   : >> { %v3788_v0 = vsel %vm3786_vm1, %v8573_v14, %v3777_v53  ;;  %vm9711_vm1 = vmmov %vm9699_vm2  ;;  %v4141_v20 = vld [vmem:[#allocation10 + $0x28] sm:$0xff] }
 0x6ed   : >> { %3796 = vst.msk [vmem:[#allocation10 + $0x8] sm:$0xff] %vm9706_vm9, %v3788_v0  ;;  %v3991_v35 = vpop.permute.xlu0 %3990  ;;  %vm9712_vm15 = vmmov %vm9711_vm1  ;;  %v4156_v62 = vld [vmem:[#allocation10 + $0xa0] sm:$0xff]  ;;  %v6453_v0 = vld [vmem:[%s9465_s5 + $0x8] ss:$20 sps:$4 sm:$0xff]  }
 0x6ee   : >> { %4000 = vst.msk [vmem:[#allocation10 + $0xb0] sm:$0xff] %vm9707_vm10, %v3991_v35  ;;  %vm9714_vm2 = vmmov %vm9711_vm1  ;;  %v6459_v35 = vld [vmem:[%s9465_s5 + $0x34] ss:$20 sps:$4 sm:$0xff]  }
 0x6ef   : >> { %v3944_v24 = vpop.permute.xlu1 %3943  ;;  %vm9715_vm9 = vmmov %vm9711_vm1 }
 0x6f0   : >> { %v3953_v28 = vsel %vm9708_vm14, %v3944_v24, %v3946_v45  ;;  %v4145_v52 = vld [vmem:[#allocation10 + $0x48] sm:$0xff]  ;;  %vm9716_vm10 = vmmov %vm9713_vm13  ;;  %v4154_v45 = vld [vmem:[#allocation10 + $0x90] sm:$0xff] }
 0x6f1   : >> { %3961 = vst.msk [vmem:[#allocation10 + $0x70] sm:$0xff] %vm9709_vm12, %v3953_v28  ;;  %v3993_v9 = vpop.permute.xlu0 %3992  ;;  %5958 = vmatprep.subr.bf16.mxu0 %v4145_v52  ;;  %vm9717_vm14 = vmmov %vm9711_vm1  ;;  %v4157_v40 = vld [vmem:[#allocation10 + $0xa8] sm:$0xff]  ;;  %v6458_v28 = vld [vmem:[%s9465_s5 + $0xa0] ss:$20 sps:$4 sm:$0xff]  }
 0x6f2   : >> { %4001 = vst.msk [vmem:[#allocation10 + $0xb8] sm:$0xff] %vm9710_vm11, %v3993_v9  ;;  %vm9718_vm12 = vmmov %vm9711_vm1  ;;  %v6462_v52 = vld [vmem:[%s9465_s5 + $0xcc] ss:$20 sps:$4 sm:$0xff]   ;;  %v6461_v9 = vld [vmem:[%s9465_s5 + $0x30] ss:$20 sps:$4 sm:$0xff]  }
 0x6f3   : >> { %v3824_v13 = vpop.permute.xlu1 %3823  ;;  %vm9719_vm11 = vmmov %vm9711_vm1 }
 0x6f4   : >> { %v3834_v3 = vsel %vm3831_vm0, %v3824_v13, %v3826_v27  ;;  %v4137_v30 = vld [vmem:[#allocation10 + $0x8] sm:$0xff]  ;;  %v6465_v13 = vld [vmem:[%s9465_s5 + $0x5c] ss:$20 sps:$4 sm:$0xff]  }
 0x6f5   : >> { %3842 = vst.msk [vmem:[#allocation10 + $0x30] sm:$0xff] %vm9711_vm1, %v3834_v3  ;;  %v4075_v14 = vpop.permute.xlu0 %4074  ;;  %5959 = vmatpush3.bf16.msra.mxu0 %v4137_v30  ;;  %v6446_v27 = vld [vmem:[%s9465_s5 + $0x28] ss:$20 sps:$4 sm:$0xff]   ;;  %v4158_v12 = vld [vmem:[#allocation10 + $0xb0] sm:$0xff] }
 0x6f6   : >> { %4085 = vst.msk [vmem:[#allocation10 + $0x108] sm:$0xff] %vm9712_vm15, %v4075_v14  ;;  %5960 = vmatprep.subr.bf16.mxu0 %v4146_v8  ;;  %v6464_v3 = vld [vmem:[%s9465_s5 + $0xc8] ss:$20 sps:$4 sm:$0xff]   ;;  %v6467_v14 = vld [vmem:[%s9465_s5 + $0x58] ss:$20 sps:$4 sm:$0xff]  }
 0x6f7   : >> { %v3942_v33 = vpop.permute.xlu1 %3941  ;;  %v6468_v30 = vld [vmem:[%s9465_s5 + $0xf4] ss:$20 sps:$4 sm:$0xff]   ;;  %v6471_v8 = vld [vmem:[%s9465_s5 + $0x84] ss:$20 sps:$4 sm:$0xff]  }
 0x6f8   : >> { %v3952_v6 = vsel %vm9713_vm13, %v8620_v11, %v3942_v33  ;;  %v4150_v34 = vld [vmem:[#allocation10 + $0x70] sm:$0xff] }
 0x6f9   : >> { %3960 = vst.msk [vmem:[#allocation10 + $0x68] sm:$0xff] %vm9714_vm2, %v3952_v6  ;;  %5961 = vmatpush3.bf16.msra.mxu0 %v4138_v43  ;;  %v4079_v48 = vpop.permute.xlu0 %4078  ;;  %v4159_v53 = vld [vmem:[#allocation10 + $0xb8] sm:$0xff]  ;;  %v6470_v33 = vld [vmem:[%s9465_s5 + $0xf0] ss:$20 sps:$4 sm:$0xff]   ;;  %v6473_v43 = vld [vmem:[%s9465_s5 + $0x80] ss:$20 sps:$4 sm:$0xff]  }
 0x6fa   : >> { %5962 = vmatprep.subr.bf16.mxu0 %v4147_v7  ;;  %4087 = vst.msk [vmem:[#allocation10 + $0x118] sm:$0xff] %vm9715_vm9, %v4079_v48  ;;  %v6474_v6 = vld [vmem:[%s9465_s5 + $0x11c] ss:$20 sps:$4 sm:$0xff]   ;;  %v6477_v7 = vld [vmem:[%s9465_s5 + $0xac] ss:$20 sps:$4 sm:$0xff]  }
 0x6fb   : >> { %v3948_v18 = vpop.permute.xlu1 %3947  ;;  %v6476_v48 = vld [vmem:[%s9465_s5 + $0x118] ss:$20 sps:$4 sm:$0xff]  }
 0x6fc   : >> { %v3954_v19 = vsel %vm9716_vm10, %v3948_v18, %v8736_v32  ;;  %v4142_v23 = vld [vmem:[#allocation10 + $0x30] sm:$0xff]  ;;  %v4163_v32 = vld [vmem:[#allocation10 + $0xd8] sm:$0xff] }
 0x6fd   : >> { %3962 = vst.msk [vmem:[#allocation10 + $0x78] sm:$0xff] %vm9717_vm14, %v3954_v19  ;;  %5963 = vmatpush3.bf16.msra.mxu0 %v4139_v26  ;;  %v4169_v15 = vld [vmem:[#allocation10 + $0x108] sm:$0xff]  ;;  %v6480_v18 = vld [vmem:[%s9465_s5 + $0x10] ss:$20 sps:$4 sm:$0xff]  }
 0x6fe   : >> { %5964 = vmatprep.subr.bf16.mxu0 %v4148_v56  ;;  %v6479_v19 = vld [vmem:[%s9465_s5 + $0xa8] ss:$20 sps:$4 sm:$0xff]   ;;  %v6481_v56 = vld [vmem:[%s9465_s5 + $0x38] ss:$20 sps:$4 sm:$0xff]  }
 0x6ff   : >> { %v3828_v11 = vpop.permute.xlu1 %3827  ;;  %v6482_v26 = vld [vmem:[%s9465_s5 + $0xd4] ss:$20 sps:$4 sm:$0xff]  }
 0x700   : >> { %v3835_v25 = vsel %vm3831_vm0, %v3828_v11, %v8741_v22  ;;  %v4149_v36 = vld [vmem:[#allocation10 + $0x68] sm:$0xff]  ;;  %vm9720_vm0 = vmmov %vm9711_vm1  ;;  %v6485_v11 = vld [vmem:[%s9465_s5 + $0x60] ss:$20 sps:$4 sm:$0xff]  }
 0x701   : >> { %3843 = vst.msk [vmem:[#allocation10 + $0x38] sm:$0xff] %vm9718_vm12, %v3835_v25  ;;  %5965 = vmatpush3.bf16.msra.mxu0 %v4140_v38  ;;  %vm9721_vm15 = vmmov %vm9720_vm0  ;;  %v4171_v24 = vld [vmem:[#allocation10 + $0x118] sm:$0xff]  ;;  %v6484_v25 = vld [vmem:[%s9465_s5 + $0xd0] ss:$20 sps:$4 sm:$0xff]  }
 0x702   : >> { %5966 = vmatprep.subr.bf16.mxu0 %v4149_v36  ;;  %vm9722_vm13 = vmmov %vm9720_vm0  ;;  %v6487_v38 = vld [vmem:[%s9465_s5 + $0xfc] ss:$20 sps:$4 sm:$0xff]  }
 0x703   : >> { %v4018_v29 = vpop.permute.xlu1 %4017  ;;  %vm9723_vm2 = vmmov %vm9720_vm0  ;;  %v6486_v36 = vld [vmem:[%s9465_s5 + $0x88] ss:$20 sps:$4 sm:$0xff]  }
 0x704   : >> { %4029 = vst.msk [vmem:[#allocation10 + $0xc0] sm:$0xff] %vm9719_vm11, %v4018_v29  ;;  %v4151_v2 = vld [vmem:[#allocation10 + $0x78] sm:$0xff]  ;;  %vm9724_vm9 = vmmov %vm9720_vm0  ;;  %v6490_v29 = vld [vmem:[%s9465_s5 + $0xb0] ss:$20 sps:$4 sm:$0xff]  }
 0x705   : >> { %5967 = vmatpush3.bf16.msra.mxu0 %v4141_v20  ;;  %vm9725_vm10 = vmmov %vm9720_vm0  ;;  %v6489_v20 = vld [vmem:[%s9465_s5 + $0xf8] ss:$20 sps:$4 sm:$0xff]  }
 0x706   : >> { %5968 = vmatprep.subr.bf16.mxu0 %v4150_v34  ;;  %vm9726_vm14 = vmmov %vm9720_vm0  ;;  %v6492_v34 = vld [vmem:[%s9465_s5 + $0x124] ss:$20 sps:$4 sm:$0xff]  }
 0x707   : >> { %v4022_v17 = vpop.permute.xlu1 %4021  ;;  %vm9727_vm12 = vmmov %vm9720_vm0 }
 0x708   : >> { %4031 = vst.msk [vmem:[#allocation10 + $0xd0] sm:$0xff] %vm9711_vm1, %v4022_v17  ;;  %v4143_v31 = vld [vmem:[#allocation10 + $0x38] sm:$0xff]  ;;  %vm9728_vm11 = vmmov %vm9720_vm0 }
 0x709   : >> { %5969 = vmatpush3.bf16.msra.mxu0 %v4142_v23  ;;  %vm9729_vm1 = vmmov %vm9720_vm0  ;;  %v6491_v17 = vld [vmem:[%s9465_s5 + $0xd8] ss:$20 sps:$4 sm:$0xff]   ;;  %v6495_v23 = vld [vmem:[%s9465_s5 + $0x100] ss:$20 sps:$4 sm:$0xff]  }
 0x70a   : >> { %5970 = vmatprep.subr.bf16.mxu0 %v4151_v2  ;;  %v6494_v2 = vld [vmem:[%s9465_s5 + $0x120] ss:$20 sps:$4 sm:$0xff]  }
 0x70b   : >> { %v4042_v1 = vpop.permute.xlu1 %4041  ;;  %v4160_v39 = vld [vmem:[#allocation10 + $0xc0] sm:$0xff] }
 0x70c   : >> { %4053 = vst.msk [vmem:[#allocation10 + $0xe0] sm:$0xff] %vm9720_vm0, %v4042_v1  ;;  %6020 = vmatprep.subr.bf16.mxu1 %v4160_v39  ;;  %v6496_v1 = vld [vmem:[%s9465_s5 + $0x128] ss:$20 sps:$4 sm:$0xff]  }
 0x70d   : >> { %5971 = vmatpush3.bf16.msra.mxu0 %v4143_v31  ;;  %6021 = vmatpush3.bf16.msra.mxu1 %v4152_v47 }
 0x70e   : >> { %6022 = vmatprep.subr.bf16.mxu1 %v4161_v49 }
 0x70f   : >> { %v4044_v44 = vpop.permute.xlu1 %4043  ;;  %v4162_v42 = vld [vmem:[#allocation10 + $0xd0] sm:$0xff] }
 0x710   : >> { %4054 = vst.msk [vmem:[#allocation10 + $0xe8] sm:$0xff] %vm9721_vm15, %v4044_v44  ;;  %4525 = vmatmul.mubr.bf16.vlgmr.msra.gmra.mrb[40].mxu0 %v6441_v50  ;;  %vm9730_vm15 = vmmov %vm9720_vm0 }
 0x711   : >> { %6023 = vmatpush3.bf16.msra.mxu1 %v4153_v63  ;;  %4532 = vmatprep.mubr.bf16.mxu0 %v6444_v21 }
 0x712   : >> { %6024 = vmatprep.subr.bf16.mxu1 %v4162_v42 }
 0x713   : >> { %v4046_v54 = vpop.permute.xlu1 %4045  ;;  %v4164_v22 = vld [vmem:[#allocation10 + $0xe0] sm:$0xff] }
 0x714   : >> { %4055 = vst.msk [vmem:[#allocation10 + $0xf0] sm:$0xff] %vm9722_vm13, %v4046_v54  ;;  %vm9731_vm13 = vmmov %vm9720_vm0 }
 0x715   : >> { %6025 = vmatpush3.bf16.msra.mxu1 %v4154_v45 }
 0x716   : >> { %6026 = vmatprep.subr.bf16.mxu1 %v4163_v32 }
 0x717   : >> { %v4048_v58 = vpop.permute.xlu1 %4047  ;;  %v4165_v16 = vld [vmem:[#allocation10 + $0xe8] sm:$0xff] }
 0x718   : >> { %4056 = vst.msk [vmem:[#allocation10 + $0xf8] sm:$0xff] %vm9723_vm2, %v4048_v58  ;;  %4533 = vmatmul.mubr.bf16.gmra.mrb[44].mxu0 %v6446_v27  ;;  %vm9732_vm2 = vmmov %vm9720_vm0 }
 0x719   : >> { %6027 = vmatpush3.bf16.msra.mxu1 %v4155_v61  ;;  %4540 = vmatprep.mubr.bf16.mxu0 %v6447_v55 }
 0x71a   : >> { %6028 = vmatprep.subr.bf16.mxu1 %v4164_v22 }
 0x71b   : >> { %v4073_v41 = vpop.permute.xlu1 %4072  ;;  %v4166_v57 = vld [vmem:[#allocation10 + $0xf0] sm:$0xff] }
 0x71c   : >> { %4084 = vst.msk [vmem:[#allocation10 + $0x100] sm:$0xff] %vm9724_vm9, %v4073_v41  ;;  %vm9733_vm9 = vmmov %vm9720_vm0 }
 0x71d   : >> { %6029 = vmatpush3.bf16.msra.mxu1 %v4156_v62 }
 0x71e   : >> { %6030 = vmatprep.subr.bf16.mxu1 %v4165_v16 }
 0x71f   : >> { %v4077_v37 = vpop.permute.xlu1 %4076  ;;  %v4167_v59 = vld [vmem:[#allocation10 + $0xf8] sm:$0xff] }
 0x720   : >> { %4541 = vmatmul.mubr.bf16.gmra.mrb[48].mxu0 %v6449_v4  ;;  %4086 = vst.msk [vmem:[#allocation10 + $0x110] sm:$0xff] %vm9725_vm10, %v4077_v37  ;;  %vm9734_vm10 = vmmov %vm9720_vm0 }
 0x721   : >> { %6031 = vmatpush3.bf16.msra.mxu1 %v4157_v40  ;;  %4548 = vmatprep.mubr.bf16.mxu0 %v6450_v46 }
 0x722   : >> { %6032 = vmatprep.subr.bf16.mxu1 %v4166_v57 }
 0x723   : >> { %v4168_v5 = vld [vmem:[#allocation10 + $0x100] sm:$0xff] }
 0x724   : >> { %6096 = vmatprep.subr.bf16.mxu0 %v4168_v5 }
 0x725   : >> { %6033 = vmatpush3.bf16.msra.mxu1 %v4158_v12  ;;  %6097 = vmatpush3.bf16.msra.mxu0 %v4168_v5 }
 0x726   : >> { %6098 = vmatprep.subr.bf16.mxu0 %v4169_v15  ;;  %6034 = vmatprep.subr.bf16.mxu1 %v4167_v59 }
 0x727   : >> { %v4170_v51 = vld [vmem:[#allocation10 + $0x110] sm:$0xff] }
 0x728   : >> { %4549 = vmatmul.mubr.bf16.gmra.mrb[52].mxu0 %v6452_v60 }
 0x729   : >> { %6035 = vmatpush3.bf16.msra.mxu1 %v4159_v53  ;;  %6099 = vmatpush3.bf16.msra.mxu0 %v4169_v15 }
 0x72a   : >> { %6100 = vmatprep.subr.bf16.mxu0 %v4170_v51  ;;  %4556 = vmatprep.mubr.bf16.mxu0 %v6456_v10  ;;  %v4196_v10 = vpop.permute.xlu0 %4195 }
 0x72c   : >> { %4622 = vmatmul.mubr.bf16.vlgmr.msra.gmra.mrb[32].mxu1 %v6453_v0 }
 0x72d   : >> { %6101 = vmatpush3.bf16.msra.mxu0 %v4170_v51  ;;  %4629 = vmatprep.mubr.bf16.mxu1 %v6459_v35 }
 0x72e   : >> { %6102 = vmatprep.subr.bf16.mxu0 %v4171_v24 }
 0x730   : >> { %4557 = vmatmul.mubr.bf16.gmra.mrb[56].mxu0 %v6458_v28  ;;  %v4191_v5 = vpop.permute.xlu1 %4190 }
 0x731   : >> { %6103 = vmatpush3.bf16.msra.mxu0 %v4171_v24  ;;  %4564 = vmatprep.mubr.bf16.mxu0 %v6462_v52 }
 0x734   : >> { %4630 = vmatmul.mubr.bf16.gmra.mrb[36].mxu1 %v6461_v9 }
 0x735   : >> { %4637 = vmatprep.mubr.bf16.mxu1 %v6465_v13 }
 0x738   : >> { %4565 = vmatmul.mubr.bf16.gmra.mrb[60].mxu0 %v6464_v3 }
 0x739   : >> { %4572 = vmatprep.mubr.bf16.mxu0 %v6468_v30 }
 0x73c   : >> { %4638 = vmatmul.mubr.bf16.gmra.mrb[40].mxu1 %v6467_v14 }
 0x73d   : >> { %4645 = vmatprep.mubr.bf16.mxu1 %v6471_v8  ;;  %v4201_v8 = vpop.permute.xlu1 %4200 }
 0x740   : >> { %4573 = vmatmul.mubr.bf16.gmra.mrb[64].mxu0 %v6470_v33 }
 0x741   : >> { %4580 = vmatprep.mubr.bf16.mxu0 %v6474_v6 }
 0x744   : >> { %4646 = vmatmul.mubr.bf16.gmra.mrb[44].mxu1 %v6473_v43 }
 0x745   : >> { %4653 = vmatprep.mubr.bf16.mxu1 %v6477_v7 }
 0x748   : >> { %4581 = vmatmul.mubr.bf16.gmra.mrb[68].mxu0 %v6476_v48  ;;  %v4206_v48 = vpop.permute.xlu0 %4205 }
 0x749   : >> { %6104 = vmatprep.mubr.msk.bf16.mxu0 %vm9726_vm14, %v6480_v18  ;;  %vm9735_vm14 = vmmov %vm9720_vm0 }
 0x74c   : >> { %4654 = vmatmul.mubr.bf16.gmra.mrb[48].mxu1 %v6479_v19 }
 0x74d   : >> { %4661 = vmatprep.mubr.bf16.mxu1 %v6482_v26 }
 0x750   : >> { %6105 = vmatmul.mubr.msk.bf16.vlgmr.msra.gmra.mrb[72].mxu0 %vm9727_vm12, %v6481_v56  ;;  %vm9736_vm12 = vmmov %vm9720_vm0 }
 0x751   : >> { %6108 = vmatprep.mubr.msk.bf16.mxu0 %vm9728_vm11, %v6485_v11  ;;  %vm9737_vm11 = vmmov %vm9720_vm0 }
 0x754   : >> { %4662 = vmatmul.mubr.bf16.gmra.mrb[52].mxu1 %v6484_v25 }
 0x755   : >> { %4669 = vmatprep.mubr.bf16.mxu1 %v6487_v38 }
 0x758   : >> { %6109 = vmatmul.mubr.msk.bf16.gmra.mrb[76].mxu0 %vm9729_vm1, %v6486_v36  ;;  %vm9738_vm1 = vmmov %vm9720_vm0 }
 0x759   : >> { %6112 = vmatprep.mubr.msk.bf16.mxu0 %vm9720_vm0, %v6490_v29  ;;  %vm9745_vm0 = vmmov (%p469_p4), %vm9739_vm3 }
 0x75c   : >> { %4670 = vmatmul.mubr.bf16.gmra.mrb[56].mxu1 %v6489_v20 }
 0x75d   : >> { %4677 = vmatprep.mubr.bf16.mxu1 %v6492_v34 }
 0x760   : >> { %6113 = vmatmul.mubr.msk.bf16.gmra.mrb[80].mxu0 %vm9730_vm15, %v6491_v17  ;;  %vm9746_vm15 = vmmov (%p469_p4), %vm9745_vm0 }
 0x761   : >> { %6116 = vmatprep.mubr.msk.bf16.mxu0 %vm9731_vm13, %v6495_v23  ;;  %v4211_v23 = vpop.permute.xlu1 %4210  ;;  %vm9747_vm13 = vmmov (%p469_p4), %vm9745_vm0 }
 0x764   : >> { %4678 = vmatmul.mubr.bf16.gmra.mrb[60].mxu1 %v6494_v2 }
 0x768   : >> { %6117 = vmatmul.mubr.msk.bf16.gmra.mrb[84].mxu0 %vm9732_vm2, %v6496_v1  ;;  %vm9748_vm2 = vmmov (%p469_p4), %vm9745_vm0 }
 0x7e3   : >> { %v5972_v39 = vpop.f32.mrb[40].mxu0 }
 0x7e4   : >> { %v5973_v31 = vpop.f32.mrb[41].mxu0 }
 0x7e5   : >> { %v5974_v47 = vadd.f32 %v5973_v31, %v5972_v39  ;;  %v5975_v50 = vpop.f32.mrb[42].mxu0 }
 0x7e6   : >> { %v5976_v49 = vpop.f32.mrb[43].mxu0 }
 0x7e7   : >> { %v5977_v21 = vadd.f32 %v5976_v49, %v5975_v50  ;;  %v4527_v12 = vadd.f32 %v5974_v47, %v4191_v5  ;;  %v4216_v47 = vpop.permute.xlu0 %4215 }
 0x7e9   : >> { %v4530_v53 = vadd.f32 %v5977_v21, %v4196_v10 }
 0x7eb   : >> { %v5978_v44 = vpop.f32.mrb[44].mxu0 }
 0x7ec   : >> { %v5979_v63 = vpop.f32.mrb[45].mxu0 }
 0x7ed   : >> { %v5980_v42 = vadd.f32 %v5979_v63, %v5978_v44  ;;  %v5981_v45 = vpop.f32.mrb[46].mxu0 }
 0x7ee   : >> { %v5982_v54 = vpop.f32.mrb[47].mxu0 }
 0x7ef   : >> { %v5983_v27 = vadd.f32 %v5982_v54, %v5981_v45  ;;  %v4535_v6 = vadd.f32 %v5980_v42, %v4201_v8 }
 0x7f1   : >> { %v4538_v19 = vadd.f32 %v5983_v27, %v4206_v48 }
 0x7f3   : >> { %v5984_v32 = vpop.f32.mrb[48].mxu0 }
 0x7f4   : >> { %v5985_v55 = vpop.f32.mrb[49].mxu0 }
 0x7f5   : >> { %v5986_v61 = vadd.f32 %v5985_v55, %v5984_v32  ;;  %v5987_v58 = vpop.f32.mrb[50].mxu0 }
 0x7f6   : >> { %v5988_v22 = vpop.f32.mrb[51].mxu0 }
 0x7f7   : >> { %v5989_v41 = vadd.f32 %v5988_v22, %v5987_v58  ;;  %v4543_v1 = vadd.f32 %v5986_v61, %v4211_v23  ;;  %v4221_v61 = vpop.permute.xlu1 %4220 }
 0x7f9   : >> { %v4546_v49 = vadd.f32 %v5989_v41, %v4216_v47  ;;  %v4226_v41 = vpop.permute.xlu0 %4225 }
 0x7fb   : >> { %v5990_v62 = vpop.f32.mrb[52].mxu0 }
 0x7fc   : >> { %v5991_v4 = vpop.f32.mrb[53].mxu0 }
 0x7fd   : >> { %v5992_v16 = vadd.f32 %v5991_v4, %v5990_v62  ;;  %v5993_v46 = vpop.f32.mrb[54].mxu0  ;;  %v4236_v8 = vpop.permute.xlu0 %4235 }
 0x7fe   : >> { %v5994_v37 = vpop.f32.mrb[55].mxu0 }
 0x7ff   : >> { %v8912_v57 = vadd.f32 %v5994_v37, %v5993_v46  ;;  %v6036_v40 = vpop.f32.mrb[32].mxu1  ;;  %v4551_v62 = vadd.f32 %v5992_v16, %v4221_v61 }
 0x800   : >> { %v6037_v59 = vpop.f32.mrb[33].mxu1 }
 0x801   : >> { %v6038_v60 = vadd.f32 %v6037_v59, %v6036_v40  ;;  %v6039_v15 = vpop.f32.mrb[34].mxu1  ;;  %v4554_v40 = vadd.f32 %v8912_v57, %v4226_v41  ;;  %v4246_v47 = vpop.permute.xlu0 %4245 }
 0x802   : >> { %v6040_v51 = vpop.f32.mrb[35].mxu1 }
 0x803   : >> { %v6041_v0 = vadd.f32 %v6040_v51, %v6039_v15  ;;  %v5996_v35 = vpop.f32.mrb[56].mxu0  ;;  %v8914_v24 = vadd.f32 %v6038_v60, %v4527_v12 }
 0x804   : >> { %v5997_v28 = vpop.f32.mrb[57].mxu0 }
 0x805   : >> { %v5998_v52 = vadd.f32 %v5997_v28, %v5996_v35  ;;  %v5999_v9 = vpop.f32.mrb[58].mxu0  ;;  %v8916_v13 = vadd.f32 %v6041_v0, %v4530_v53  ;;  %v4231_v28 = vpop.permute.xlu1 %4230 }
 0x806   : >> { %v6000_v3 = vpop.f32.mrb[59].mxu0 }
 0x807   : >> { %v8918_v30 = vadd.f32 %v6000_v3, %v5999_v9  ;;  %v6042_v14 = vpop.f32.mrb[36].mxu1  ;;  %v4559_v9 = vadd.f32 %v5998_v52, %v4231_v28 }
 0x808   : >> { %v6043_v33 = vpop.f32.mrb[37].mxu1 }
 0x809   : >> { %v6044_v43 = vadd.f32 %v6043_v33, %v6042_v14  ;;  %v6045_v7 = vpop.f32.mrb[38].mxu1  ;;  %v4562_v57 = vadd.f32 %v8918_v30, %v4236_v8 }
 0x80a   : >> { %v6046_v18 = vpop.f32.mrb[39].mxu1 }
 0x80b   : >> { %v6047_v26 = vadd.f32 %v6046_v18, %v6045_v7  ;;  %v6002_v56 = vpop.f32.mrb[60].mxu0  ;;  %v4632_v11 = vadd.f32 %v6044_v43, %v4535_v6 }
 0x80c   : >> { %v6003_v25 = vpop.f32.mrb[61].mxu0 }
 0x80d   : >> { %v8920_v38 = vadd.f32 %v6003_v25, %v6002_v56  ;;  %v6005_v36 = vpop.f32.mrb[62].mxu0  ;;  %v4635_v29 = vadd.f32 %v6047_v26, %v4538_v19 }
 0x80e   : >> { %v6006_v20 = vpop.f32.mrb[63].mxu0 }
 0x80f   : >> { %v8922_v34 = vadd.f32 %v6006_v20, %v6005_v36  ;;  %v6048_v17 = vpop.f32.mrb[40].mxu1 }
 0x810   : >> { %v6049_v2 = vpop.f32.mrb[41].mxu1 }
 0x811   : >> { %v6050_v39 = vadd.f32 %v6049_v2, %v6048_v17  ;;  %v6051_v31 = vpop.f32.mrb[42].mxu1  ;;  %v4241_v2 = vpop.permute.xlu1 %4240 }
 0x812   : >> { %v6052_v50 = vpop.f32.mrb[43].mxu1 }
 0x813   : >> { %v6053_v21 = vadd.f32 %v6052_v50, %v6051_v31  ;;  %v6008_v44 = vpop.f32.mrb[64].mxu0  ;;  %v8924_v63 = vadd.f32 %v6050_v39, %v4543_v1  ;;  %v4567_v39 = vadd.f32 %v8920_v38, %v4241_v2 }
 0x814   : >> { %v6009_v42 = vpop.f32.mrb[65].mxu0 }
 0x815   : >> { %v8926_v45 = vadd.f32 %v6009_v42, %v6008_v44  ;;  %v6011_v54 = vpop.f32.mrb[66].mxu0  ;;  %v8928_v27 = vadd.f32 %v6053_v21, %v4546_v49  ;;  %v4251_v41 = vpop.permute.xlu1 %4250 }
 0x816   : >> { %v6012_v32 = vpop.f32.mrb[67].mxu0 }
 0x817   : >> { %v8930_v55 = vadd.f32 %v6012_v32, %v6011_v54  ;;  %v6054_v58 = vpop.f32.mrb[44].mxu1 }
 0x818   : >> { %v6055_v22 = vpop.f32.mrb[45].mxu1 }
 0x819   : >> { %v6056_v4 = vadd.f32 %v6055_v22, %v6054_v58  ;;  %v6057_v46 = vpop.f32.mrb[46].mxu1 }
 0x81a   : >> { %v6058_v37 = vpop.f32.mrb[47].mxu1 }
 0x81b   : >> { %v6059_v5 = vadd.f32 %v6058_v37, %v6057_v46  ;;  %v6014_v59 = vpop.f32.mrb[68].mxu0  ;;  %v4648_v12 = vadd.f32 %v6056_v4, %v4551_v62 }
 0x81c   : >> { %v6015_v60 = vpop.f32.mrb[69].mxu0 }
 0x81d   : >> { %v8933_v15 = vadd.f32 %v6015_v60, %v6014_v59  ;;  %v6017_v10 = vpop.f32.mrb[70].mxu0  ;;  %v4651_v51 = vadd.f32 %v6059_v5, %v4554_v40  ;;  %v4256_v40 = vpop.permute.xlu0 %4255  ;;  %v4575_v5 = vadd.f32 %v8926_v45, %v4251_v41 }
 0x81e   : >> { %v6018_v53 = vpop.f32.mrb[71].mxu0 }
 0x81f   : >> { %v8935_v0 = vadd.f32 %v6018_v53, %v6017_v10  ;;  %v6060_v35 = vpop.f32.mrb[48].mxu1  ;;  %v4578_v10 = vadd.f32 %v8930_v55, %v4256_v40 }
 0x820   : >> { %v6061_v16 = vpop.f32.mrb[49].mxu1 }
 0x821   : >> { %v6062_v3 = vadd.f32 %v6061_v16, %v6060_v35  ;;  %v6063_v14 = vpop.f32.mrb[50].mxu1 }
 0x822   : >> { %v6064_v33 = vpop.f32.mrb[51].mxu1 }
 0x823   : >> { %v6065_v6 = vadd.f32 %v6064_v33, %v6063_v14  ;;  %v6106_v43 = vpop.f32.mrb[72].mxu0  ;;  %v8938_v7 = vadd.f32 %v6062_v3, %v4559_v9 }
 0x824   : >> { %v4729_v48 = vadd.f32 %v6106_v43, %v4632_v11  ;;  %v4720_v18 = vpop.f32.mrb[73].mxu0 }
 0x825   : >> { %v4721_v19 = vadd.f32 %v4720_v18, %v8914_v24  ;;  %v6107_v26 = vpop.f32.mrb[74].mxu0  ;;  %v8941_v56 = vadd.f32 %v6065_v6, %v4562_v57 }
 0x826   : >> { %v5913_v25 = vmul.f32 -1.442695, %v4729_v48  ;;  %v4732_v36 = vadd.f32 %v6107_v26, %v4635_v29  ;;  %v4723_v52 = vpop.f32.mrb[75].mxu0  ;;  %v4570_v29 = vadd.f32 %v8922_v34, %v4246_v47 }
 0x827   : >> { %v5911_v20 = vmul.f32 -1.442695, %v4721_v19  ;;  %v4724_v17 = vadd.f32 %v4723_v52, %v8916_v13  ;;  %v6066_v23 = vpop.f32.mrb[52].mxu1  ;;  %v4261_v52 = vpop.permute.xlu1 %4260 }
 0x828   : >> { %6753 = vpow2.f32 %v5913_v25  ;;  %v5914_v30 = vmul.f32 -1.442695, %v4732_v36  ;;  %v6067_v1 = vpop.f32.mrb[53].mxu1 }
 0x829   : >> { %6755 = vpow2.f32 %v5911_v20  ;;  %v5912_v11 = vmul.f32 -1.442695, %v4724_v17  ;;  %v6068_v31 = vadd.f32 %v6067_v1, %v6066_v23  ;;  %v6069_v24 = vpop.f32.mrb[54].mxu1  ;;  %v4583_v23 = vadd.f32 %v8933_v15, %v4261_v52 }
 0x82a   : >> { %6757 = vpow2.f32 %v5914_v30  ;;  %v6070_v50 = vpop.f32.mrb[55].mxu1 }
 0x82b   : >> { %6759 = vpow2.f32 %v5912_v11  ;;  %v6071_v49 = vadd.f32 %v6070_v50, %v6069_v24  ;;  %v6110_v21 = vpop.f32.mrb[76].mxu0  ;;  %v4664_v13 = vadd.f32 %v6068_v31, %v4567_v39  ;;  %v4266_v31 = vpop.permute.xlu0 %4265 }
 0x82c   : >> { %v4745_v44 = vadd.f32 %v6110_v21, %v4648_v12  ;;  %v4736_v42 = vpop.f32.mrb[77].mxu0 }
 0x82d   : >> { %v4737_v54 = vadd.f32 %v4736_v42, %v8924_v63  ;;  %v6111_v32 = vpop.f32.mrb[78].mxu0  ;;  %v4667_v58 = vadd.f32 %v6071_v49, %v4570_v29  ;;  %v4586_v49 = vadd.f32 %v8935_v0, %v4266_v31 }
 0x82e   : >> { %v5917_v38 = vmul.f32 -1.442695, %v4745_v44  ;;  %v4748_v61 = vadd.f32 %v6111_v32, %v4651_v51  ;;  %v4739_v22 = vpop.f32.mrb[79].mxu0 }
 0x82f   : >> { %v5915_v62 = vmul.f32 -1.442695, %v4737_v54  ;;  %v4740_v4 = vadd.f32 %v4739_v22, %v8928_v27  ;;  %v6072_v46 = vpop.f32.mrb[56].mxu1 }
 0x830   : >> { %6761 = vpow2.f32 %v5917_v38  ;;  %v5918_v34 = vmul.f32 -1.442695, %v4748_v61  ;;  %v6073_v37 = vpop.f32.mrb[57].mxu1 }
 0x831   : >> { %6763 = vpow2.f32 %v5915_v62  ;;  %v5916_v59 = vmul.f32 -1.442695, %v4740_v4  ;;  %v6074_v12 = vadd.f32 %v6073_v37, %v6072_v46  ;;  %v6075_v63 = vpop.f32.mrb[58].mxu1 }
 0x832   : >> { %v6754_v60 = vpop.eup %6753  ;;  %6765 = vpow2.f32 %v5918_v34  ;;  %v6076_v51 = vpop.f32.mrb[59].mxu1 }
 0x833   : >> { %v6756_v53 = vpop.eup %6755  ;;  %v4797_v35 = vadd.f32 1.0, %v6754_v60  ;;  %6767 = vpow2.f32 %v5916_v59  ;;  %v6077_v27 = vadd.f32 %v6076_v51, %v6075_v63  ;;  %v6114_v28 = vpop.f32.mrb[80].mxu0  ;;  %v4672_v16 = vadd.f32 %v6074_v12, %v4575_v5  ;;  %v4859_v63 = vld [vmem:[#allocation7] sm:$0xff]  ;;  %v4861_v51 = vld [vmem:[#allocation7 + $0x10] sm:$0xff] }
 0x834   : >> { %v6758_v9 = vpop.eup %6757  ;;  %v4795_v3 = vadd.f32 1.0, %v6756_v53  ;;  %v4761_v14 = vadd.f32 %v6114_v28, %v4664_v13  ;;  %v4752_v8 = vpop.f32.mrb[81].mxu0 }
 0x835   : >> { %v6760_v45 = vpop.eup %6759  ;;  %6769 = vrcp.f32 %v4797_v35  ;;  %v4798_v33 = vadd.f32 1.0, %v6758_v9  ;;  %v4753_v57 = vadd.f32 %v4752_v8, %v8938_v7  ;;  %v6115_v6 = vpop.f32.mrb[82].mxu0  ;;  %v4675_v43 = vadd.f32 %v6077_v27, %v4578_v10  ;;  %v4860_v27 = vld [vmem:[#allocation7 + $0x8] sm:$0xff] }
 0x836   : >> { %6771 = vrcp.f32 %v4795_v3  ;;  %v4796_v55 = vadd.f32 1.0, %v6760_v45  ;;  %v5921_v48 = vmul.f32 -1.442695, %v4761_v14  ;;  %v4764_v18 = vadd.f32 %v6115_v6, %v4667_v58  ;;  %v4755_v19 = vpop.f32.mrb[83].mxu0  ;;  %v4862_v3 = vld [vmem:[#allocation7 + $0x18] sm:$0xff] }
 0x837   : >> { %6773 = vrcp.f32 %v4798_v33  ;;  %v5919_v26 = vmul.f32 -1.442695, %v4753_v57  ;;  %v4756_v25 = vadd.f32 %v4755_v19, %v8941_v56  ;;  %v6078_v36 = vpop.f32.mrb[60].mxu1 }
 0x838   : >> { %6775 = vrcp.f32 %v4796_v55  ;;  %v5922_v20 = vmul.f32 -1.442695, %v4764_v18  ;;  %v6079_v17 = vpop.f32.mrb[61].mxu1 }
 0x839   : >> { %6777 = vpow2.f32 %v5921_v48  ;;  %v5920_v7 = vmul.f32 -1.442695, %v4756_v25  ;;  %v6080_v2 = vadd.f32 %v6079_v17, %v6078_v36  ;;  %v6081_v30 = vpop.f32.mrb[62].mxu1 }
 0x83a   : >> { %v6762_v1 = vpop.eup %6761  ;;  %6779 = vpow2.f32 %v5919_v26  ;;  %v6082_v39 = vpop.f32.mrb[63].mxu1 }
 0x83b   : >> { %v6764_v11 = vpop.eup %6763  ;;  %v4821_v24 = vadd.f32 1.0, %v6762_v1  ;;  %6781 = vpow2.f32 %v5922_v20  ;;  %v6083_v47 = vadd.f32 %v6082_v39, %v6081_v30  ;;  %v4680_v56 = vadd.f32 %v6080_v2, %v4583_v23  ;;  %v6118_v50 = vpop.f32.mrb[84].mxu0 }
 0x83c   : >> { %v6766_v29 = vpop.eup %6765  ;;  %v4819_v21 = vadd.f32 1.0, %v6764_v11  ;;  %6783 = vpow2.f32 %v5920_v7  ;;  %v4768_v15 = vpop.f32.mrb[85].mxu0 }
 0x83d   : >> { %v6768_v13 = vpop.eup %6767  ;;  %6785 = vrcp.f32 %v4821_v24  ;;  %v4822_v44 = vadd.f32 1.0, %v6766_v29  ;;  %v4777_v42 = vadd.f32 %v6118_v50, %v4680_v56  ;;  %v4769_v54 = vadd.f32 %v4768_v15, %v4672_v16  ;;  %v6119_v32 = vpop.f32.mrb[86].mxu0  ;;  %v4895_v29 = vld [vmem:[%s9468_s8 + $0x20] sm:$0xff] (%p469_p4) }
 0x83e   : >> { %6787 = vrcp.f32 %v4819_v21  ;;  %v4820_v58 = vadd.f32 1.0, %v6768_v13  ;;  %v4683_v38 = vadd.f32 %v6083_v47, %v4586_v49  ;;  %v4771_v61 = vpop.f32.mrb[87].mxu0  ;;  %v4891_v49 = vld [vmem:[%s9468_s8] sm:$0xff] (%p469_p4)  ;;  %v4896_v21 = vld [vmem:[%s9468_s8 + $0x28] sm:$0xff] (%p469_p4) }
 0x83f   : >> { %v6770_v22 = vpop.eup %6769  ;;  %6789 = vrcp.f32 %v4822_v44  ;;  %v4772_v62 = vadd.f32 %v4771_v61, %v4675_v43 }
 0x840   : >> { %v6772_v4 = vpop.eup %6771  ;;  %6791 = vrcp.f32 %v4820_v58  ;;  %v4780_v46 = vadd.f32 %v6119_v32, %v4683_v38  ;;  %v4924_v32 = vld [vmem:[%s9468_s8 + $0x108] sm:$0xff] (%p469_p4)  ;;  %v4923_v58 = vld [vmem:[%s9468_s8 + $0x100] sm:$0xff] (%p469_p4) }
 0x841   : >> { %v6774_v0 = vpop.eup %6773  ;;  %6793 = vtanh.f32 %v4777_v42  ;;  %v4892_v42 = vld [vmem:[%s9468_s8 + $0x8] sm:$0xff] (%p469_p4) }
 0x842   : >> { %v6776_v41 = vpop.eup %6775  ;;  %6795 = vtanh.f32 %v4769_v54 }
 0x843   : >> { %v6778_v34 = vpop.eup %6777  ;;  %6797 = vtanh.f32 %v4780_v46 }
 0x844   : >> { %v6780_v37 = vpop.eup %6779  ;;  %6799 = vtanh.f32 %v4772_v62  ;;  %v4845_v60 = vadd.f32 1.0, %v6778_v34 }
 0x845   : >> { %v6782_v40 = vpop.eup %6781  ;;  %v4843_v53 = vadd.f32 1.0, %v6780_v37 }
 0x846   : >> { %v6784_v5 = vpop.eup %6783  ;;  %v4846_v28 = vadd.f32 1.0, %v6782_v40  ;;  %6801 = vrcp.f32 %v4845_v60 }
 0x847   : >> { %v6786_v59 = vpop.eup %6785  ;;  %v4844_v14 = vadd.f32 1.0, %v6784_v5  ;;  %6803 = vrcp.f32 %v4843_v53  ;;  %v4900_v53 = vld [vmem:[%s9468_s8 + $0x48] sm:$0xff] (%p469_p4) }
 0x848   : >> { %v6788_v12 = vpop.eup %6787  ;;  %v4865_v45 = vmul.f32 %v6786_v59, %v4861_v51  ;;  %6805 = vrcp.f32 %v4846_v28  ;;  %v4897_v59 = vld [vmem:[%s9468_s8 + $0x30] sm:$0xff] (%p469_p4) }
 0x849   : >> { %v6790_v10 = vpop.eup %6789  ;;  %v4863_v9 = vmul.f32 %v6788_v12, %v4859_v63  ;;  %6807 = vrcp.f32 %v4844_v14  ;;  %v4893_v12 = vld [vmem:[%s9468_s8 + $0x10] sm:$0xff] (%p469_p4) }
 0x84a   : >> { %v6792_v35 = vpop.eup %6791  ;;  %v4866_v48 = vmul.f32 %v6790_v10, %v4862_v3  ;;  %v4929_v3 = vld [vmem:[%s9468_s8 + $0x130] sm:$0xff] (%p469_p4) }
 0x84b   : >> { %v6794_v16 = vpop.eup %6793  ;;  %v4864_v6 = vmul.f32 %v6792_v35, %v4860_v27  ;;  %v4899_v35 = vld [vmem:[%s9468_s8 + $0x40] sm:$0xff] (%p469_p4)  ;;  %v4925_v14 = vld [vmem:[%s9468_s8 + $0x110] sm:$0xff] (%p469_p4) }
 0x84c   : >> { %v6796_v8 = vpop.eup %6795  ;;  %v4869_v33 = vmul.f32 %v6794_v16, %v6770_v22 }
 0x84d   : >> { %v6798_v57 = vpop.eup %6797  ;;  %v4867_v43 = vmul.f32 %v6796_v8, %v6772_v4 }
 0x84e   : >> { %v6800_v55 = vpop.eup %6799  ;;  %v4873_v18 = vadd.f32 %v4869_v33, %v4865_v45  ;;  %v4870_v19 = vmul.f32 %v6798_v57, %v6774_v0  ;;  %v4928_v0 = vld [vmem:[%s9468_s8 + $0x128] sm:$0xff] (%p469_p4) }
 0x84f   : >> { %v4871_v26 = vadd.f32 %v4867_v43, %v4863_v9  ;;  %v4868_v25 = vmul.f32 %v6800_v55, %v6776_v41  ;;  %v4927_v41 = vld [vmem:[%s9468_s8 + $0x120] sm:$0xff] (%p469_p4) }
 0x850   : >> { %6809 = vtanh.f32 %v4873_v18  ;;  %4885 = vst.msk [vmem:[#allocation7 + $0x10] sm:$0xff] %vm9733_vm9, %v4873_v18  ;;  %v4874_v36 = vadd.f32 %v4870_v19, %v4866_v48  ;;  %v6802_v20 = vpop.eup %6801  ;;  %vm9749_vm9 = vmmov (%p469_p4), %vm9745_vm0  ;;  %v4931_v43 = vld [vmem:[%s9468_s8 + $0x140] sm:$0xff] (%p469_p4) }
 0x851   : >> { %6811 = vtanh.f32 %v4871_v26  ;;  %4883 = vst.msk [vmem:[#allocation7] sm:$0xff] %vm9734_vm10, %v4871_v26  ;;  %v4872_v52 = vadd.f32 %v4868_v25, %v4864_v6  ;;  %v6804_v17 = vpop.eup %6803  ;;  %vm9750_vm10 = vmmov (%p469_p4), %vm9745_vm0  ;;  %v4932_v6 = vld [vmem:[%s9468_s8 + $0x148] sm:$0xff] (%p469_p4)  ;;  %v4898_v26 = vld [vmem:[%s9468_s8 + $0x38] sm:$0xff] (%p469_p4) }
 0x852   : >> { %6813 = vtanh.f32 %v4874_v36  ;;  %4886 = vst.msk [vmem:[#allocation7 + $0x18] sm:$0xff] %vm9735_vm14, %v4874_v36  ;;  %v6806_v23 = vpop.eup %6805  ;;  %vm9751_vm14 = vmmov (%p469_p4), %vm9745_vm0  ;;  %v4894_v25 = vld [vmem:[%s9468_s8 + $0x18] sm:$0xff] (%p469_p4) }
 0x853   : >> { %6815 = vtanh.f32 %v4872_v52  ;;  %4884 = vst.msk [vmem:[#allocation7 + $0x8] sm:$0xff] %vm9736_vm12, %v4872_v52  ;;  %v6808_v7 = vpop.eup %6807  ;;  %vm9752_vm12 = vmmov (%p469_p4), %vm9745_vm0 }
 0x85a   : >> { %v6810_v2 = vpop.eup %6809 }
 0x85b   : >> { %v6812_v30 = vpop.eup %6811  ;;  %v8958_v1 = vmul.f32 %v6810_v2, %v6802_v20 }
 0x85c   : >> { %v6814_v39 = vpop.eup %6813  ;;  %v8960_v11 = vmul.f32 %v6812_v30, %v6804_v17  ;;  %471 = sbr.rel (!%p469_p4) target bundleno = 42 (0x2a), region = 98 }
 0x85d   : >> { %v6816_v31 = vpop.eup %6815  ;;  %v8962_v24 = vmul.f32 %v6814_v39, %v6806_v23  ;;  %v4961_v10 = vmul.f32 (%p469_p4), %v4897_v59, %v8958_v1  ;;  %v4957_v51 = vmul.f32 (%p469_p4), %v4893_v12, %v8958_v1  ;;  %v4993_v33 = vmul.f32 (%p469_p4), %v4929_v3, %v8958_v1  ;;  %v4903_v23 = vld [vmem:[%s9468_s8 + $0x60] sm:$0xff] (%p469_p4)  ;;  %v4908_v59 = vld [vmem:[%s9468_s8 + $0x88] sm:$0xff] (%p469_p4) }
 0x85e   : >> { %v8964_v47 = vmul.f32 %v6816_v31, %v6808_v7  ;;  %v4959_v15 = vmul.f32 (%p469_p4), %v4895_v29, %v8960_v11  ;;  %v4955_v13 = vmul.f32 (%p469_p4), %v4891_v49, %v8960_v11  ;;  %v4987_v46 = vmul.f32 (%p469_p4), %v4923_v58, %v8960_v11  ;;  %v4901_v7 = vld [vmem:[%s9468_s8 + $0x50] sm:$0xff] (%p469_p4)  ;;  %v4907_v12 = vld [vmem:[%s9468_s8 + $0x80] sm:$0xff] (%p469_p4)  ;;  %v4940_v3 = vld [vmem:[%s9468_s8 + $0x188] sm:$0xff] (%p469_p4) }
 0x85f   : >> { %v4888_v56 = vpack.c.bf16 %v8962_v24, %v8958_v1  ;;  %v4991_v5 = vmul.f32 (%p469_p4), %v4927_v41, %v8960_v11  ;;  %v5037_v27 = vsel (%p469_p4), %vm9747_vm13, %v4961_v10, 0.0  ;;  %v5025_v28 = vsel (%p469_p4), %vm9748_vm2, %v4957_v51, 0.0  ;;  %v4902_v41 = vld [vmem:[%s9468_s8 + $0x58] sm:$0xff] (%p469_p4)  ;;  %vm9762_vm13 = vmmov (%p469_p4), %vm9745_vm0 }
 0x860   : >> { %v4887_v50 = vpack.c.bf16 %v8964_v47, %v8960_v11  ;;  %v4960_v44 = vmul.f32 (%p469_p4), %v4896_v21, %v8964_v47  ;;  %v4956_v54 = vmul.f32 (%p469_p4), %v4892_v42, %v8964_v47  ;;  %v5031_v38 = vsel (%p469_p4), %vm9739_vm3, %v4959_v15, 0.0  ;;  %vm9755_vm3 = vmmov (%p469_p4), %vm9745_vm0 }
 0x861   : >> { %4890 = vst.msk [vmem:[#allocation6 + $0x38] sm:$0xff] %vm9737_vm11, %v4888_v56  ;;  %v5019_v61 = vsel (%p469_p4), %vm9740_vm4, %v4955_v13, 0.0  ;;  %5032 = vadd.xlane.f32.xlu1 (%p469_p4), %v5031_v38  ;;  %v4988_v4 = vmul.f32 (%p469_p4), %v4924_v32, %v8964_v47  ;;  %v5115_v37 = vsel (%p469_p4), %vm9744_vm8, %v4987_v46, 0.0  ;;  %v4992_v40 = vmul.f32 (%p469_p4), %v4928_v0, %v8964_v47  ;;  %vm9753_vm11 = vmmov (%p469_p4), %vm9745_vm0  ;;  %v4926_v56 = vld [vmem:[%s9468_s8 + $0x118] sm:$0xff] (%p469_p4)  ;;  %v4933_v13 = vld [vmem:[%s9468_s8 + $0x150] sm:$0xff] (%p469_p4) }
 0x862   : >> { %4889 = vst.msk [vmem:[#allocation6 + $0x28] sm:$0xff] %vm9738_vm1, %v4887_v50  ;;  %5020 = vadd.xlane.f32.xlu0 (%p469_p4), %v5019_v61  ;;  %v5034_v22 = vsel (%p469_p4), %vm9741_vm5, %v4960_v44, 0.0  ;;  %v5022_v62 = vsel (%p469_p4), %vm9742_vm6, %v4956_v54, 0.0  ;;  %v5127_v60 = vsel (%p469_p4), %vm9746_vm15, %v4991_v5, 0.0  ;;  %v4964_v16 = vmul.f32 (%p469_p4), %v4900_v53, %v8964_v47  ;;  %vm9754_vm1 = vmmov (%p469_p4), %vm9745_vm0  ;;  %v4904_v50 = vld [vmem:[%s9468_s8 + $0x68] sm:$0xff] (%p469_p4)  ;;  %v4930_v44 = vld [vmem:[%s9468_s8 + $0x138] sm:$0xff] (%p469_p4) }
 0x863   : > { %v5118_v34 = vsel %vm9743_vm7, %v4988_v4, 0.0  ;;  %v5130_v63 = vsel %vm9745_vm0, %v4992_v40, 0.0  ;;  %v4963_v9 = vmul.f32 %v4899_v35, %v8960_v11  ;;  %v4989_v57 = vmul.f32 %v4925_v14, %v8958_v1  ;;  %vm9756_vm4 = vmmov %vm9745_vm0  ;;  %v4936_v38 = vld [vmem:[%s9468_s8 + $0x168] sm:$0xff]  ;;  %v4935_v61 = vld [vmem:[%s9468_s8 + $0x160] sm:$0xff] }
 0x864   : > { %v5046_v8 = vsel %vm9749_vm9, %v4964_v16, 0.0  ;;  %v5133_v55 = vsel %vm9751_vm14, %v4993_v33, 0.0  ;;  %v4996_v18 = vmul.f32 %v4932_v6, %v8964_v47  ;;  %v4995_v19 = vmul.f32 %v4931_v43, %v8960_v11  ;;  %vm9757_vm5 = vmmov %vm9745_vm0  ;;  %v4905_v0 = vld [vmem:[%s9468_s8 + $0x70] sm:$0xff]  ;;  %v4934_v35 = vld [vmem:[%s9468_s8 + $0x158] sm:$0xff] }
 0x865   : > { %5035 = vadd.xlane.f32.xlu1 %v5034_v22  ;;  %v5043_v45 = vsel %vm9750_vm10, %v4963_v9, 0.0  ;;  %v5121_v48 = vsel %vm9752_vm12, %v4989_v57, 0.0  ;;  %v4962_v20 = vmul.f32 %v4898_v26, %v8962_v24  ;;  %v4958_v17 = vmul.f32 %v4894_v25, %v8962_v24  ;;  %vm9758_vm6 = vmmov %vm9745_vm0  ;;  %v4937_v53 = vld [vmem:[%s9468_s8 + $0x170] sm:$0xff]  ;;  %v4939_v14 = vld [vmem:[%s9468_s8 + $0x180] sm:$0xff] }
 0x866   : > { %5023 = vadd.xlane.f32.xlu0 %v5022_v62  ;;  %v5142_v36 = vsel %vm9753_vm11, %v4996_v18, 0.0  ;;  %v5139_v52 = vsel %vm9754_vm1, %v4995_v19, 0.0  ;;  %v4967_v39 = vmul.f32 %v4903_v23, %v8960_v11  ;;  %v4965_v31 = vmul.f32 %v4901_v7, %v8958_v1  ;;  %vm9759_vm7 = vmmov %vm9745_vm0  ;;  %v4909_v6 = vld [vmem:[%s9468_s8 + $0x90] sm:$0xff]  ;;  %v4906_v43 = vld [vmem:[%s9468_s8 + $0x78] sm:$0xff] }
 0x867   : > { %v5040_v2 = vsel %vm9755_vm3, %v4962_v20, 0.0  ;;  %v5028_v30 = vsel %vm9756_vm4, %v4958_v17, 0.0  ;;  %v4990_v21 = vmul.f32 %v4926_v56, %v8962_v24  ;;  %v4968_v15 = vmul.f32 %v4904_v50, %v8964_v47  ;;  %vm9760_vm8 = vmmov %vm9745_vm0  ;;  %v4912_v26 = vld [vmem:[%s9468_s8 + $0xa8] sm:$0xff]  ;;  %v4911_v25 = vld [vmem:[%s9468_s8 + $0xa0] sm:$0xff] }
 0x868   : > { %v5055_v29 = vsel %vm9757_vm5, %v4967_v39, 0.0  ;;  %v5049_v49 = vsel %vm9758_vm6, %v4965_v31, 0.0  ;;  %v4997_v32 = vmul.f32 %v4933_v13, %v8958_v1  ;;  %v4994_v58 = vmul.f32 %v4930_v44, %v8962_v24  ;;  %vm9761_vm15 = vmmov %vm9745_vm0  ;;  %v4941_v23 = vld [vmem:[%s9468_s8 + $0x190] sm:$0xff]  ;;  %v4938_v7 = vld [vmem:[%s9468_s8 + $0x178] sm:$0xff] }
 0x869   : > { %5119 = vadd.xlane.f32.xlu1 %v5118_v34  ;;  %v5124_v42 = vsel %vm9759_vm7, %v4990_v21, 0.0  ;;  %v5058_v54 = vsel %vm9760_vm8, %v4968_v15, 0.0  ;;  %v5000_v4 = vmul.f32 %v4936_v38, %v8964_v47  ;;  %v4999_v46 = vmul.f32 %v4935_v61, %v8960_v11  ;;  %vm9763_vm2 = vmmov %vm9745_vm0  ;;  %v4944_v56 = vld [vmem:[%s9468_s8 + $0x1a8] sm:$0xff]  ;;  %v4943_v50 = vld [vmem:[%s9468_s8 + $0x1a0] sm:$0xff] }
 0x86a   : > { %5116 = vadd.xlane.f32.xlu0 %v5115_v37  ;;  %v5145_v22 = vsel %vm9745_vm0, %v4997_v32, 0.0  ;;  %v5136_v62 = vsel %vm9761_vm15, %v4994_v58, 0.0  ;;  %v4969_v40 = vmul.f32 %v4905_v0, %v8958_v1  ;;  %v4966_v5 = vmul.f32 %v4902_v41, %v8962_v24  ;;  %vm9764_vm9 = vmmov %vm9745_vm0  ;;  %v4913_v13 = vld [vmem:[%s9468_s8 + $0xb0] sm:$0xff]  ;;  %v4910_v44 = vld [vmem:[%s9468_s8 + $0x98] sm:$0xff] }
 0x86b   : > { %v5154_v34 = vsel %vm9762_vm13, %v5000_v4, 0.0  ;;  %v5151_v37 = vsel %vm9763_vm2, %v4999_v46, 0.0  ;;  %vm9765_vm10 = vmmov %vm9745_vm0  ;;  %v4972_v10 = vmul.f32 %v4908_v59, %v8964_v47  ;;  %v4971_v51 = vmul.f32 %v4907_v12, %v8960_v11  ;;  %v4916_v38 = vld [vmem:[%s9468_s8 + $0xc8] sm:$0xff]  ;;  %v4915_v61 = vld [vmem:[%s9468_s8 + $0xc0] sm:$0xff] }
 0x86c   : > { %vm9766_vm14 = vmmov %vm9745_vm0  ;;  %v5001_v16 = vmul.f32 %v4937_v53, %v8958_v1  ;;  %v4998_v9 = vmul.f32 %v4934_v35, %v8962_v24  ;;  %v5004_v33 = vmul.f32 %v4940_v3, %v8964_v47  ;;  %v5003_v57 = vmul.f32 %v4939_v14, %v8960_v11  ;;  %v4945_v0 = vld [vmem:[%s9468_s8 + $0x1b0] sm:$0xff]  ;;  %v4942_v41 = vld [vmem:[%s9468_s8 + $0x198] sm:$0xff] }
 0x86d   : > { %5131 = vadd.xlane.f32.xlu1 %v5130_v63  ;;  %v5061_v63 = vsel %vm9764_vm9, %v4969_v40, 0.0  ;;  %vm9767_vm12 = vmmov %vm9745_vm0  ;;  %v4973_v18 = vmul.f32 %v4909_v6, %v8958_v1  ;;  %v4970_v19 = vmul.f32 %v4906_v43, %v8962_v24  ;;  %v4976_v20 = vmul.f32 %v4912_v26, %v8964_v47  ;;  %v4948_v59 = vld [vmem:[%s9468_s8 + $0x1c8] sm:$0xff]  ;;  %v4947_v12 = vld [vmem:[%s9468_s8 + $0x1c0] sm:$0xff] }
 0x86e   : > { %5128 = vadd.xlane.f32.xlu0 %v5127_v60  ;;  %v5052_v60 = vsel %vm9765_vm10, %v4966_v5, 0.0  ;;  %vm9768_vm11 = vmmov %vm9745_vm0  ;;  %v4975_v17 = vmul.f32 %v4911_v25, %v8960_v11  ;;  %v5005_v39 = vmul.f32 %v4941_v23, %v8958_v1  ;;  %v5002_v31 = vmul.f32 %v4938_v7, %v8962_v24  ;;  %v4917_v53 = vld [vmem:[%s9468_s8 + $0xd0] sm:$0xff]  ;;  %v4914_v35 = vld [vmem:[%s9468_s8 + $0xb8] sm:$0xff] }
 0x86f   : > { %vm9769_vm1 = vmmov %vm9745_vm0  ;;  %v5008_v21 = vmul.f32 %v4944_v56, %v8964_v47  ;;  %v5007_v15 = vmul.f32 %v4943_v50, %v8960_v11  ;;  %v4977_v32 = vmul.f32 %v4913_v13, %v8958_v1  ;;  %v4974_v58 = vmul.f32 %v4910_v44, %v8962_v24  ;;  %v4920_v3 = vld [vmem:[%s9468_s8 + $0xe8] sm:$0xff]  ;;  %v4919_v14 = vld [vmem:[%s9468_s8 + $0xe0] sm:$0xff] }
 0x870   : > { %vm9770_vm3 = vmmov %vm9745_vm0  ;;  %v4980_v4 = vmul.f32 %v4916_v38, %v8964_v47  ;;  %v4979_v46 = vmul.f32 %v4915_v61, %v8960_v11  ;;  %v5009_v40 = vmul.f32 %v4945_v0, %v8958_v1  ;;  %v5006_v5 = vmul.f32 %v4942_v41, %v8962_v24  ;;  %v4949_v6 = vld [vmem:[%s9468_s8 + $0x1d0] sm:$0xff]  ;;  %v4946_v43 = vld [vmem:[%s9468_s8 + $0x1b8] sm:$0xff] }
 0x871   : > { %5038 = vadd.xlane.f32.xlu1 %v5037_v27  ;;  %v5070_v27 = vsel %vm9766_vm14, %v4972_v10, 0.0  ;;  %vm9771_vm4 = vmmov %vm9745_vm0  ;;  %v5012_v10 = vmul.f32 %v4948_v59, %v8964_v47  ;;  %v4952_v26 = vld [vmem:[%s9468_s8 + $0x1e8] sm:$0xff]  ;;  %v4951_v25 = vld [vmem:[%s9468_s8 + $0x1e0] sm:$0xff] }
 0x872   : > { %5026 = vadd.xlane.f32.xlu0 %v5025_v28  ;;  %v5067_v28 = vsel %vm9767_vm12, %v4971_v51, 0.0  ;;  %vm9772_vm5 = vmmov %vm9745_vm0  ;;  %v5011_v51 = vmul.f32 %v4947_v12, %v8960_v11  ;;  %v4921_v23 = vld [vmem:[%s9468_s8 + $0xf0] sm:$0xff]  ;;  %v4918_v7 = vld [vmem:[%s9468_s8 + $0xd8] sm:$0xff] }
 0x873   : > { %vm9773_vm6 = vmmov %vm9745_vm0 }
 0x874   : > { %vm9774_vm7 = vmmov %vm9745_vm0 }
 0x875   : > { %5047 = vadd.xlane.f32.xlu1 %v5046_v8  ;;  %v5157_v8 = vsel %vm9768_vm11, %v5001_v16, 0.0  ;;  %vm9775_vm8 = vmmov %vm9745_vm0  ;;  %v4981_v16 = vmul.f32 %v4917_v53, %v8958_v1 }
 0x876   : > { %5044 = vadd.xlane.f32.xlu0 %v5043_v45  ;;  %v5148_v45 = vsel %vm9769_vm1, %v4998_v9, 0.0  ;;  %vm9776_vm15 = vmmov %vm9745_vm0  ;;  %v4978_v9 = vmul.f32 %v4914_v35, %v8962_v24 }
 0x877   : > { %vm9777_vm13 = vmmov %vm9745_vm0 }
 0x878   : > { %vm9778_vm2 = vmmov %vm9745_vm0 }
 0x879   : > { %5134 = vadd.xlane.f32.xlu1 %v5133_v55  ;;  %v5166_v55 = vsel %vm9770_vm3, %v5004_v33, 0.0  ;;  %vm9779_vm9 = vmmov %vm9745_vm0  ;;  %v4984_v33 = vmul.f32 %v4920_v3, %v8964_v47 }
 0x87a   : > { %5122 = vadd.xlane.f32.xlu0 %v5121_v48  ;;  %v5163_v48 = vsel %vm9771_vm4, %v5003_v57, 0.0  ;;  %vm9780_vm10 = vmmov %vm9745_vm0  ;;  %v4983_v57 = vmul.f32 %v4919_v14, %v8960_v11 }
 0x87b   : > { %vm9781_vm14 = vmmov %vm9745_vm0 }
 0x87c   : > { %vm9782_vm12 = vmmov %vm9745_vm0 }
 0x87d   : > { %5143 = vadd.xlane.f32.xlu1 %v5142_v36  ;;  %v5073_v36 = vsel %vm9772_vm5, %v4973_v18, 0.0  ;;  %vm9783_vm11 = vmmov %vm9745_vm0  ;;  %v5013_v18 = vmul.f32 %v4949_v6, %v8958_v1 }
 0x87e   : > { %5140 = vadd.xlane.f32.xlu0 %v5139_v52  ;;  %v5064_v52 = vsel %vm9773_vm6, %v4970_v19, 0.0  ;;  %vm9784_vm1 = vmmov %vm9745_vm0  ;;  %v5010_v19 = vmul.f32 %v4946_v43, %v8962_v24 }
 0x87f   : > { %vm9785_vm3 = vmmov %vm9745_vm0 }
 0x880   : > { %vm9786_vm4 = vmmov %vm9745_vm0 }
 0x881   : > { %5041 = vadd.xlane.f32.xlu1 %v5040_v2  ;;  %v5082_v2 = vsel %vm9774_vm7, %v4976_v20, 0.0  ;;  %vm9787_vm5 = vmmov %vm9745_vm0  ;;  %v5016_v20 = vmul.f32 %v4952_v26, %v8964_v47  ;;  %v4982_v47 = vmul.f32 %v4918_v7, %v8962_v24 }
 0x882   : > { %5029 = vadd.xlane.f32.xlu0 %v5028_v30  ;;  %v5079_v30 = vsel %vm9775_vm8, %v4975_v17, 0.0  ;;  %vm9788_vm6 = vmmov %vm9745_vm0  ;;  %v5015_v17 = vmul.f32 %v4951_v25, %v8960_v11  ;;  %v4953_v11 = vld [vmem:[%s9468_s8 + $0x1f0] sm:$0xff] }
 0x883   : > { %vm9789_vm7 = vmmov %vm9745_vm0 }
 0x884   : > { %vm9790_vm8 = vmmov %vm9745_vm0 }
 0x885   : > { %5056 = vadd.xlane.f32.xlu1 %v5055_v29  ;;  %v5169_v29 = vsel %vm9745_vm0, %v5005_v39, 0.0  ;;  %v4985_v39 = vmul.f32 %v4921_v23, %v8958_v1 }
 0x886   : > { %5050 = vadd.xlane.f32.xlu0 %v5049_v49  ;;  %v5160_v49 = vsel %vm9776_vm15, %v5002_v31, 0.0  ;;  %vm9791_vm15 = vmmov %vm9745_vm0  ;;  %v4950_v31 = vld [vmem:[%s9468_s8 + $0x1d8] sm:$0xff] }
 0x889   : > { %5125 = vadd.xlane.f32.xlu1 %v5124_v42  ;;  %v5178_v42 = vsel %vm9777_vm13, %v5008_v21, 0.0  ;;  %vm9792_vm13 = vmmov %vm9745_vm0  ;;  %v4954_v21 = vld [vmem:[%s9468_s8 + $0x1f8] sm:$0xff] }
 0x88a   : > { %5059 = vadd.xlane.f32.xlu0 %v5058_v54  ;;  %v5175_v54 = vsel %vm9778_vm2, %v5007_v15, 0.0  ;;  %vm9793_vm2 = vmmov %vm9745_vm0  ;;  %v4922_v15 = vld [vmem:[%s9468_s8 + $0xf8] sm:$0xff] }
 0x88d   : > { %5146 = vadd.xlane.f32.xlu1 %v5145_v22  ;;  %v5085_v22 = vsel %vm9779_vm9, %v4977_v32, 0.0  ;;  %vm9794_vm9 = vmmov %vm9745_vm0 }
 0x88e   : > { %5137 = vadd.xlane.f32.xlu0 %v5136_v62  ;;  %v5076_v62 = vsel %vm9780_vm10, %v4974_v58, 0.0  ;;  %v5109_v56 = vsel %vm9794_vm9, %v4985_v39, 0.0  ;;  %vm9795_vm10 = vmmov %vm9745_vm0  ;;  %v9800_v58 = vld [vmem:[#allocation11_spill] sm:$0xff]  ;;  %vm5608_vm9 = vcmask 261120  }
 0x88f   : > { %v5100_v50 = vsel %vm9795_vm10, %v4982_v47, 0.0  ;;  %v5279_v38 = vadd.s32 4294967288, %v9800_v58  ;;  %vm9802_vm10 = vcmask 7168  }
 0x891   : > { %5155 = vadd.xlane.f32.xlu1 %v5154_v34  ;;  %v5094_v34 = vsel %vm9781_vm14, %v4980_v4, 0.0  ;;  %vm9796_vm14 = vmmov %vm9745_vm0 }
 0x892   : > { %5152 = vadd.xlane.f32.xlu0 %v5151_v37  ;;  %v5091_v37 = vsel %vm9782_vm12, %v4979_v46, 0.0  ;;  %vm9797_vm12 = vmmov %vm9745_vm0 }
 0x895   : > { %5062 = vadd.xlane.f32.xlu1 %v5061_v63  ;;  %v5181_v63 = vsel %vm9783_vm11, %v5009_v40, 0.0  ;;  %vm9798_vm11 = vmmov %vm9745_vm0 }
 0x896   : > { %5053 = vadd.xlane.f32.xlu0 %v5052_v60  ;;  %v5172_v60 = vsel %vm9784_vm1, %v5006_v5, 0.0  ;;  %vm9799_vm1 = vmmov %vm9745_vm0 }
 0x899   : > { %5071 = vadd.xlane.f32.xlu1 %v5070_v27  ;;  %v5190_v27 = vsel %vm9785_vm3, %v5012_v10, 0.0  ;;  %vm5284_vm3 = vcmask 130112  }
 0x89a   : > { %5068 = vadd.xlane.f32.xlu0 %v5067_v28  ;;  %v5187_v28 = vsel %vm9786_vm4, %v5011_v51, 0.0  ;;  %v5286_v51 = vadd.s32 4294967280, %v9800_v58  ;;  %vm5291_vm4 = vcmask 195712  }
 0x89d   : > { %5158 = vadd.xlane.f32.xlu1 %v5157_v8  ;;  %v5097_v8 = vsel %vm9787_vm5, %v4981_v16, 0.0  ;;  %vm5298_vm5 = vcmask 261312  }
 0x89e   : > { %5149 = vadd.xlane.f32.xlu0 %v5148_v45  ;;  %v5088_v45 = vsel %vm9788_vm6, %v4978_v9, 0.0  ;;  %vm5585_vm6 = vcmask 1041409  }
 0x8a1   : > { %5167 = vadd.xlane.f32.xlu1 %v5166_v55  ;;  %v5106_v55 = vsel %vm9789_vm7, %v4984_v33, 0.0  ;;  %vm5587_vm7 = vcmask 1042434  }
 0x8a2   : > { %5164 = vadd.xlane.f32.xlu0 %v5163_v48  ;;  %v5103_v48 = vsel %vm9790_vm8, %v4983_v57, 0.0  ;;  %vm5589_vm8 = vcmask 1043459  }
 0x8a5   : > { %5074 = vadd.xlane.f32.xlu1 %v5073_v36  ;;  %v5193_v36 = vsel %vm9745_vm0, %v5013_v18, 0.0  ;;  %vm5591_vm0 = vcmask 1044484  }
 0x8a6   : > { %5065 = vadd.xlane.f32.xlu0 %v5064_v52  ;;  %v5184_v52 = vsel %vm9791_vm15, %v5010_v19, 0.0  ;;  %vm5593_vm15 = vcmask 1045509  }
 0x8a9   : > { %5083 = vadd.xlane.f32.xlu1 %v5082_v2  ;;  %v5202_v2 = vsel %vm9792_vm13, %v5016_v20, 0.0  ;;  %v5293_v20 = vadd.s32 4294967272, %v9800_v58  ;;  %vm5595_vm13 = vcmask 1046534  }
 0x8aa   : > { %5080 = vadd.xlane.f32.xlu0 %v5079_v30  ;;  %v5199_v30 = vsel %vm9793_vm2, %v5015_v17, 0.0  ;;  %vm5597_vm2 = vcmask 1047559  }
 0x8ad   : > { %5170 = vadd.xlane.f32.xlu1 %v5169_v29  ;;  %v5017_v29 = vmul.f32 %v4953_v11, %v8958_v1  ;;  %v4986_v1 = vmul.f32 %v4922_v15, %v8962_v24 }
 0x8ae   : > { %5161 = vadd.xlane.f32.xlu0 %v5160_v49  ;;  %v5014_v49 = vmul.f32 %v4950_v31, %v8962_v24 }
 0x8af   : > { %v5205_v13 = vsel %vm9796_vm14, %v5017_v29, 0.0  ;;  %v5112_v32 = vsel %vm9799_vm1, %v4986_v1, 0.0  ;;  %vm9803_vm14 = vmmov %vm9802_vm10 }
 0x8b0   : > { %v5196_v44 = vsel %vm9797_vm12, %v5014_v49, 0.0 }
 0x8b1   : > { %5179 = vadd.xlane.f32.xlu1 %v5178_v42  ;;  %v5018_v42 = vmul.f32 %v4954_v21, %v8962_v24 }
 0x8b2   : > { %5176 = vadd.xlane.f32.xlu0 %v5175_v54 }
 0x8b3   : > { %v5208_v54 = vsel %vm9798_vm11, %v5018_v42, 0.0 }
 0x8b5   : > { %5086 = vadd.xlane.f32.xlu1 %v5085_v22 }
 0x8b6   : > { %5077 = vadd.xlane.f32.xlu0 %v5076_v62  ;;  %v9801_v62 = vld [vmem:[#allocation18_spill] sm:$0xff] }
 0x8b7   : > { %v9298_v4 = vsub.s32 %v9800_v58, %v9801_v62  ;;  %v9301_v46 = vsub.s32 %v5279_v38, %v9801_v62  ;;  %v9316_v9 = vsub.s32 %v5286_v51, %v9801_v62  ;;  %v9334_v47 = vsub.s32 %v5293_v20, %v9801_v62 }
 0x8b9   : > { %5095 = vadd.xlane.f32.xlu1 %v5094_v34 }
 0x8ba   : > { %5092 = vadd.xlane.f32.xlu0 %v5091_v37 }
 0x8bd   : > { %5182 = vadd.xlane.f32.xlu1 %v5181_v63 }
 0x8be   : > { %5173 = vadd.xlane.f32.xlu0 %v5172_v60 }
 0x8c1   : > { %5191 = vadd.xlane.f32.xlu1 %v5190_v27 }
 0x8c2   : > { %5188 = vadd.xlane.f32.xlu0 %v5187_v28 }
 0x8c5   : > { %5098 = vadd.xlane.f32.xlu1 %v5097_v8 }
 0x8c6   : > { %5089 = vadd.xlane.f32.xlu0 %v5088_v45 }
 0x8c9   : > { %5107 = vadd.xlane.f32.xlu1 %v5106_v55 }
 0x8ca   : > { %5104 = vadd.xlane.f32.xlu0 %v5103_v48 }
 0x8cd   : > { %5194 = vadd.xlane.f32.xlu1 %v5193_v36 }
 0x8ce   : > { %5185 = vadd.xlane.f32.xlu0 %v5184_v52 }
 0x8d1   : > { %5203 = vadd.xlane.f32.xlu1 %v5202_v2 }
 0x8d2   : > { %5200 = vadd.xlane.f32.xlu0 %v5199_v30 }
 0x8d5   : > { %5110 = vadd.xlane.f32.xlu1 %v5109_v56 }
 0x8d6   : > { %5101 = vadd.xlane.f32.xlu0 %v5100_v50 }
 0x8d9   : > { %5206 = vadd.xlane.f32.xlu1 %v5205_v13 }
 0x8da   : > { %5197 = vadd.xlane.f32.xlu0 %v5196_v44 }
 0x8dd   : > { %5209 = vadd.xlane.f32.xlu1 %v5208_v54 }
 0x8de   : > { %5113 = vadd.xlane.f32.xlu0 %v5112_v32 }
 0x8ee   : > { %v5033_v61 = vpop.xlane.xlu1 %5032 }
 0x8ef   : > { %v5021_v22 = vpop.xlane.xlu0 %5020  ;;  %v5303_v41 = vrot.slane %v5033_v61, %v9298_v4 }
 0x8f0   : > { %v5278_v34 = vrot.slane %v5021_v22, %v9298_v4 }
 0x8f2   : > { %v5036_v24 = vpop.xlane.xlu1 %5035 }
 0x8f3   : > { %v5024_v0 = vpop.xlane.xlu0 %5023  ;;  %v5307_v37 = vrot.slane %v5036_v24, %v9301_v46 }
 0x8f4   : > { %v5283_v40 = vrot.slane %v5024_v0, %v9301_v46 }
 0x8f5   : > { %v5308_v5 = vsel %vm5284_vm3, %v5307_v37, %v5303_v41 }
 0x8f6   : > { %v5285_v59 = vsel %vm5284_vm3, %v5283_v40, %v5278_v34  ;;  %v5120_v12 = vpop.xlane.xlu1 %5119 }
 0x8f7   : > { %v5117_v63 = vpop.xlane.xlu0 %5116  ;;  %v5440_v60 = vrot.slane %v5120_v12, %v9301_v46 }
 0x8f8   : > { %v5436_v10 = vrot.slane %v5117_v63, %v9298_v4 }
 0x8fa   : > { %v5441_v53 = vsel %vm5284_vm3, %v5440_v60, %v5436_v10  ;;  %v5132_v35 = vpop.xlane.xlu1 %5131 }
 0x8fb   : > { %v5129_v27 = vpop.xlane.xlu0 %5128  ;;  %v5459_v28 = vrot.slane %v5132_v35, %v9301_v46 }
 0x8fc   : > { %v5455_v16 = vrot.slane %v5129_v27, %v9298_v4 }
 0x8fe   : > { %v5460_v3 = vsel %vm5284_vm3, %v5459_v28, %v5455_v16  ;;  %v5039_v14 = vpop.xlane.xlu1 %5038 }
 0x8ff   : > { %v5027_v8 = vpop.xlane.xlu0 %5026  ;;  %v5312_v45 = vrot.slane %v5039_v14, %v9316_v9 }
 0x900   : > { %v5290_v33 = vrot.slane %v5027_v8, %v9316_v9 }
 0x901   : > { %v5313_v57 = vsel %vm5291_vm4, %v5312_v45, %v5308_v5 }
 0x902   : > { %v5292_v6 = vsel %vm5291_vm4, %v5290_v33, %v5285_v59  ;;  %v5048_v43 = vpop.xlane.xlu1 %5047 }
 0x903   : > { %v5045_v55 = vpop.xlane.xlu0 %5044  ;;  %v5326_v48 = vrot.slane %v5048_v43, %v9301_v46 }
 0x904   : > { %v5322_v18 = vrot.slane %v5045_v55, %v9298_v4 }
 0x906   : > { %v5327_v19 = vsel %vm5284_vm3, %v5326_v48, %v5322_v18  ;;  %v5135_v26 = vpop.xlane.xlu1 %5134 }
 0x907   : > { %v5123_v25 = vpop.xlane.xlu0 %5122  ;;  %v5464_v36 = vrot.slane %v5135_v26, %v9316_v9 }
 0x908   : > { %v5445_v52 = vrot.slane %v5123_v25, %v9316_v9 }
 0x909   : > { %v5465_v17 = vsel %vm5291_vm4, %v5464_v36, %v5460_v3 }
 0x90a   : > { %v5446_v23 = vsel %vm5291_vm4, %v5445_v52, %v5441_v53  ;;  %v5144_v7 = vpop.xlane.xlu1 %5143 }
 0x90b   : > { %v5141_v2 = vpop.xlane.xlu0 %5140  ;;  %v5478_v30 = vrot.slane %v5144_v7, %v9301_v46 }
 0x90c   : > { %v5474_v39 = vrot.slane %v5141_v2, %v9298_v4 }
 0x90e   : > { %v5479_v11 = vsel %vm5284_vm3, %v5478_v30, %v5474_v39  ;;  %v5042_v31 = vpop.xlane.xlu1 %5041 }
 0x90f   : > { %v5030_v56 = vpop.xlane.xlu0 %5029  ;;  %v5317_v50 = vrot.slane %v5042_v31, %v9334_v47 }
 0x910   : > { %v5297_v29 = vrot.slane %v5030_v56, %v9334_v47 }
 0x911   : > { %v5318_v49 = vsel %vm5298_vm5, %v5317_v50, %v5313_v57 }
 0x912   : > { %v5299_v21 = vsel %vm5298_vm5, %v5297_v29, %v5292_v6  ;;  %v5057_v13 = vpop.xlane.xlu1 %5056 }
 0x913   : > { %v5586_v15 = vsel %vm5585_vm6, %v5318_v49, %v5299_v21  ;;  %v5051_v44 = vpop.xlane.xlu0 %5050  ;;  %v5341_v58 = vrot.slane %v5057_v13, %v9298_v4 }
 0x914   : > { %v5331_v42 = vrot.slane %v5051_v44, %v9316_v9 }
 0x916   : > { %v5332_v1 = vsel %vm5291_vm4, %v5331_v42, %v5327_v19  ;;  %v5126_v54 = vpop.xlane.xlu1 %5125 }
 0x917   : > { %v5060_v32 = vpop.xlane.xlu0 %5059  ;;  %v5450_v38 = vrot.slane %v5126_v54, %v9334_v47 }
 0x918   : > { %v5345_v61 = vrot.slane %v5060_v32, %v9301_v46 }
 0x919   : > { %v5451_v22 = vsel %vm5298_vm5, %v5450_v38, %v5446_v23 }
 0x91a   : > { %v5346_v62 = vsel %vm5284_vm3, %v5345_v61, %v5341_v58  ;;  %v5147_v24 = vpop.xlane.xlu1 %5146 }
 0x91b   : > { %v5138_v0 = vpop.xlane.xlu0 %5137  ;;  %v5483_v41 = vrot.slane %v5147_v24, %v9316_v9 }
 0x91c   : > { %v5469_v34 = vrot.slane %v5138_v0, %v9334_v47 }
 0x91d   : > { %v5484_v37 = vsel %vm5291_vm4, %v5483_v41, %v5479_v11 }
 0x91e   : > { %v5470_v40 = vsel %vm5298_vm5, %v5469_v34, %v5465_v17  ;;  %v5156_v59 = vpop.xlane.xlu1 %5155 }
 0x91f   : > { %v5599_v5 = vsel %vm5585_vm6, %v5470_v40, %v5451_v22  ;;  %v5153_v12 = vpop.xlane.xlu0 %5152  ;;  %v5497_v63 = vrot.slane %v5156_v59, %v9301_v46 }
 0x920   : > { %v5493_v60 = vrot.slane %v5153_v12, %v9298_v4 }
 0x922   : > { %v5498_v10 = vsel %vm5284_vm3, %v5497_v63, %v5493_v60  ;;  %v5063_v51 = vpop.xlane.xlu1 %5062 }
 0x923   : > { %v5054_v53 = vpop.xlane.xlu0 %5053  ;;  %v5350_v35 = vrot.slane %v5063_v51, %v9316_v9 }
 0x924   : > { %v5336_v27 = vrot.slane %v5054_v53, %v9334_v47 }
 0x925   : > { %v5351_v28 = vsel %vm5291_vm4, %v5350_v35, %v5346_v62 }
 0x926   : > { %v5337_v16 = vsel %vm5298_vm5, %v5336_v27, %v5332_v1  ;;  %v5072_v14 = vpop.xlane.xlu1 %5071 }
 0x927   : > { %v5588_v3 = vsel %vm5587_vm7, %v5337_v16, %v5586_v15  ;;  %v5069_v8 = vpop.xlane.xlu0 %5068  ;;  %v5364_v22 = vrot.slane %v5072_v14, %v9301_v46 }
 0x928   : > { %v5360_v62 = vrot.slane %v5069_v8, %v9298_v4 }
 0x92a   : > { %v5159_v45 = vpop.xlane.xlu1 %5158  ;;  %v5365_v51 = vsel %vm5284_vm3, %v5364_v22, %v5360_v62 }
 0x92b   : > { %v5150_v33 = vpop.xlane.xlu0 %5149  ;;  %v5502_v17 = vrot.slane %v5159_v45, %v9316_v9 }
 0x92c   : > { %v5488_v57 = vrot.slane %v5150_v33, %v9334_v47 }
 0x92d   : > { %v5503_v30 = vsel %vm5291_vm4, %v5502_v17, %v5498_v10 }
 0x92e   : > { %v5489_v6 = vsel %vm5298_vm5, %v5488_v57, %v5484_v37  ;;  %v5168_v55 = vpop.xlane.xlu1 %5167 }
 0x92f   : > { %v5600_v43 = vsel %vm5587_vm7, %v5489_v6, %v5599_v5  ;;  %v5165_v48 = vpop.xlane.xlu0 %5164  ;;  %v5516_v24 = vrot.slane %v5168_v55, %v9301_v46 }
 0x930   : > { %v5512_v0 = vrot.slane %v5165_v48, %v9298_v4 }
 0x932   : > { %v5075_v18 = vpop.xlane.xlu1 %5074  ;;  %v5517_v53 = vsel %vm5284_vm3, %v5516_v24, %v5512_v0 }
 0x933   : > { %v5066_v19 = vpop.xlane.xlu0 %5065  ;;  %v5369_v41 = vrot.slane %v5075_v18, %v9316_v9 }
 0x934   : > { %v5355_v26 = vrot.slane %v5066_v19, %v9334_v47 }
 0x935   : > { %v5370_v8 = vsel %vm5291_vm4, %v5369_v41, %v5365_v51 }
 0x936   : > { %v5356_v25 = vsel %vm5298_vm5, %v5355_v26, %v5351_v28  ;;  %v5084_v52 = vpop.xlane.xlu1 %5083 }
 0x937   : > { %v9365_v36 = vsel %vm5589_vm8, %v5356_v25, %v5588_v3  ;;  %v5081_v20 = vpop.xlane.xlu0 %5080  ;;  %v5383_v34 = vrot.slane %v5084_v52, %v9301_v46 }
 0x938   : > { %v5379_v37 = vrot.slane %v5081_v20, %v9298_v4 }
 0x93a   : > { %v5171_v23 = vpop.xlane.xlu1 %5170  ;;  %v5384_v35 = vsel %vm5284_vm3, %v5383_v34, %v5379_v37 }
 0x93b   : > { %v5162_v7 = vpop.xlane.xlu0 %5161  ;;  %v5521_v59 = vrot.slane %v5171_v23, %v9316_v9 }
 0x93c   : > { %v5507_v2 = vrot.slane %v5162_v7, %v9334_v47 }
 0x93d   : > { %v5522_v45 = vsel %vm5291_vm4, %v5521_v59, %v5517_v53 }
 0x93e   : > { %v5508_v39 = vsel %vm5298_vm5, %v5507_v2, %v5503_v30  ;;  %v5180_v31 = vpop.xlane.xlu1 %5179 }
 0x93f   : > { %v9371_v11 = vsel %vm5589_vm8, %v5508_v39, %v5600_v43  ;;  %v5177_v56 = vpop.xlane.xlu0 %5176  ;;  %v5535_v12 = vrot.slane %v5180_v31, %v9301_v46 }
 0x940   : > { %v5531_v63 = vrot.slane %v5177_v56, %v9298_v4 }
 0x942   : > { %v5087_v50 = vpop.xlane.xlu1 %5086  ;;  %v5536_v33 = vsel %vm5284_vm3, %v5535_v12, %v5531_v63  ;;  %v5616_v12 = vld [vmem:[%s9469_s9 + $0x8] sm:$0xff]  ;;  %v5615_v63 = vld [vmem:[%s9469_s9] sm:$0xff] }
 0x943   : > { %v5078_v29 = vpop.xlane.xlu0 %5077  ;;  %v5388_v60 = vrot.slane %v5087_v50, %v9316_v9 }
 0x944   : > { %v5374_v10 = vrot.slane %v5078_v29, %v9334_v47 }
 0x945   : > { %v5389_v57 = vsel %vm5291_vm4, %v5388_v60, %v5384_v35 }
 0x946   : > { %v5096_v49 = vpop.xlane.xlu1 %5095  ;;  %v5375_v6 = vsel %vm5298_vm5, %v5374_v10, %v5370_v8 }
 0x947   : > { %v5093_v21 = vpop.xlane.xlu0 %5092  ;;  %v5402_v27 = vrot.slane %v5096_v49, %v9301_v46 }
 0x948   : > { %v5398_v28 = vrot.slane %v5093_v21, %v9298_v4 }
 0x94a   : > { %v5183_v15 = vpop.xlane.xlu1 %5182  ;;  %v5403_v52 = vsel %vm5284_vm3, %v5402_v27, %v5398_v28 }
 0x94b   : > { %v5174_v13 = vpop.xlane.xlu0 %5173  ;;  %v5540_v43 = vrot.slane %v5183_v15, %v9316_v9 }
 0x94c   : > { %v5526_v16 = vrot.slane %v5174_v13, %v9334_v47 }
 0x94d   : > { %v5541_v50 = vsel %vm5291_vm4, %v5540_v43, %v5536_v33 }
 0x94e   : > { %v5192_v44 = vpop.xlane.xlu1 %5191  ;;  %v5527_v20 = vsel %vm5298_vm5, %v5526_v16, %v5522_v45 }
 0x94f   : > { %v5189_v42 = vpop.xlane.xlu0 %5188  ;;  %v5554_v55 = vrot.slane %v5192_v44, %v9301_v46 }
 0x950   : > { %v5550_v48 = vrot.slane %v5189_v42, %v9298_v4  ;;  %v5602_v42 = vsel %vm5591_vm0, %v5527_v20, %v9371_v11 }
 0x952   : > { %v5099_v1 = vpop.xlane.xlu1 %5098  ;;  %v5555_v29 = vsel %vm5284_vm3, %v5554_v55, %v5550_v48 }
 0x953   : > { %v5090_v54 = vpop.xlane.xlu0 %5089  ;;  %v5407_v18 = vrot.slane %v5099_v1, %v9316_v9 }
 0x954   : > { %v5393_v19 = vrot.slane %v5090_v54, %v9334_v47 }
 0x955   : > { %v5408_v15 = vsel %vm5291_vm4, %v5407_v18, %v5403_v52 }
 0x956   : > { %v9373_v32 = vpop.xlane.xlu1 %5107  ;;  %v5394_v13 = vsel %vm5298_vm5, %v5393_v19, %v5389_v57 }
 0x957   : > { %v9375_v58 = vpop.xlane.xlu0 %5104  ;;  %v5421_v17 = vrot.slane %v9373_v32, %v9301_v46 }
 0x958   : > { %v5417_v30 = vrot.slane %v9375_v58, %v9298_v4 }
 0x95a   : > { %v5195_v38 = vpop.xlane.xlu1 %5194  ;;  %v5422_v58 = vsel %vm5284_vm3, %v5421_v17, %v5417_v30 }
 0x95b   : > { %v5186_v61 = vpop.xlane.xlu0 %5185  ;;  %v5559_v26 = vrot.slane %v5195_v38, %v9316_v9 }
 0x95c   : > { %v5545_v25 = vrot.slane %v5186_v61, %v9334_v47 }
 0x95d   : > { %v5560_v44 = vsel %vm5291_vm4, %v5559_v26, %v5555_v29 }
 0x95e   : > { %v5204_v40 = vpop.xlane.xlu1 %5203 }
 0x95f   : > { %v5201_v5 = vpop.xlane.xlu0 %5200  ;;  %v5573_v39 = vrot.slane %v5204_v40, %v9301_v46  ;;  %v5546_v46 = vsel %vm5298_vm5, %v5545_v25, %v5541_v50 }
 0x960   : > { %v5569_v31 = vrot.slane %v5201_v5, %v9298_v4  ;;  %v5592_v4 = vsel %vm5591_vm0, %v5375_v6, %v9365_v36  ;;  %v5603_v11 = vsel %vm5593_vm15, %v5546_v46, %v5602_v42 }
 0x961   : > { %v5594_v24 = vsel %vm5593_vm15, %v5394_v13, %v5592_v4 }
 0x962   : > { %v5111_v3 = vpop.xlane.xlu1 %5110  ;;  %v5574_v38 = vsel %vm5284_vm3, %v5573_v39, %v5569_v31 }
 0x963   : > { %v5102_v14 = vpop.xlane.xlu0 %5101  ;;  %v5426_v49 = vrot.slane %v5111_v3, %v9316_v9 }
 0x964   : > { %v5412_v23 = vrot.slane %v5102_v14, %v9334_v47 }
 0x965   : > { %v5427_v62 = vsel %vm5291_vm4, %v5426_v49, %v5422_v58 }
 0x966   : > { %v5207_v7 = vpop.xlane.xlu1 %5206  ;;  %v5413_v1 = vsel %vm5298_vm5, %v5412_v23, %v5408_v15 }
 0x967   : > { %v5198_v2 = vpop.xlane.xlu0 %5197  ;;  %v5578_v21 = vrot.slane %v5207_v7, %v9316_v9  ;;  %v5596_v37 = vsel %vm5595_vm13, %v5413_v1, %v5594_v24 }
 0x968   : > { %v5564_v56 = vrot.slane %v5198_v2, %v9334_v47 }
 0x969   : > { %v5579_v36 = vsel %vm5291_vm4, %v5578_v21, %v5574_v38 }
 0x96a   : > { %v5565_v54 = vsel %vm5298_vm5, %v5564_v56, %v5560_v44  ;;  %v5210_v32 = vpop.xlane.xlu1 %5209 }
 0x96b   : > { %v5114_v9 = vpop.xlane.xlu0 %5113  ;;  %v5583_v61 = vrot.slane %v5210_v32, %v9334_v47  ;;  %v5604_v41 = vsel %vm5595_vm13, %v5565_v54, %v5603_v11 }
 0x96c   : > { %v5431_v22 = vrot.slane %v5114_v9, %v9334_v47 }
 0x96d   : > { %v5584_v0 = vsel %vm5298_vm5, %v5583_v61, %v5579_v36 }
 0x96e   : > { %v5432_v34 = vsel %vm5298_vm5, %v5431_v22, %v5427_v62  ;;  %v5605_v47 = vsel %vm5597_vm2, %v5584_v0, %v5604_v41 }
 0x96f   : > { %v5598_v40 = vsel %vm5597_vm2, %v5432_v34, %v5596_v37  ;;  %v5612_v5 = vsel %vm5608_vm9, %v5605_v47, 0.0 }
 0x970   : > { %v5609_v59 = vsel %vm5608_vm9, %v5598_v40, 0.0  ;;  %5613 = vadd.xlane.f32.xlu1 %v5612_v5 }
 0x971   : > { %5610 = vadd.xlane.f32.xlu0 %v5609_v59 }
 0x9fd   : > { %v5614_v60 = vpop.xlane.xlu1 %5613 }
 0x9fe   : > { %v5611_v10 = vpop.xlane.xlu0 %5610  ;;  %v5618_v51 = vadd.f32 %v5616_v12, %v5614_v60 }
 0x9ff   : > { %v5617_v53 = vadd.f32 %v5615_v63, %v5611_v10 }
 0xa00   : > { %5621 = vst.msk [vmem:[%s6948_s23 + $0x8] sm:$0xff] %vm9802_vm10, %v5618_v51 }
 0xa01   : > { %5620 = vst.msk [vmem:[%s6948_s23] sm:$0xff] %vm9803_vm14, %v5617_v53 }
 0xa02 PF: > { %s20_s13 = sadd.s32 1, %s6827_s13  }
 0xa03   : > { %p17_p5 = scmp.ge.s32.totalorder %s20_s13, 4  }
 0xa05   :  { %19 = sbr.rel (!%p17_p5) target bundleno = 1 (0x1), region = 109 }

</bundles_post_ra>
